<compile_context>
chip_gen: v7x
topology: tpu7x:2x2x1
jax: 0.10.0
libtpu: 0.0.40
codegen_flags: <defaults>
</compile_context>

<pallas_src>
import functools

import jax
import jax.numpy as jnp
import numpy as np
from jax.experimental import pallas as pl
from jax.experimental.pallas import tpu as pltpu

_MIB = 1024 * 1024


def _round_up(x, m):
    return ((x + m - 1) // m) * m


def _tpu_config():
    """Per-generation (vmem_budget_bytes, use_bf16_activation)."""
    try:
        kind = jax.devices()[0].device_kind.lower()
    except Exception:
        kind = ""
    if "v7" in kind:
        return 48 * _MIB, True      # 64 MiB VMEM per TensorCore, bf16 EUP
    if "v6" in kind:
        return 96 * _MIB, True      # 128 MiB VMEM, bf16 EUP
    if "v5" in kind:
        return 96 * _MIB, False     # 128 MiB VMEM, no bf16 VPU/EUP
    return 32 * _MIB, False         # unknown/older: stay within default scoped limit


def _choose_tm(M, K, budget, itemsize):
    """M tile: multiple of 16 (bf16 sublanes), 128/256 preferred, >= 2 grid steps
    for large M so both v7x TensorCores are engaged via the 'parallel' axis."""
    if M >= 512:
        tm = 256
    elif M >= 256:
        tm = 128
    else:
        tm = max(16, _round_up(M, 16))
    # Keep the double-buffered x tile to a fraction of the VMEM budget.
    while tm > 16 and 2 * tm * K * itemsize > budget // 4:
        tm = max(16, _round_up(tm // 2, 16))
    return tm


def _choose_th(H, K, N, tm, budget, cb, out_b):
    """Largest 128-aligned divisor of H whose Path-B footprint fits the budget."""
    def need(th):
        return (2 * (tm * K + K * th + th * N) * cb   # x / W1-chunk / W2-chunk (x2 buffers)
                + 2 * (th + N) * 4                    # f32 biases (x2 buffers)
                + 2 * tm * N * out_b                  # output tile (x2 buffers)
                + tm * N * 4                          # f32 accumulator
                + tm * th * (4 + cb))                 # f32 h + cast intermediate

    start = (min(H, 2048) // 128) * 128
    best = None
    th = start
    while th >= 128:
        if H % th == 0:
            if best is None:
                best = th
            if need(th) <= budget:
                return th
        th -= 128
    # May be None (no layout-legal 128-aligned divisor); caller falls back.
    return best


def _ffn_kernel_resident(x_ref, w1_ref, b1_ref, w2_ref, b2_ref, o_ref, *, act_dtype):
    # First linear on the MXU, f32 accumulation; bias add in f32.
    h = jnp.dot(x_ref[...], w1_ref[...], preferred_element_type=jnp.float32)
    h = (h + b1_ref[...]).astype(act_dtype)
    # SiLU: bf16 on v6e/v7x (bf16 EUP), f32 on v5e.
    h = h * jax.nn.sigmoid(h)
    # Second linear, f32 accumulation, bias added once; write output directly
    # (no accumulator needed when the whole hidden dim is resident).
    y = jnp.dot(h.astype(w2_ref.dtype), w2_ref[...],
                preferred_element_type=jnp.float32)
    o_ref[...] = (y + b2_ref[...]).astype(o_ref.dtype)


def _ffn_kernel_hsplit(x_ref, w1_ref, b1_ref, w2_ref, b2_ref, o_ref, acc_ref, *,
                       act_dtype):
    hj = pl.program_id(1)

    @pl.when(hj == 0)
    def _():
        acc_ref[...] = jnp.zeros_like(acc_ref)

    h = jnp.dot(x_ref[...], w1_ref[...], preferred_element_type=jnp.float32)
    h = (h + b1_ref[...]).astype(act_dtype)
    h = h * jax.nn.sigmoid(h)
    acc_ref[...] += jnp.dot(h.astype(w2_ref.dtype), w2_ref[...],
                            preferred_element_type=jnp.float32)

    @pl.when(hj == pl.num_programs(1) - 1)
    def _():
        o_ref[...] = (acc_ref[...] + b2_ref[...]).astype(o_ref.dtype)


def ffn_pallas(x, w1, b1, w2, b2, *, tm=None, th=None,
               compute_dtype=jnp.bfloat16, interpret=False):
    """Fused FFN: silu(x @ w1 + b1) @ w2 + b2.

    x: (..., K);  w1: (K, H);  b1: (H,) or (1, H);  w2: (H, N);  b2: (N,) or (1, N).
    Pass bf16 w1/w2 to avoid a per-call cast (weights are used as-is when their
    dtype already matches compute_dtype).
    """
    orig_shape = x.shape
    K = orig_shape[-1]
    x2 = x.reshape(-1, K)
    M = x2.shape[0]
    H = w1.shape[1]
    N = w2.shape[1]
    out_dtype = x.dtype

    budget, bf16_act = _tpu_config()
    act_dtype = compute_dtype if bf16_act else jnp.float32
    cb = jnp.dtype(compute_dtype).itemsize
    out_b = jnp.dtype(out_dtype).itemsize

    # ---- tile selection --------------------------------------------------
    if tm is None:
        tm = _choose_tm(M, K, budget, cb)
    tm = max(16, _round_up(min(tm, _round_up(M, 16)), 16))
    m_pad = _round_up(M, tm)
    grid_m = m_pad // tm

    # Path A (full weight residency) if bf16 W1+W2 (+x/out tiles + intermediates)
    # fit the per-generation VMEM budget; otherwise Path B (H reduction axis).
    need_resident = (2 * (tm * K + K * H + H * N) * cb
                     + 2 * (H + N) * 4
                     + 2 * tm * N * out_b
                     + tm * H * (4 + cb))
    if th is None:
        if need_resident <= budget:
            th = H
        else:
            th = _choose_th(H, K, N, tm, budget, cb, out_b)
            if th is None:
                # No layout-legal 128-aligned H split; accept full residency.
                # TODO(synk): pad H / add a K reduction axis for awkward huge shapes.
                th = H
    if H % th != 0:
        th = H
    h_steps = H // th

    # ---- operand prep (cast only when needed; pre-cast weights upstream) --
    xc = x2 if x2.dtype == compute_dtype else x2.astype(compute_dtype)
    if m_pad != M:
        xc = jnp.pad(xc, ((0, m_pad - M), (0, 0)))
    w1c = w1 if w1.dtype == compute_dtype else w1.astype(compute_dtype)
    w2c = w2 if w2.dtype == compute_dtype else w2.astype(compute_dtype)
    b1f = b1.astype(jnp.float32).reshape(1, H)
    b2f = b2.astype(jnp.float32).reshape(1, N)

    cost = pl.CostEstimate(
        flops=2 * M * (K * H + H * N),
        transcendentals=M * H,
        bytes_accessed=(m_pad * K * cb
                        + (grid_m if h_steps > 1 else 1) * (K * H + H * N) * cb
                        + (H + N) * 4
                        + m_pad * N * out_b),
    )

    if h_steps == 1:
        kernel = functools.partial(_ffn_kernel_resident, act_dtype=act_dtype)
        grid_spec = pltpu.PrefetchScalarGridSpec(
            num_scalar_prefetch=0,
            grid=(grid_m,),
            in_specs=[
                pl.BlockSpec((tm, K), lambda i: (i, 0)),   # x row tile (streams)
                pl.BlockSpec((K, H), lambda i: (0, 0)),    # W1 (resident)
                pl.BlockSpec((1, H), lambda i: (0, 0)),    # b1 (resident)
                pl.BlockSpec((H, N), lambda i: (0, 0)),    # W2 (resident)
                pl.BlockSpec((1, N), lambda i: (0, 0)),    # b2 (resident)
            ],
            out_specs=pl.BlockSpec((tm, N), lambda i: (i, 0)),
        )
        dim_sem = ("parallel",)
    else:
        kernel = functools.partial(_ffn_kernel_hsplit, act_dtype=act_dtype)
        grid_spec = pltpu.PrefetchScalarGridSpec(
            num_scalar_prefetch=0,
            grid=(grid_m, h_steps),
            in_specs=[
                pl.BlockSpec((tm, K), lambda i, j: (i, 0)),  # x row tile
                pl.BlockSpec((K, th), lambda i, j: (0, j)),  # W1 hidden chunk
                pl.BlockSpec((1, th), lambda i, j: (0, j)),  # b1 hidden chunk
                pl.BlockSpec((th, N), lambda i, j: (j, 0)),  # W2 hidden chunk
                pl.BlockSpec((1, N), lambda i, j: (0, 0)),   # b2 (resident)
            ],
            out_specs=pl.BlockSpec((tm, N), lambda i, j: (i, 0)),
            scratch_shapes=[pltpu.VMEM((tm, N), jnp.float32)],
        )
        dim_sem = ("parallel", "arbitrary")

    out = pl.pallas_call(
        kernel,
        out_shape=jax.ShapeDtypeStruct((m_pad, N), out_dtype),
        grid_spec=grid_spec,
        compiler_params=pltpu.CompilerParams(
            dimension_semantics=dim_sem,
            vmem_limit_bytes=int(budget),
        ),
        cost_estimate=cost,
        interpret=interpret,
    )(xc, w1c, b1f, w2c, b2f)

    if m_pad != M:
        out = out[:M]
    return out.reshape(orig_shape[:-1] + (N,))


def ffn_ref(x, w1, b1, w2, b2, compute_dtype=jnp.bfloat16):
    # Reference with the same bf16-in / f32-accumulate precision policy.
    xc = x.reshape(-1, x.shape[-1]).astype(compute_dtype)
    h = jnp.dot(xc, w1.astype(compute_dtype),
                preferred_element_type=jnp.float32) + b1.astype(jnp.float32).reshape(1, -1)
    h = h * jax.nn.sigmoid(h)
    y = jnp.dot(h.astype(compute_dtype), w2.astype(compute_dtype),
                preferred_element_type=jnp.float32) + b2.astype(jnp.float32).reshape(1, -1)
    return y.astype(x.dtype).reshape(x.shape[:-1] + (w2.shape[1],))


if __name__ == "__main__":
    # Small shapes consistent with FFN(input_size, output_size, hidden_dim),
    # layers_num=1 (default): Linear(K->H) -> SiLU -> Linear(H->N).
    M, K, H, N = 256, 128, 1024, 128
    key = jax.random.PRNGKey(0)
    kx, kw1, kb1, kw2, kb2 = jax.random.split(key, 5)

    x = jax.random.normal(kx, (M, K), dtype=jnp.float32)

    # Deterministic PyTorch-style uniform init.
    bound1 = 1.0 / np.sqrt(K)
    w1 = jax.random.uniform(kw1, (K, H), jnp.float32, -bound1, bound1)
    b1 = jax.random.uniform(kb1, (1, H), jnp.float32, -bound1, bound1)
    bound2 = 1.0 / np.sqrt(H)
    w2 = jax.random.uniform(kw2, (H, N), jnp.float32, -bound2, bound2)
    b2 = jax.random.uniform(kb2, (1, N), jnp.float32, -bound2, bound2)

    ref = np.asarray(ffn_ref(x, w1, b1, w2, b2))

    # Pre-cast weights to bf16 ONCE, outside the per-call path (as a real model
    # holding bf16 params would), so the kernel call adds no wrapper-side casts.
    w1_bf16 = w1.astype(jnp.bfloat16)
    w2_bf16 = w2.astype(jnp.bfloat16)

    # Path A: full weight residency, single 'parallel' grid axis over M
    # (tm=128 => grid=(2,), so both v7x TensorCores get work).
    out_a = jax.block_until_ready(ffn_pallas(x, w1_bf16, b1, w2_bf16, b2))
    np.testing.assert_allclose(np.asarray(out_a), ref, rtol=2e-2, atol=2e-2)

    # Path B: hidden-dim reduction with the f32 VMEM accumulator (forced via th<H)
    # to exercise the large-H fallback as well.
    out_b = jax.block_until_ready(ffn_pallas(x, w1_bf16, b1, w2_bf16, b2, th=256))
    np.testing.assert_allclose(np.asarray(out_b), ref, rtol=2e-2, atol=2e-2)

    print("KERNEL_OK")
</pallas_src>

<mosaic_0001>
module attributes {stable_mosaic.version = 11 : i64} {
  func.func @_ffn_kernel_resident(%arg0: i32, %arg1: memref<128x128xbf16, #tpu.memory_space<vmem>>, %arg2: memref<128x1024xbf16, #tpu.memory_space<vmem>>, %arg3: memref<1x1024xf32, #tpu.memory_space<vmem>>, %arg4: memref<1024x128xbf16, #tpu.memory_space<vmem>>, %arg5: memref<1x128xf32, #tpu.memory_space<vmem>>, %arg6: memref<128x128xf32, #tpu.memory_space<vmem>>) attributes {dimension_semantics = [#tpu.dimension_semantics<parallel>], iteration_bounds = array<i64: 2>, scalar_prefetch = 0 : i64, scratch_operands = 0 : i64, tpu.core_type = #tpu.core_type<tc>, window_params = [{transform_indices = @transform_0, window_bounds = array<i64: 128, 128>}, {pipeline_mode = #tpu.pipeline_mode<synchronous>, transform_indices = @transform_1, window_bounds = array<i64: 128, 1024>}, {pipeline_mode = #tpu.pipeline_mode<synchronous>, transform_indices = @transform_2, window_bounds = array<i64: 1, 1024>}, {pipeline_mode = #tpu.pipeline_mode<synchronous>, transform_indices = @transform_3, window_bounds = array<i64: 1024, 128>}, {pipeline_mode = #tpu.pipeline_mode<synchronous>, transform_indices = @transform_4, window_bounds = array<i64: 1, 128>}, {transform_indices = @transform_5, window_bounds = array<i64: 128, 128>}]} {
    %c0 = arith.constant 0 : index
    %c0_0 = arith.constant 0 : index
    %0 = vector.load %arg1[%c0, %c0_0] : memref<128x128xbf16, #tpu.memory_space<vmem>>, vector<128x128xbf16>
    %c0_1 = arith.constant 0 : index
    %c0_2 = arith.constant 0 : index
    %1 = vector.load %arg2[%c0_1, %c0_2] : memref<128x1024xbf16, #tpu.memory_space<vmem>>, vector<128x1024xbf16>
    %cst = arith.constant dense<0.000000e+00> : vector<128x1024xf32>
    %2 = tpu.matmul %0, %1, %cst {dimension_numbers = #tpu.dot_dimension_numbers<[1], [0], [0], [1], [0, 0, 1, 1], [], []>} : vector<128x128xbf16>, vector<128x1024xbf16>, vector<128x1024xf32> -> vector<128x1024xf32>
    %c0_3 = arith.constant 0 : index
    %c0_4 = arith.constant 0 : index
    %3 = vector.load %arg3[%c0_3, %c0_4] : memref<1x1024xf32, #tpu.memory_space<vmem>>, vector<1x1024xf32>
    %4 = vector.broadcast %3 : vector<1x1024xf32> to vector<128x1024xf32>
    %5 = arith.addf %2, %4 : vector<128x1024xf32>
    %6 = arith.negf %5 : vector<128x1024xf32>
    %7 = math.exp %6 : vector<128x1024xf32>
    %cst_5 = arith.constant 1.000000e+00 : f32
    %8 = vector.broadcast %cst_5 : f32 to vector<128x1024xf32>
    %9 = arith.addf %8, %7 : vector<128x1024xf32>
    %10 = arith.divf %8, %9 : vector<128x1024xf32>
    %11 = arith.mulf %5, %10 : vector<128x1024xf32>
    %12 = arith.truncf %11 : vector<128x1024xf32> to vector<128x1024xbf16>
    %c0_6 = arith.constant 0 : index
    %c0_7 = arith.constant 0 : index
    %13 = vector.load %arg4[%c0_6, %c0_7] : memref<1024x128xbf16, #tpu.memory_space<vmem>>, vector<1024x128xbf16>
    %cst_8 = arith.constant dense<0.000000e+00> : vector<128x128xf32>
    %14 = tpu.matmul %12, %13, %cst_8 {dimension_numbers = #tpu.dot_dimension_numbers<[1], [0], [0], [1], [0, 0, 1, 1], [], []>} : vector<128x1024xbf16>, vector<1024x128xbf16>, vector<128x128xf32> -> vector<128x128xf32>
    %c0_9 = arith.constant 0 : index
    %c0_10 = arith.constant 0 : index
    %15 = vector.load %arg5[%c0_9, %c0_10] : memref<1x128xf32, #tpu.memory_space<vmem>>, vector<1x128xf32>
    %16 = vector.broadcast %15 : vector<1x128xf32> to vector<128x128xf32>
    %17 = arith.addf %14, %16 : vector<128x128xf32>
    %c0_11 = arith.constant 0 : index
    %c0_12 = arith.constant 0 : index
    %18 = vector.load %arg6[%c0_11, %c0_12] : memref<128x128xf32, #tpu.memory_space<vmem>>, vector<128x128xf32>
    tpu.vector_store %arg6[%c0_11, %c0_12], %17 {strides = array<i32>} : memref<128x128xf32, #tpu.memory_space<vmem>>, vector<128x128xf32>,
    return
  }
  func.func @transform_0(%arg0: i32) -> (i32, i32) {
    %c0_i32 = arith.constant 0 : i32
    %c0_i32_0 = arith.constant 0 : i32
    return %arg0, %c0_i32 : i32, i32
  }
  func.func @transform_1(%arg0: i32) -> (i32, i32) {
    %c0_i32 = arith.constant 0 : i32
    %c0_i32_0 = arith.constant 0 : i32
    %c0_i32_1 = arith.constant 0 : i32
    return %c0_i32, %c0_i32_0 : i32, i32
  }
  func.func @transform_2(%arg0: i32) -> (i32, i32) {
    %c0_i32 = arith.constant 0 : i32
    %c0_i32_0 = arith.constant 0 : i32
    %c0_i32_1 = arith.constant 0 : i32
    return %c0_i32, %c0_i32_0 : i32, i32
  }
  func.func @transform_3(%arg0: i32) -> (i32, i32) {
    %c0_i32 = arith.constant 0 : i32
    %c0_i32_0 = arith.constant 0 : i32
    %c0_i32_1 = arith.constant 0 : i32
    return %c0_i32, %c0_i32_0 : i32, i32
  }
  func.func @transform_4(%arg0: i32) -> (i32, i32) {
    %c0_i32 = arith.constant 0 : i32
    %c0_i32_0 = arith.constant 0 : i32
    %c0_i32_1 = arith.constant 0 : i32
    return %c0_i32, %c0_i32_0 : i32, i32
  }
  func.func @transform_5(%arg0: i32) -> (i32, i32) {
    %c0_i32 = arith.constant 0 : i32
    %c0_i32_0 = arith.constant 0 : i32
    return %arg0, %c0_i32 : i32, i32
  }
}

</mosaic_0001>

<bundles_post_ra>
// kernel: tpu_custom_call.1
= control target key start
LH: loop header
LB: loop body
LE: loop exit
PB: predicated region body
PF: predicated region fallthrough
CT: control target
= control target key end

     0   :  { %10 = vsyncpa [#allocation3], 0  ;;  %s6211_s0 = inlined_call_operand.hbm [shape: bf16[256,128], index: 0, kind: input, shape index: {}]   ;;  %s6212_s1 = inlined_call_operand.hbm [shape: bf16[128,1024], index: 1, kind: input, shape index: {}]   ;;  %s6213_s2 = inlined_call_operand.hbm [shape: f32[1,1024], index: 2, kind: input, shape index: {}]   ;;  %s6214_s3 = inlined_call_operand.hbm [shape: bf16[1024,128], index: 3, kind: input, shape index: {}]   ;;  %s6215_s4 = inlined_call_operand.vmem [shape: f32[1,128], index: 4, kind: input, shape index: {}]   ;;  %s6216_s5 = inlined_call_operand.hbm [shape: f32[256,128], index: 5, kind: output, shape index: {}]  }
   0x1   :  { %12 = vsyncpa [#allocation3 + $0x1], 0 }
   0x2   :  { %13 = vsyncpa [#allocation6], 0 }
   0x3   :  { %14 = vsyncpa [#allocation9], 0 }
   0x4   :  { %15 = vsyncpa [#allocation4], 0 }
   0x5   :  { %17 = vsyncpa [#allocation4 + $0x1], 0  ;;  %s4673_s18 = smov 0   ;;  %s4675_s19 = smov 0  }
   0x6   :  { %s4677_s20 = smov 0   ;;  %s4679_s21 = smov 0  }
   0x7 LB: > { %s4694_s22 = sadd.s32 4294967295, %s4629_s21   ;;  %s3229_s23 = sadd.s32 4294967294, %s4629_s21   ;;  %s4629_s21 = sphi %s4679_s21, %s6375_s21   ;;  %s4625_s20 = sphi %s4677_s20, %s6374_s20   ;;  %s4621_s19 = sphi %s4675_s19, %s6373_s19   ;;  %s4617_s18 = sphi %s4673_s18, %s6372_s18  }
   0x8   : > { %p43_p0 = scmp.ne.s32.totalorder %s4621_s19, %s4617_s18  ;;  %p6217_p1 = scmp.eq.s32.totalorder %s4694_s22, 0 }
   0x9   : > { %p157_p3 = scmp.eq.s32.totalorder %s3229_s23, 1  ;;  %p3230_p5 = scmp.ge.s32.totalorder %s4629_s21, 1 }
   0xa   : > { %p4703_p4 = por %p6217_p1, %p43_p0  ;;  %p164_p7 = scmp.lt.s32.totalorder %s4629_s21, 3 }
   0xb   : > { %p4708_p6 = por %p157_p3, %p43_p0  ;;  %s4631_s27 = smov [#allocation5]  }
   0xc   : > { %s6225_s24 = scalar_select %p4703_p4, 1, 0 }
   0xd   : > { %s6226_s25 = scalar_select %p4708_p6, 1, 0 }
   0xe   : > { %p4713_p8 = pnand %p3230_p5, %p164_p7  ;;  %s176_s28 = sshll.u32 %s4631_s27, 4  ;;  %s4717_s28 = int_to_ptr.vmem [resolvable:$true] %s176_s28 }
   0xf   : > { %s4632_s30 = smov [#allocation7]   ;;  %s4633_s7 = smov [#allocation8]  }
  0x10   : > { %s6227_s26 = scalar_select %p4713_p8, 1, 0 }
  0x11   : > { %p3788_p9 = pneg %p4713_p8  ;;  %s190_s6 = sshll.u32 %s4632_s30, 4  ;;  %s4728_s6 = int_to_ptr.vmem [resolvable:$true] %s190_s6 }
  0x12   : > { %s4730_s8 = sshll.u32 %s4633_s7, 4  ;;  %s4441_s11 = scalar_lea.hbm %s6212_s1, 8192  ;;  %s201_s8 = int_to_ptr.vmem [resolvable:$true] %s4730_s8 }
  0x13   : > { %p4724_p11 = pnand %p3788_p9, %p6217_p1  ;;  %p4442_p12 = scmp.ne.s32.totalorder %s6212_s1, %s4441_s11 }
  0x14   : > { %p4448_p5 = scmp.lt.u32.totalorder %s4441_s11, %s6212_s1 }
  0x15   : > { %p4740_p13 = pneg %p4724_p11 }
  0x17   : > { %p4444_p0 = pnand %p4740_p13, %p4442_p12 }
  0x19   : > { %p4445_p3 = pneg %p4444_p0 }
  0x1b   : > { %p4450_p7 = pnand %p4448_p5, %p4445_p3 }
  0x1d   : > { %4453 = shalt.err (!%p4450_p7)
}
  0x1e   : > { %s4454_s17 = scalar_lea.vmem %s4717_s28, 8192  ;;  %p4462_p2 = scmp.lt.s32.totalorder %s4717_s28, %s4717_s28 }
  0x1f   : > { %p4455_p9 = scmp.ne.s32.totalorder %s4717_s28, %s4454_s17  ;;  %p4463_p6 = scmp.lt.s32.totalorder %s4454_s17, %s4454_s17 }
  0x21   : > { %p4457_p10 = pnand %p4455_p9, %p4740_p13  ;;  %p4464_p12 = por %p4463_p6, %p4462_p2 }
  0x23   : > { %p4458_p1 = pneg %p4457_p10 }
  0x25   : > { %p4465_p0 = pnand %p4464_p12, %p4458_p1 }
  0x27   : > { %4468 = shalt.err (!%p4465_p0)
}
  0x28   : > { %s4634_s23 = smov 512   ;;  %s4635_s27 = smov 32  }
  0x29   : > { %3791 = dma.hbm_to_vmem [thread:$0]  (!%p4724_p11), %s6212_s1, 8192, %s4717_s28, [#allocation6], %s4634_s23, %s4634_s23, %s4635_s27  }
  0x2a   : > { %s4469_s11 = scalar_lea.hbm %s6213_s2, 128 }
  0x2b   : > { %p4470_p2 = scmp.ne.s32.totalorder %s6213_s2, %s4469_s11  ;;  %p4476_p10 = scmp.lt.u32.totalorder %s4469_s11, %s6213_s2 }
  0x2d   : > { %p4472_p1 = pnand %p4470_p2, %p4740_p13 }
  0x2f   : > { %p4473_p6 = pneg %p4472_p1 }
  0x31   : > { %p4478_p3 = pnand %p4476_p10, %p4473_p6 }
  0x33   : > { %4481 = shalt.err (!%p4478_p3)
}
  0x34   : > { %s4482_s28 = scalar_lea.vmem %s4728_s6, 128  ;;  %p4490_p12 = scmp.lt.s32.totalorder %s4728_s6, %s4728_s6 }
  0x35   : > { %p4483_p5 = scmp.ne.s32.totalorder %s4728_s6, %s4482_s28  ;;  %p4491_p0 = scmp.lt.s32.totalorder %s4482_s28, %s4482_s28 }
  0x37   : > { %p4485_p7 = pnand %p4483_p5, %p4740_p13  ;;  %p4492_p2 = por %p4491_p0, %p4490_p12 }
  0x39   : > { %p4486_p9 = pneg %p4485_p7 }
  0x3b   : > { %p4493_p1 = pnand %p4492_p2, %p4486_p9 }
  0x3d   : > { %4496 = shalt.err (!%p4493_p1)
}
  0x3e   : > { %3794 = dma.hbm_to_vmem [thread:$0]  (!%p4724_p11), %s6213_s2, 128, %s4728_s6, [#allocation6]  }
  0x3f   : > { %s4497_s7 = scalar_lea.hbm %s6214_s3, 8192 }
  0x40   : > { %p4498_p6 = scmp.ne.s32.totalorder %s6214_s3, %s4497_s7  ;;  %p4504_p5 = scmp.lt.u32.totalorder %s4497_s7, %s6214_s3 }
  0x42   : > { %p4500_p10 = pnand %p4498_p6, %p4740_p13 }
  0x44   : > { %p4501_p3 = pneg %p4500_p10 }
  0x46   : > { %p4506_p7 = pnand %p4504_p5, %p4501_p3 }
  0x48   : > { %4509 = shalt.err (!%p4506_p7)
}
  0x49   : > { %s4510_s13 = scalar_lea.vmem %s201_s8, 8192  ;;  %p4518_p2 = scmp.lt.s32.totalorder %s201_s8, %s201_s8 }
  0x4a   : > { %p4511_p9 = scmp.ne.s32.totalorder %s201_s8, %s4510_s13  ;;  %p4519_p1 = scmp.lt.s32.totalorder %s4510_s13, %s4510_s13 }
  0x4c   : > { %p4513_p12 = pnand %p4511_p9, %p4740_p13  ;;  %p4520_p4 = por %p4519_p1, %p4518_p2 }
  0x4e   : > { %p4514_p0 = pneg %p4513_p12 }
  0x50   : > { %p4521_p8 = pnand %p4520_p4, %p4514_p0 }
  0x52   : > { %4524 = shalt.err (!%p4521_p8)
}
  0x53   : > { %s4636_s6 = smov 64   ;;  %s4637_s14 = smov 4  }
  0x54   : > { %3797 = dma.hbm_to_vmem [thread:$0]  (!%p4724_p11), %s6214_s3, 8192, %s201_s8, [#allocation9], %s4636_s6, %s4636_s6, %s4637_s14  }
  0x55   : > { %s4807_s28 = sadd.s32 1, %s4629_s21   ;;  %s30_s23 = sadd.s32 1, %s4625_s20 }
  0x56   : > { %s27_s17 = ssub.s32 %s4629_s21, %s4807_s28  ;;  %p37_p8 = scmp.ne.s32.totalorder %s4625_s20, %s4621_s19 }
  0x57   : > { %p28_p4 = scmp.eq.s32.totalorder %s27_s17, 0  ;;  %p38_p13 = scmp.eq.s32.totalorder %s4629_s21, 0 }
  0x58   : > { %p3809_p6 = scmp.lt.s32.totalorder %s4629_s21, 2  ;;  %p6230_p3 = scmp.eq.s32.totalorder %s4694_s22, 1 }
  0x59   : > { %s4817_s27 = scalar_select %p28_p4, %s4625_s20, %s30_s23  }
  0x5a   : > { %p39_p10 = por %p38_p13, %p37_p8  ;;  %p4821_p5 = por %p6230_p3, %p37_p8 }
  0x5b   : > { %s217_s30 = sand.u32 1, %s4625_s20   ;;  %s3514_s7 = sshll.u32 %s4629_s21, 10 }
  0x5c   : > { %s3235_s8 = sshll.u32 %s217_s30, 6  ;;  %s4830_s11 = scalar_lea.hbm %s6211_s0, %s3514_s7 }
  0x5d   : > { %s221_s12 = scalar_lea.vmem [#allocation2], %s3235_s8  ;;  %p4832_p11 = pnand %p3809_p6, %p39_p10 }
  0x5e   : > { %s228_s13 = sshll.u32 %s221_s12, 4  ;;  %s4838_s16 = scalar_lea.sflag [#allocation3], %s217_s30  ;;  %s4836_s13 = int_to_ptr.vmem [resolvable:$true] %s228_s13 }
  0x5f   : > { %s4525_s17 = scalar_lea.hbm %s4830_s11, 1024  ;;  %p4527_p9 = pneg %p4832_p11 }
  0x60   : > { %p4526_p7 = scmp.ne.s32.totalorder %s4830_s11, %s4525_s17  ;;  %s4530_s8 = scalar_lea.hbm %s6211_s0, 2048 }
  0x61   : > { %p4531_p2 = scmp.lt.u32.totalorder %s4830_s11, %s6211_s0  ;;  %p4532_p1 = scmp.lt.u32.totalorder %s4530_s8, %s4525_s17 }
  0x62   : > { %p4528_p12 = pnand %p4527_p9, %p4526_p7  ;;  %p4534_p8 = scmp.lt.u32.totalorder %s4525_s17, %s4830_s11 }
  0x63   : > { %p4533_p4 = por %p4532_p1, %p4531_p2 }
  0x64   : > { %p4529_p0 = pneg %p4528_p12 }
  0x65   : > { %p4535_p13 = por %p4534_p8, %p4533_p4 }
  0x67   : > { %p4536_p6 = pnand %p4535_p13, %p4529_p0 }
  0x69   : > { %4539 = shalt.err (!%p4536_p6)
}
  0x6a   : > { %s4540_s30 = scalar_lea.vmem %s4836_s13, 1024  ;;  %s4638_s12 = smov [#allocation2]  }
  0x6b   : > { %p4541_p10 = scmp.ne.s32.totalorder %s4836_s13, %s4540_s30  ;;  %s4545_s23 = sshll.u32 %s4638_s12, 4  ;;  %s4546_s23 = int_to_ptr.vmem [resolvable:$false] %s4545_s23 }
  0x6c   : > { %s4547_s7 = scalar_lea.vmem %s4546_s23, 2048  ;;  %p4548_p12 = scmp.lt.s32.totalorder %s4836_s13, %s4546_s23 }
  0x6d   : > { %p4543_p3 = pnand %p4541_p10, %p4527_p9  ;;  %p4549_p2 = scmp.lt.s32.totalorder %s4547_s7, %s4540_s30 }
  0x6f   : > { %p4544_p7 = pneg %p4543_p3  ;;  %p4550_p1 = por %p4549_p2, %p4548_p12 }
  0x71   : > { %p4551_p4 = pnand %p4550_p1, %p4544_p7 }
  0x73   : > { %4554 = shalt.err (!%p4551_p4)
}
  0x74   : > { %3801 = dma.hbm_to_vmem [thread:$0]  (!%p4832_p11), %s4830_s11, 1024, %s4836_s13, %s4838_s16, %s4636_s6, %s4636_s6, %s4637_s14  }
  0x75   : > { %p6233_p9 = scmp.ne.s32.totalorder %s6227_s26, 0 }
  0x77   : > { %240 = sbr.rel (%p6233_p9) target bundleno = 899 (0x383), region = 40 }
  0x7e   : > { %s4872_s17 = sand.u32 1, %s4621_s19   ;;  %p6234_p0 = scmp.ne.s32.totalorder %s6225_s24, 0 }
  0x7f   : > { %s3239_s8 = sshll.u32 %s4872_s17, 6  ;;  %s243_s9 = scalar_lea.sflag [#allocation3], %s4872_s17 }
  0x80   : > { %s4876_s10 = scalar_lea.vmem [#allocation2], %s3239_s8 }
  0x81   : > { %4600 = dma.done.wait (%p6234_p0), %s243_s9, 1024  }
  0x82   : > { %4602 = vsyncadd (%p6234_p0), %s243_s9, 4294966272  ;;  %p6235_p11 = scmp.eq.s32.totalorder %s4694_s22, 0 }
  0x84   : > { %4604 = dma.done.wait (%p6235_p11), [#allocation6], 8320   ;;  %p6236_p8 = pmov %p6235_p11 }
  0x86   : > { %4606 = vsyncadd (%p6236_p8), [#allocation6], 4294958976  ;;  %p6237_p13 = pmov %p6236_p8 }
  0x87   : > { %p6238_p6 = pmov %p6236_p8 }
  0x88   : > { %4608 = dma.done.wait (%p6237_p13), [#allocation9], 8192  }
  0x89   : > { %4610 = vsyncadd (%p6238_p6), [#allocation9], 4294959104  ;;  %v4639_v0 = vmov 0   ;;  %v304_v1 = vld [vmem:[#allocation5] sm:$0xff]  ;;  %v305_v3 = vld [vmem:[#allocation5 + $0x8] sm:$0xff]  ;;  %s3243_s6 = sshll.u32 %s4872_s17, 7 }
  0x8a   : > { %810 = vmatprep.mubr.bf16.mxu0 %v4639_v0  ;;  %923 = vmatprep.mubr.bf16.mxu1 %v4639_v0  ;;  %v308_v2 = vld [vmem:[#allocation5 + $0x20] sm:$0xff]  ;;  %v309_v5 = vld [vmem:[#allocation5 + $0x28] sm:$0xff]  ;;  %v306_v63 = vld [vmem:[#allocation5 + $0x10] sm:$0xff]  ;;  %s6128_s14 = scalar_lea.vmem [#allocation10], %s3243_s6  ;;  %s3515_s11 = sshll.u32 %s4694_s22, 11 }
  0x8b   : > { %v3253_v4 = vcombine.high %v304_v1, %v308_v2  ;;  %v3252_v6 = vcombine.low %v304_v1, %v308_v2  ;;  %v312_v7 = vld [vmem:[#allocation5 + $0x40] sm:$0xff]  ;;  %v3255_v9 = vcombine.high %v305_v3, %v309_v5  ;;  %v3254_v10 = vcombine.low %v305_v3, %v309_v5  ;;  %v313_v12 = vld [vmem:[#allocation5 + $0x48] sm:$0xff]  ;;  %v310_v1 = vld [vmem:[#allocation5 + $0x30] sm:$0xff]  ;;  %s3127_s13 = sshll.u32 %s6128_s14, 4  ;;  %s6163_s30 = scalar_lea.hbm %s6216_s5, %s3515_s11  ;;  %s6165_s13 = int_to_ptr.vmem [resolvable:$true] %s3127_s13 }
  0x8c   : > { %v316_v8 = vld [vmem:[#allocation5 + $0x60] sm:$0xff]  ;;  %v317_v13 = vld [vmem:[#allocation5 + $0x68] sm:$0xff]  ;;  %v307_v2 = vld [vmem:[#allocation5 + $0x18] sm:$0xff]  ;;  %s3114_s12 = scalar_lea.sflag [#allocation4], %s4872_s17  ;;  %s4555_s22 = scalar_lea.vmem %s6165_s13, 2048 }
  0x8d   : > { %v3261_v11 = vcombine.high %v312_v7, %v316_v8  ;;  %v320_v14 = vld [vmem:[#allocation5 + $0x80] sm:$0xff]  ;;  %778 = vmatprep.subr.bf16.mxu0 %v3253_v4  ;;  %v3263_v15 = vcombine.high %v313_v12, %v317_v13  ;;  %v321_v17 = vld [vmem:[#allocation5 + $0x88] sm:$0xff]  ;;  %891 = vmatprep.subr.bf16.mxu1 %v3255_v9  ;;  %v3260_v19 = vcombine.low %v312_v7, %v316_v8  ;;  %v311_v3 = vld [vmem:[#allocation5 + $0x38] sm:$0xff]  ;;  %p4556_p10 = scmp.ne.s32.totalorder %s6165_s13, %s4555_s22  ;;  %s4640_s23 = smov [#allocation10]  }
  0x8e   : > { %v324_v16 = vld [vmem:[#allocation5 + $0xa0] sm:$0xff]  ;;  %v325_v18 = vld [vmem:[#allocation5 + $0xa8] sm:$0xff]  ;;  %779 = vmatpush1.bf16.msra.mxu0 %v3252_v6  ;;  %892 = vmatpush1.bf16.msra.mxu1 %v3254_v10  ;;  %v3262_v20 = vcombine.low %v313_v12, %v317_v13  ;;  %v3257_v7 = vcombine.high %v306_v63, %v310_v1  ;;  %v314_v8 = vld [vmem:[#allocation5 + $0x50] sm:$0xff]  ;;  %v3259_v10 = vcombine.high %v307_v2, %v311_v3  ;;  %s4559_s7 = sshll.u32 %s4640_s23, 4  ;;  %s4560_s7 = int_to_ptr.vmem [resolvable:$false] %s4559_s7 }
  0x8f   : > { %780 = vmatprep.subr.bf16.mxu0 %v3261_v11  ;;  %v3269_v21 = vcombine.high %v320_v14, %v324_v16  ;;  %893 = vmatprep.subr.bf16.mxu1 %v3263_v15  ;;  %v3271_v22 = vcombine.high %v321_v17, %v325_v18  ;;  %v328_v23 = vld [vmem:[#allocation5 + $0xc0] sm:$0xff]  ;;  %v329_v25 = vld [vmem:[#allocation5 + $0xc8] sm:$0xff]  ;;  %v3268_v27 = vcombine.low %v320_v14, %v324_v16  ;;  %v318_v9 = vld [vmem:[#allocation5 + $0x70] sm:$0xff]  ;;  %p4557_p3 = pnand %p4556_p10, %p4821_p5  ;;  %s4561_s8 = scalar_lea.vmem %s4560_s7, 4096 }
  0x90   : > { %v332_v24 = vld [vmem:[#allocation5 + $0xe0] sm:$0xff]  ;;  %v333_v26 = vld [vmem:[#allocation5 + $0xe8] sm:$0xff]  ;;  %v3270_v28 = vcombine.low %v321_v17, %v325_v18  ;;  %v315_v11 = vld [vmem:[#allocation5 + $0x58] sm:$0xff]  ;;  %v3256_v13 = vcombine.low %v306_v63, %v310_v1  ;;  %v3258_v15 = vcombine.low %v307_v2, %v311_v3  ;;  %v3265_v17 = vcombine.high %v314_v8, %v318_v9  ;;  %p4562_p12 = scmp.lt.s32.totalorder %s6165_s13, %s4560_s7  ;;  %p4563_p2 = scmp.lt.s32.totalorder %s4561_s8, %s4555_s22 }
  0x91   : > { %v3277_v29 = vcombine.high %v328_v23, %v332_v24  ;;  %v3279_v30 = vcombine.high %v329_v25, %v333_v26  ;;  %v336_v31 = vld [vmem:[#allocation5 + $0x100] sm:$0xff]  ;;  %v337_v33 = vld [vmem:[#allocation5 + $0x108] sm:$0xff]  ;;  %v3276_v35 = vcombine.low %v328_v23, %v332_v24  ;;  %v3278_v36 = vcombine.low %v329_v25, %v333_v26  ;;  %v319_v12 = vld [vmem:[#allocation5 + $0x78] sm:$0xff]  ;;  %p4558_p7 = pneg %p4557_p3 }
  0x92   : > { %781 = vmatpush1.bf16.msra.mxu0 %v3260_v19  ;;  %894 = vmatpush1.bf16.msra.mxu1 %v3262_v20  ;;  %v340_v32 = vld [vmem:[#allocation5 + $0x120] sm:$0xff]  ;;  %v341_v34 = vld [vmem:[#allocation5 + $0x128] sm:$0xff]  ;;  %v322_v14 = vld [vmem:[#allocation5 + $0x90] sm:$0xff]  ;;  %v3267_v19 = vcombine.high %v315_v11, %v319_v12  ;;  %v3266_v23 = vcombine.low %v315_v11, %v319_v12  ;;  %p4564_p1 = por %p4563_p2, %p4562_p12 }
  0x93   : > { %782 = vmatprep.subr.bf16.mxu0 %v3269_v21  ;;  %895 = vmatprep.subr.bf16.mxu1 %v3271_v22  ;;  %v3285_v37 = vcombine.high %v336_v31, %v340_v32  ;;  %v3287_v38 = vcombine.high %v337_v33, %v341_v34  ;;  %v344_v39 = vld [vmem:[#allocation5 + $0x140] sm:$0xff]  ;;  %v345_v41 = vld [vmem:[#allocation5 + $0x148] sm:$0xff]  ;;  %v3284_v43 = vcombine.low %v336_v31, %v340_v32  ;;  %v326_v16 = vld [vmem:[#allocation5 + $0xb0] sm:$0xff] }
  0x94   : > { %v348_v40 = vld [vmem:[#allocation5 + $0x160] sm:$0xff]  ;;  %v349_v42 = vld [vmem:[#allocation5 + $0x168] sm:$0xff]  ;;  %v3286_v44 = vcombine.low %v337_v33, %v341_v34  ;;  %v323_v18 = vld [vmem:[#allocation5 + $0x98] sm:$0xff]  ;;  %v3264_v21 = vcombine.low %v314_v8, %v318_v9  ;;  %v3273_v24 = vcombine.high %v322_v14, %v326_v16  ;;  %p4565_p4 = pnand %p4564_p1, %p4558_p7 }
  0x95   : > { %v3293_v45 = vcombine.high %v344_v39, %v348_v40  ;;  %v3295_v46 = vcombine.high %v345_v41, %v349_v42  ;;  %v352_v47 = vld [vmem:[#allocation5 + $0x180] sm:$0xff]  ;;  %v353_v49 = vld [vmem:[#allocation5 + $0x188] sm:$0xff]  ;;  %v3292_v51 = vcombine.low %v344_v39, %v348_v40  ;;  %v3294_v52 = vcombine.low %v345_v41, %v349_v42  ;;  %v327_v20 = vld [vmem:[#allocation5 + $0xb8] sm:$0xff] }
  0x96   : > { %783 = vmatpush1.bf16.msra.mxu0 %v3268_v27  ;;  %896 = vmatpush1.bf16.msra.mxu1 %v3270_v28  ;;  %v356_v48 = vld [vmem:[#allocation5 + $0x1a0] sm:$0xff]  ;;  %v357_v50 = vld [vmem:[#allocation5 + $0x1a8] sm:$0xff]  ;;  %v330_v25 = vld [vmem:[#allocation5 + $0xd0] sm:$0xff]  ;;  %v3275_v26 = vcombine.high %v323_v18, %v327_v20  ;;  %v3274_v31 = vcombine.low %v323_v18, %v327_v20 }
  0x97   : > { %784 = vmatprep.subr.bf16.mxu0 %v3277_v29  ;;  %897 = vmatprep.subr.bf16.mxu1 %v3279_v30  ;;  %v3301_v53 = vcombine.high %v352_v47, %v356_v48  ;;  %v360_v54 = vld [vmem:[#allocation5 + $0x1c0] sm:$0xff]  ;;  %v3303_v55 = vcombine.high %v353_v49, %v357_v50  ;;  %v361_v57 = vld [vmem:[#allocation5 + $0x1c8] sm:$0xff]  ;;  %v3300_v59 = vcombine.low %v352_v47, %v356_v48  ;;  %v334_v27 = vld [vmem:[#allocation5 + $0xf0] sm:$0xff] }
  0x98   : > { %v364_v56 = vld [vmem:[#allocation5 + $0x1e0] sm:$0xff]  ;;  %v365_v58 = vld [vmem:[#allocation5 + $0x1e8] sm:$0xff]  ;;  %v3302_v60 = vcombine.low %v353_v49, %v357_v50  ;;  %v331_v28 = vld [vmem:[#allocation5 + $0xd8] sm:$0xff]  ;;  %v3272_v30 = vcombine.low %v322_v14, %v326_v16  ;;  %v3281_v32 = vcombine.high %v330_v25, %v334_v27  ;;  %v3280_v39 = vcombine.low %v330_v25, %v334_v27 }
  0x99   : > { %v3309_v61 = vcombine.high %v360_v54, %v364_v56  ;;  %v3311_v62 = vcombine.high %v361_v57, %v365_v58  ;;  %v3308_v4 = vcombine.low %v360_v54, %v364_v56  ;;  %v3310_v5 = vcombine.low %v361_v57, %v365_v58  ;;  %v4893_v6 = vld [vmem:[%s4876_s10] sm:$0xff]   ;;  %v4899_v22 = vld [vmem:[%s4876_s10 + $0x8] sm:$0xff]   ;;  %v335_v29 = vld [vmem:[#allocation5 + $0xf8] sm:$0xff] }
  0x9a   : > { %785 = vmatpush1.bf16.msra.mxu0 %v3276_v35  ;;  %898 = vmatpush1.bf16.msra.mxu1 %v3278_v36  ;;  %v338_v33 = vld [vmem:[#allocation5 + $0x110] sm:$0xff]  ;;  %v3283_v34 = vcombine.high %v331_v28, %v335_v29  ;;  %v339_v36 = vld [vmem:[#allocation5 + $0x118] sm:$0xff]  ;;  %v3282_v42 = vcombine.low %v331_v28, %v335_v29  ;;  %v3866_v9 = vld [vmem:[#allocation8 + $0xc0] sm:$0xff]  }
  0x9b   : > { %786 = vmatprep.subr.bf16.mxu0 %v3285_v37  ;;  %899 = vmatprep.subr.bf16.mxu1 %v3287_v38  ;;  %v342_v35 = vld [vmem:[#allocation5 + $0x130] sm:$0xff]  ;;  %v343_v37 = vld [vmem:[#allocation5 + $0x138] sm:$0xff]  ;;  %v4928_v11 = vld [vmem:[%s4876_s10 + $0x28] sm:$0xff]  }
  0x9c   : > { %v4907_v38 = vld [vmem:[%s4876_s10 + $0x10] sm:$0xff]   ;;  %v3288_v47 = vcombine.low %v338_v33, %v342_v35  ;;  %v3290_v50 = vcombine.low %v339_v36, %v343_v37  ;;  %v3865_v14 = vld [vmem:[#allocation8] sm:$0xff]   ;;  %v3872_v20 = vld [vmem:[#allocation8 + $0x50] sm:$0xff]  }
  0x9d   : > { %v346_v40 = vld [vmem:[#allocation5 + $0x150] sm:$0xff]  ;;  %v3876_v25 = vld [vmem:[#allocation8 + $0x58] sm:$0xff]   ;;  %v3880_v27 = vld [vmem:[#allocation8 + $0x60] sm:$0xff]  }
  0x9e   : > { %787 = vmatpush1.bf16.msra.mxu0 %v3284_v43  ;;  %900 = vmatpush1.bf16.msra.mxu1 %v3286_v44  ;;  %v350_v41 = vld [vmem:[#allocation5 + $0x170] sm:$0xff]  ;;  %v3289_v43 = vcombine.high %v338_v33, %v342_v35  ;;  %v347_v44 = vld [vmem:[#allocation5 + $0x158] sm:$0xff]  ;;  %v3882_v28 = vld [vmem:[#allocation8 + $0xe0] sm:$0xff]  }
  0x9f   : > { %788 = vmatprep.subr.bf16.mxu0 %v3293_v45  ;;  %901 = vmatprep.subr.bf16.mxu1 %v3295_v46  ;;  %v351_v45 = vld [vmem:[#allocation5 + $0x178] sm:$0xff]  ;;  %v3291_v46 = vcombine.high %v339_v36, %v343_v37  ;;  %v354_v48 = vld [vmem:[#allocation5 + $0x190] sm:$0xff]  ;;  %v3296_v56 = vcombine.low %v346_v40, %v350_v41  ;;  %v3881_v29 = vld [vmem:[#allocation8 + $0x20] sm:$0xff]  }
  0xa0   : > { %v358_v49 = vld [vmem:[#allocation5 + $0x1b0] sm:$0xff]  ;;  %v3299_v54 = vcombine.high %v347_v44, %v351_v45  ;;  %v3888_v35 = vld [vmem:[#allocation8 + $0x70] sm:$0xff]  }
  0xa1   : > { %v362_v57 = vld [vmem:[#allocation5 + $0x1d0] sm:$0xff]  ;;  %v3304_v1 = vcombine.low %v354_v48, %v358_v49  ;;  %v3890_v36 = vld [vmem:[#allocation8 + $0xf0] sm:$0xff]  }
  0xa2   : > { %789 = vmatpush1.bf16.msra.mxu0 %v3292_v51  ;;  %902 = vmatpush1.bf16.msra.mxu1 %v3294_v52  ;;  %v3297_v51 = vcombine.high %v346_v40, %v350_v41  ;;  %v355_v52 = vld [vmem:[#allocation5 + $0x198] sm:$0xff]  ;;  %v366_v58 = vld [vmem:[#allocation5 + $0x1f0] sm:$0xff]  ;;  %v3893_v40 = vld [vmem:[#allocation8 + $0x38] sm:$0xff]  }
  0xa3   : > { %790 = vmatprep.subr.bf16.mxu0 %v3301_v53  ;;  %903 = vmatprep.subr.bf16.mxu1 %v3303_v55  ;;  %v359_v53 = vld [vmem:[#allocation5 + $0x1b8] sm:$0xff]  ;;  %v3313_v3 = vcombine.high %v362_v57, %v366_v58  ;;  %v3312_v8 = vcombine.low %v362_v57, %v366_v58  ;;  %v4935_v12 = vld [vmem:[%s4876_s10 + $0x30] sm:$0xff]   ;;  %v3895_v41 = vld [vmem:[#allocation8 + $0xb8] sm:$0xff]  }
  0xa4   : > { %v4914_v55 = vld [vmem:[%s4876_s10 + $0x18] sm:$0xff]   ;;  %v3307_v63 = vcombine.high %v355_v52, %v359_v53  ;;  %v3306_v2 = vcombine.low %v355_v52, %v359_v53  ;;  %v3868_v16 = vld [vmem:[#allocation8 + $0x48] sm:$0xff]  }
  0xa5   : > { %v3869_v18 = vld [vmem:[#allocation8 + $0x8] sm:$0xff]   ;;  %v3889_v37 = vld [vmem:[#allocation8 + $0x30] sm:$0xff]  }
  0xa6   : > { %791 = vmatpush1.bf16.msra.mxu0 %v3300_v59  ;;  %904 = vmatpush1.bf16.msra.mxu1 %v3302_v60  ;;  %v3298_v59 = vcombine.low %v347_v44, %v351_v45  ;;  %v3305_v60 = vcombine.high %v354_v48, %v358_v49  ;;  %v3885_v33 = vld [vmem:[#allocation8 + $0x28] sm:$0xff]   ;;  %v370_v44 = vlaneseq }
  0xa7   : > { %792 = vmatprep.subr.bf16.mxu0 %v3309_v61  ;;  %905 = vmatprep.subr.bf16.mxu1 %v3311_v62  ;;  %v363_v61 = vld [vmem:[#allocation5 + $0x1d8] sm:$0xff] }
  0xa8   : > { %v367_v62 = vld [vmem:[#allocation5 + $0x1f8] sm:$0xff]  ;;  %v4978_v45 = vshrl.u32 %v370_v44, 7 }
  0xaa   : > { %793 = vmatpush1.bf16.msra.mxu0 %v3308_v4  ;;  %906 = vmatpush1.bf16.msra.mxu1 %v3310_v5  ;;  %v3315_v4 = vcombine.high %v363_v61, %v367_v62  ;;  %v3864_v5 = vld [vmem:[#allocation8 + $0x40] sm:$0xff]   ;;  %6239 = vst [vmem:[#allocation15_spill] sm:$0xff] %v4978_v45  ;;  %v380_v48 = vsub.s32 2, %v4978_v45  ;;  %v376_v49 = vsub.s32 1, %v4978_v45 }
  0xab   : > { %1004 = vmatprep.subr.bf16.mxu0 %v3257_v7  ;;  %1117 = vmatprep.subr.bf16.mxu1 %v3259_v10  ;;  %v4921_v7 = vld [vmem:[%s4876_s10 + $0x20] sm:$0xff]   ;;  %v3314_v10 = vcombine.low %v363_v61, %v367_v62 }
  0xad   : > { %811 = vmatmul.mubr.bf16.vlgmr.msra.gmra.mrb[0].mxu0 %v4893_v6  ;;  %924 = vmatmul.mubr.bf16.vlgmr.msra.gmra.mrb[0].mxu1 %v4893_v6 }
  0xae   : > { %1005 = vmatpush1.bf16.msra.mxu0 %v3256_v13  ;;  %1118 = vmatpush1.bf16.msra.mxu1 %v3258_v15  ;;  %v4942_v13 = vld [vmem:[%s4876_s10 + $0x38] sm:$0xff]   ;;  %v3867_v15 = vld [vmem:[#allocation8 + $0x80] sm:$0xff]  }
  0xaf   : > { %820 = vmatprep.mubr.bf16.mxu0 %v4639_v0  ;;  %933 = vmatprep.mubr.bf16.mxu1 %v4639_v0 }
  0xb0   : > { %1006 = vmatprep.subr.bf16.mxu0 %v3265_v17  ;;  %1119 = vmatprep.subr.bf16.mxu1 %v3267_v19  ;;  %v3870_v17 = vld [vmem:[#allocation8 + $0xc8] sm:$0xff]  }
  0xb1   : > { %v3871_v19 = vld [vmem:[#allocation8 + $0x88] sm:$0xff]  }
  0xb2   : > { %1007 = vmatpush1.bf16.msra.mxu0 %v3264_v21  ;;  %1120 = vmatpush1.bf16.msra.mxu1 %v3266_v23  ;;  %v3874_v21 = vld [vmem:[#allocation8 + $0xd0] sm:$0xff]  }
  0xb3   : > { %1008 = vmatprep.subr.bf16.mxu0 %v3273_v24  ;;  %1121 = vmatprep.subr.bf16.mxu1 %v3275_v26  ;;  %v3873_v23 = vld [vmem:[#allocation8 + $0x10] sm:$0xff]   ;;  %v3877_v26 = vld [vmem:[#allocation8 + $0x18] sm:$0xff]  }
  0xb4   : > { %v3875_v24 = vld [vmem:[#allocation8 + $0x90] sm:$0xff]  }
  0xb5   : > { %821 = vmatmul.mubr.bf16.gmra.mrb[4].mxu0 %v4899_v22  ;;  %934 = vmatmul.mubr.bf16.gmra.mrb[4].mxu1 %v4899_v22 }
  0xb6   : > { %830 = vmatprep.mubr.bf16.mxu0 %v4639_v0  ;;  %943 = vmatprep.mubr.bf16.mxu1 %v4639_v0 }
  0xb7   : > { %1009 = vmatpush1.bf16.msra.mxu0 %v3272_v30  ;;  %1122 = vmatpush1.bf16.msra.mxu1 %v3274_v31  ;;  %v3883_v30 = vld [vmem:[#allocation8 + $0xa0] sm:$0xff]   ;;  %v3884_v31 = vld [vmem:[#allocation8 + $0x68] sm:$0xff]  }
  0xb8   : > { %1010 = vmatprep.subr.bf16.mxu0 %v3281_v32  ;;  %1123 = vmatprep.subr.bf16.mxu1 %v3283_v34  ;;  %v3886_v32 = vld [vmem:[#allocation8 + $0xe8] sm:$0xff]  }
  0xb9   : > { %v3887_v34 = vld [vmem:[#allocation8 + $0xa8] sm:$0xff]  }
  0xbb   : > { %1011 = vmatpush1.bf16.msra.mxu0 %v3280_v39  ;;  %1124 = vmatpush1.bf16.msra.mxu1 %v3282_v42  ;;  %v3894_v39 = vld [vmem:[#allocation8 + $0xf8] sm:$0xff]   ;;  %v3896_v42 = vld [vmem:[#allocation8 + $0x140] sm:$0xff]  }
  0xbc   : > { %1012 = vmatprep.subr.bf16.mxu0 %v3289_v43  ;;  %1125 = vmatprep.subr.bf16.mxu1 %v3291_v46  ;;  %v3898_v43 = vld [vmem:[#allocation8 + $0x1c0] sm:$0xff]   ;;  %v372_v46 = vsub.s32 0, %v4978_v45 }
  0xbd   : > { %831 = vmatmul.mubr.bf16.gmra.mrb[8].mxu0 %v4907_v38  ;;  %944 = vmatmul.mubr.bf16.gmra.mrb[8].mxu1 %v4907_v38 }
  0xbe   : > { %840 = vmatprep.mubr.bf16.mxu0 %v4639_v0  ;;  %953 = vmatprep.mubr.bf16.mxu1 %v4639_v0 }
  0xbf   : > { %1013 = vmatpush1.bf16.msra.mxu0 %v3288_v47  ;;  %1126 = vmatpush1.bf16.msra.mxu1 %v3290_v50  ;;  %v368_v47 = vld [vmem:[#allocation7] sm:$0xff]  ;;  %v384_v50 = vsub.s32 3, %v4978_v45  ;;  %v3897_v45 = vld [vmem:[#allocation8 + $0x100] sm:$0xff]  }
  0xc0   : > { %1014 = vmatprep.subr.bf16.mxu0 %v3297_v51  ;;  %1127 = vmatprep.subr.bf16.mxu1 %v3299_v54  ;;  %v4984_v51 = vrot.slane %v368_v47, %v372_v46  ;;  %v4986_v52 = vrot.slane %v368_v47, %v380_v48  ;;  %v4988_v53 = vrot.slane %v368_v47, %v376_v49 }
  0xc1   : > { %v4990_v54 = vrot.slane %v368_v47, %v384_v50 }
  0xc3   : > { %1015 = vmatpush1.bf16.msra.mxu0 %v3296_v56  ;;  %1128 = vmatpush1.bf16.msra.mxu1 %v3298_v59 }
  0xc4   : > { %1016 = vmatprep.subr.bf16.mxu0 %v3305_v60  ;;  %1129 = vmatprep.subr.bf16.mxu1 %v3307_v63 }
  0xc5   : > { %841 = vmatmul.mubr.bf16.gmra.mrb[12].mxu0 %v4914_v55  ;;  %954 = vmatmul.mubr.bf16.gmra.mrb[12].mxu1 %v4914_v55 }
  0xc6   : > { %850 = vmatprep.mubr.bf16.mxu0 %v4639_v0  ;;  %963 = vmatprep.mubr.bf16.mxu1 %v4639_v0 }
  0xc7   : > { %1017 = vmatpush1.bf16.msra.mxu0 %v3304_v1  ;;  %1130 = vmatpush1.bf16.msra.mxu1 %v3306_v2 }
  0xc8   : > { %1018 = vmatprep.subr.bf16.mxu0 %v3313_v3  ;;  %1131 = vmatprep.subr.bf16.mxu1 %v3315_v4 }
  0xcb   : > { %1019 = vmatpush1.bf16.msra.mxu0 %v3312_v8  ;;  %1132 = vmatpush1.bf16.msra.mxu1 %v3314_v10 }
  0xcc   : > { %3516 = vmatprep.subr.bf16.mxu0 %v3864_v5  ;;  %3580 = vmatprep.subr.bf16.mxu1 %v3866_v9 }
  0xcd   : > { %851 = vmatmul.mubr.bf16.gmra.mrb[16].mxu0 %v4921_v7  ;;  %964 = vmatmul.mubr.bf16.gmra.mrb[16].mxu1 %v4921_v7 }
  0xce   : > { %860 = vmatprep.mubr.bf16.mxu0 %v4639_v0  ;;  %973 = vmatprep.mubr.bf16.mxu1 %v4639_v0 }
  0xd5   : > { %861 = vmatmul.mubr.bf16.gmra.mrb[20].mxu0 %v4928_v11  ;;  %974 = vmatmul.mubr.bf16.gmra.mrb[20].mxu1 %v4928_v11 }
  0xd6   : > { %870 = vmatprep.mubr.bf16.mxu0 %v4639_v0  ;;  %983 = vmatprep.mubr.bf16.mxu1 %v4639_v0 }
  0xdd   : > { %871 = vmatmul.mubr.bf16.gmra.mrb[24].mxu0 %v4935_v12  ;;  %984 = vmatmul.mubr.bf16.gmra.mrb[24].mxu1 %v4935_v12 }
  0xde   : > { %880 = vmatprep.mubr.bf16.mxu0 %v4639_v0  ;;  %993 = vmatprep.mubr.bf16.mxu1 %v4639_v0 }
  0xe5   : > { %881 = vmatmul.mubr.bf16.gmra.mrb[28].mxu0 %v4942_v13  ;;  %994 = vmatmul.mubr.bf16.gmra.mrb[28].mxu1 %v4942_v13 }
  0xe6   : > { %1036 = vmatprep.mubr.bf16.mxu0 %v4639_v0  ;;  %1149 = vmatprep.mubr.bf16.mxu1 %v4639_v0 }
  0xed   : > { %1037 = vmatmul.mubr.bf16.vlgmr.msra.gmra.mrb[32].mxu0 %v4893_v6  ;;  %1150 = vmatmul.mubr.bf16.vlgmr.msra.gmra.mrb[32].mxu1 %v4893_v6  ;;  %v3878_v6 = vld [vmem:[#allocation8 + $0xd8] sm:$0xff]  }
  0xee   : > { %1046 = vmatprep.mubr.bf16.mxu0 %v4639_v0  ;;  %1159 = vmatprep.mubr.bf16.mxu1 %v4639_v0 }
  0xef   : > { %3517 = vmatpush3.bf16.msra.mxu0 %v3865_v14  ;;  %3581 = vmatpush3.bf16.msra.mxu1 %v3867_v15 }
  0xf0   : > { %3518 = vmatprep.subr.bf16.mxu0 %v3868_v16  ;;  %3582 = vmatprep.subr.bf16.mxu1 %v3870_v17 }
  0xf3   : > { %3519 = vmatpush3.bf16.msra.mxu0 %v3869_v18  ;;  %3583 = vmatpush3.bf16.msra.mxu1 %v3871_v19 }
  0xf4   : > { %3520 = vmatprep.subr.bf16.mxu0 %v3872_v20  ;;  %3584 = vmatprep.subr.bf16.mxu1 %v3874_v21 }
  0xf5   : > { %1047 = vmatmul.mubr.bf16.gmra.mrb[36].mxu0 %v4899_v22  ;;  %1160 = vmatmul.mubr.bf16.gmra.mrb[36].mxu1 %v4899_v22  ;;  %v3879_v22 = vld [vmem:[#allocation8 + $0x98] sm:$0xff]  }
  0xf6   : > { %1056 = vmatprep.mubr.bf16.mxu0 %v4639_v0  ;;  %1169 = vmatprep.mubr.bf16.mxu1 %v4639_v0 }
  0xf7   : > { %3521 = vmatpush3.bf16.msra.mxu0 %v3873_v23  ;;  %3585 = vmatpush3.bf16.msra.mxu1 %v3875_v24 }
  0xf8   : > { %3522 = vmatprep.subr.bf16.mxu0 %v3876_v25  ;;  %3586 = vmatprep.subr.bf16.mxu1 %v3878_v6 }
  0xfb   : > { %3523 = vmatpush3.bf16.msra.mxu0 %v3877_v26  ;;  %3587 = vmatpush3.bf16.msra.mxu1 %v3879_v22 }
  0xfc   : > { %3524 = vmatprep.subr.bf16.mxu0 %v3880_v27  ;;  %3588 = vmatprep.subr.bf16.mxu1 %v3882_v28 }
  0xfd   : > { %1057 = vmatmul.mubr.bf16.gmra.mrb[40].mxu0 %v4907_v38  ;;  %1170 = vmatmul.mubr.bf16.gmra.mrb[40].mxu1 %v4907_v38  ;;  %v3891_v38 = vld [vmem:[#allocation8 + $0xb0] sm:$0xff]  }
  0xfe   : > { %1066 = vmatprep.mubr.bf16.mxu0 %v4639_v0  ;;  %1179 = vmatprep.mubr.bf16.mxu1 %v4639_v0 }
  0xff   : > { %3525 = vmatpush3.bf16.msra.mxu0 %v3881_v29  ;;  %3589 = vmatpush3.bf16.msra.mxu1 %v3883_v30 }
 0x100   : > { %3526 = vmatprep.subr.bf16.mxu0 %v3884_v31  ;;  %3590 = vmatprep.subr.bf16.mxu1 %v3886_v32 }
 0x103   : > { %3527 = vmatpush3.bf16.msra.mxu0 %v3885_v33  ;;  %3591 = vmatpush3.bf16.msra.mxu1 %v3887_v34 }
 0x104   : > { %3528 = vmatprep.subr.bf16.mxu0 %v3888_v35  ;;  %3592 = vmatprep.subr.bf16.mxu1 %v3890_v36 }
 0x105   : > { %1067 = vmatmul.mubr.bf16.gmra.mrb[44].mxu0 %v4914_v55  ;;  %1180 = vmatmul.mubr.bf16.gmra.mrb[44].mxu1 %v4914_v55 }
 0x106   : > { %1076 = vmatprep.mubr.bf16.mxu0 %v4639_v0  ;;  %1189 = vmatprep.mubr.bf16.mxu1 %v4639_v0 }
 0x107   : > { %3529 = vmatpush3.bf16.msra.mxu0 %v3889_v37  ;;  %3593 = vmatpush3.bf16.msra.mxu1 %v3891_v38 }
 0x108   : > { %3594 = vmatprep.subr.bf16.mxu1 %v3894_v39 }
 0x10b   : > { %3595 = vmatpush3.bf16.msra.mxu1 %v3895_v41 }
 0x10c   : > { %3708 = vmatprep.subr.bf16.mxu1 %v3898_v43 }
 0x10d   : > { %1077 = vmatmul.mubr.bf16.gmra.mrb[48].mxu0 %v4921_v7  ;;  %1190 = vmatmul.mubr.bf16.gmra.mrb[48].mxu1 %v4921_v7 }
 0x10e   : > { %1086 = vmatprep.mubr.bf16.mxu0 %v4639_v0  ;;  %1199 = vmatprep.mubr.bf16.mxu1 %v4639_v0 }
 0x115   : > { %1087 = vmatmul.mubr.bf16.gmra.mrb[52].mxu0 %v4928_v11  ;;  %1200 = vmatmul.mubr.bf16.gmra.mrb[52].mxu1 %v4928_v11 }
 0x116   : > { %1096 = vmatprep.mubr.bf16.mxu0 %v4639_v0  ;;  %1209 = vmatprep.mubr.bf16.mxu1 %v4639_v0 }
 0x11d   : > { %1097 = vmatmul.mubr.bf16.gmra.mrb[56].mxu0 %v4935_v12  ;;  %1210 = vmatmul.mubr.bf16.gmra.mrb[56].mxu1 %v4935_v12 }
 0x11e   : > { %1106 = vmatprep.mubr.bf16.mxu0 %v4639_v0  ;;  %1219 = vmatprep.mubr.bf16.mxu1 %v4639_v0  ;;  %v3892_v0 = vld [vmem:[#allocation8 + $0x78] sm:$0xff]  }
 0x11f   : > { %3530 = vmatprep.subr.bf16.mxu0 %v3892_v0 }
 0x120   : > { %3531 = vmatpush3.bf16.msra.mxu0 %v3893_v40 }
 0x121   : > { %3644 = vmatprep.subr.bf16.mxu0 %v3896_v42 }
 0x125   : > { %1107 = vmatmul.mubr.bf16.gmra.mrb[60].mxu0 %v4942_v13  ;;  %1220 = vmatmul.mubr.bf16.gmra.mrb[60].mxu1 %v4942_v13 }
 0x180   : > { %v812_v55 = vpop.f32.mrb[0].mxu0  ;;  %v925_v57 = vpop.f32.mrb[0].mxu1 }
 0x181   : > { %v4993_v56 = vadd.f32 %v812_v55, %v4984_v51  ;;  %v814_v58 = vpop.f32.mrb[1].mxu0  ;;  %v4996_v59 = vadd.f32 %v925_v57, %v4986_v52  ;;  %v927_v61 = vpop.f32.mrb[1].mxu1 }
 0x182   : > { %v4999_v60 = vadd.f32 %v814_v58, %v4988_v53  ;;  %v816_v62 = vpop.f32.mrb[2].mxu0  ;;  %v5003_v1 = vadd.f32 %v927_v61, %v4990_v54  ;;  %v929_v3 = vpop.f32.mrb[2].mxu1 }
 0x183   : > { %v3316_v63 = vmul.f32 -1.442695, %v4993_v56  ;;  %v5006_v2 = vadd.f32 %v816_v62, %v4984_v51  ;;  %v818_v4 = vpop.f32.mrb[3].mxu0  ;;  %v3318_v5 = vmul.f32 -1.442695, %v4996_v59  ;;  %v5011_v8 = vadd.f32 %v929_v3, %v4986_v52  ;;  %v931_v10 = vpop.f32.mrb[3].mxu1 }
 0x184   : > { %v3317_v7 = vmul.f32 -1.442695, %v4999_v60  ;;  %v5014_v9 = vadd.f32 %v818_v4, %v4988_v53  ;;  %v3319_v11 = vmul.f32 -1.442695, %v5003_v1  ;;  %v5019_v13 = vadd.f32 %v931_v10, %v4990_v54 }
 0x185   : > { %3928 = vpow2.f32 %v3316_v63  ;;  %v3324_v12 = vmul.f32 -1.442695, %v5006_v2  ;;  %v3326_v14 = vmul.f32 -1.442695, %v5011_v8 }
 0x186   : > { %3930 = vpow2.f32 %v3318_v5  ;;  %v3325_v15 = vmul.f32 -1.442695, %v5014_v9  ;;  %v3327_v16 = vmul.f32 -1.442695, %v5019_v13 }
 0x187   : > { %3932 = vpow2.f32 %v3317_v7 }
 0x188   : > { %3934 = vpow2.f32 %v3319_v11  ;;  %v822_v17 = vpop.f32.mrb[4].mxu0  ;;  %v935_v19 = vpop.f32.mrb[4].mxu1 }
 0x189   : > { %3936 = vpow2.f32 %v3324_v12  ;;  %v5025_v18 = vadd.f32 %v822_v17, %v4984_v51  ;;  %v824_v20 = vpop.f32.mrb[5].mxu0  ;;  %v5028_v21 = vadd.f32 %v935_v19, %v4986_v52  ;;  %v937_v24 = vpop.f32.mrb[5].mxu1 }
 0x18a   : > { %3938 = vpow2.f32 %v3326_v14  ;;  %v5031_v23 = vadd.f32 %v824_v20, %v4988_v53  ;;  %v826_v25 = vpop.f32.mrb[6].mxu0  ;;  %v5035_v26 = vadd.f32 %v937_v24, %v4990_v54  ;;  %v939_v27 = vpop.f32.mrb[6].mxu1 }
 0x18b   : > { %3940 = vpow2.f32 %v3325_v15  ;;  %v3332_v6 = vmul.f32 -1.442695, %v5025_v18  ;;  %v5038_v22 = vadd.f32 %v826_v25, %v4984_v51  ;;  %v828_v28 = vpop.f32.mrb[7].mxu0  ;;  %v3334_v29 = vmul.f32 -1.442695, %v5028_v21  ;;  %v941_v31 = vpop.f32.mrb[7].mxu1 }
 0x18c   : > { %3942 = vpow2.f32 %v3327_v16  ;;  %v3333_v30 = vmul.f32 -1.442695, %v5031_v23  ;;  %v3335_v32 = vmul.f32 -1.442695, %v5035_v26  ;;  %v5047_v62 = vadd.f32 %v939_v27, %v4986_v52 }
 0x18d   : > { %3944 = vpow2.f32 %v3332_v6  ;;  %v3340_v33 = vmul.f32 -1.442695, %v5038_v22  ;;  %v5050_v4 = vadd.f32 %v828_v28, %v4988_v53  ;;  %v5054_v17 = vadd.f32 %v941_v31, %v4990_v54 }
 0x18e   : > { %3946 = vpow2.f32 %v3334_v29  ;;  %v3342_v16 = vmul.f32 -1.442695, %v5047_v62 }
 0x18f   : > { %v3929_v34 = vpop.eup %3928  ;;  %3948 = vpow2.f32 %v3333_v30  ;;  %v3341_v6 = vmul.f32 -1.442695, %v5050_v4 }
 0x190   : > { %v3931_v35 = vpop.eup %3930  ;;  %v1614_v36 = vadd.f32 1.0, %v3929_v34  ;;  %3950 = vpow2.f32 %v3335_v32  ;;  %v832_v37 = vpop.f32.mrb[8].mxu0 }
 0x191   : > { %v3933_v38 = vpop.eup %3932  ;;  %v1616_v0 = vadd.f32 1.0, %v3931_v35  ;;  %3952 = vpow2.f32 %v3340_v33  ;;  %v945_v39 = vpop.f32.mrb[8].mxu1  ;;  %v5060_v27 = vadd.f32 %v832_v37, %v4984_v51 }
 0x192   : > { %v834_v40 = vpop.f32.mrb[9].mxu0  ;;  %v3935_v41 = vpop.eup %3934  ;;  %3954 = vrcp.f32 %v1614_v36  ;;  %v1615_v42 = vadd.f32 1.0, %v3933_v38  ;;  %v5067_v31 = vadd.f32 %v945_v39, %v4986_v52 }
 0x193   : > { %v947_v43 = vpop.f32.mrb[9].mxu1  ;;  %v836_v44 = vpop.f32.mrb[10].mxu0  ;;  %3956 = vrcp.f32 %v1616_v0  ;;  %v1617_v47 = vadd.f32 1.0, %v3935_v41  ;;  %v5070_v33 = vadd.f32 %v834_v40, %v4988_v53  ;;  %v3343_v40 = vmul.f32 -1.442695, %v5054_v17 }
 0x194   : > { %v3937_v46 = vpop.eup %3936  ;;  %v949_v48 = vpop.f32.mrb[10].mxu1  ;;  %3958 = vrcp.f32 %v1615_v42  ;;  %v5077_v38 = vadd.f32 %v947_v43, %v4990_v54  ;;  %v5080_v0 = vadd.f32 %v836_v44, %v4984_v51 }
 0x195   : > { %v838_v49 = vpop.f32.mrb[11].mxu0  ;;  %v3939_v50 = vpop.eup %3938  ;;  %v1622_v55 = vadd.f32 1.0, %v3937_v46  ;;  %3960 = vrcp.f32 %v1617_v47  ;;  %v3348_v46 = vmul.f32 -1.442695, %v5060_v27  ;;  %v3349_v43 = vmul.f32 -1.442695, %v5070_v33 }
 0x196   : > { %v5044_v57 = vpop.f32.mrb[11].mxu1  ;;  %v3941_v58 = vpop.eup %3940  ;;  %v1624_v61 = vadd.f32 1.0, %v3939_v50  ;;  %v3350_v50 = vmul.f32 -1.442695, %v5067_v31 }
 0x197   : > { %v3943_v63 = vpop.eup %3942  ;;  %3962 = vrcp.f32 %v1622_v55  ;;  %v1623_v3 = vadd.f32 1.0, %v3941_v58  ;;  %v5089_v55 = vadd.f32 %v949_v48, %v4986_v52  ;;  %v3351_v58 = vmul.f32 -1.442695, %v5077_v38 }
 0x198   : > { %v3945_v5 = vpop.eup %3944  ;;  %3964 = vrcp.f32 %v1624_v61  ;;  %v1625_v7 = vadd.f32 1.0, %v3943_v63  ;;  %v842_v12 = vpop.f32.mrb[12].mxu0  ;;  %v3356_v61 = vmul.f32 -1.442695, %v5080_v0  ;;  %v5094_v63 = vadd.f32 %v838_v49, %v4988_v53 }
 0x199   : > { %v3947_v10 = vpop.eup %3946  ;;  %3966 = vrcp.f32 %v1623_v3  ;;  %v1630_v11 = vadd.f32 1.0, %v3945_v5  ;;  %v955_v19 = vpop.f32.mrb[12].mxu1  ;;  %v5106_v48 = vadd.f32 %v5044_v57, %v4990_v54 }
 0x19a   : > { %v3949_v14 = vpop.eup %3948  ;;  %3968 = vrcp.f32 %v1625_v7  ;;  %v1632_v15 = vadd.f32 1.0, %v3947_v10  ;;  %v5056_v20 = vpop.f32.mrb[13].mxu0 }
 0x19b   : > { %v3951_v24 = vpop.eup %3950  ;;  %3970 = vrcp.f32 %v1630_v11  ;;  %v1631_v25 = vadd.f32 1.0, %v3949_v14  ;;  %v5062_v28 = vpop.f32.mrb[13].mxu1 }
 0x19c   : > { %v5064_v29 = vpop.f32.mrb[14].mxu0  ;;  %v3953_v30 = vpop.eup %3952  ;;  %3972 = vrcp.f32 %v1632_v15  ;;  %v1633_v32 = vadd.f32 1.0, %v3951_v24 }
 0x19d   : > { %v5072_v34 = vpop.f32.mrb[14].mxu1  ;;  %v5074_v35 = vpop.f32.mrb[15].mxu0  ;;  %3974 = vrcp.f32 %v1631_v25  ;;  %v1638_v37 = vadd.f32 1.0, %v3953_v30 }
 0x19e   : > { %v3955_v36 = vpop.eup %3954  ;;  %v5082_v41 = vpop.f32.mrb[15].mxu1  ;;  %3976 = vrcp.f32 %v1633_v32 }
 0x19f   : > { %v3957_v39 = vpop.eup %3956  ;;  %3978 = vrcp.f32 %v1638_v37  ;;  %v5099_v7 = vmul.f32 %v3955_v36, %v4993_v56  ;;  %v5119_v56 = vadd.f32 %v842_v12, %v4984_v51  ;;  %v3357_v36 = vmul.f32 -1.442695, %v5094_v63 }
 0x1a0   : > { %v3959_v42 = vpop.eup %3958  ;;  %3980 = vpow2.f32 %v3342_v16  ;;  %v5096_v3 = vpop.f32.mrb[16].mxu0  ;;  %v5113_v15 = vmul.f32 %v3957_v39, %v4996_v59  ;;  %v5129_v59 = vadd.f32 %v955_v19, %v4986_v52  ;;  %v3359_v19 = vmul.f32 -1.442695, %v5106_v48 }
 0x1a1   : > { %v3961_v47 = vpop.eup %3960  ;;  %3982 = vpow2.f32 %v3341_v6  ;;  %v5108_v11 = vpop.f32.mrb[16].mxu1  ;;  %6240 = vst [vmem:[#allocation16_spill] sm:$0xff] %v5119_v56  ;;  %v3358_v6 = vmul.f32 -1.442695, %v5089_v55 }
 0x1a2   : > { %v3963_v44 = vpop.eup %3962  ;;  %3984 = vpow2.f32 %v3343_v40  ;;  %v5110_v14 = vpop.f32.mrb[17].mxu0  ;;  %6241 = vst [vmem:[#allocation17_spill] sm:$0xff] %v5129_v59 }
 0x1a3   : > { %v3965_v5 = vpop.eup %3964  ;;  %v5102_v10 = vmul.f32 %v3963_v44, %v5006_v2  ;;  %3986 = vpow2.f32 %v3348_v46  ;;  %v5121_v2 = vpop.f32.mrb[17].mxu1  ;;  %v3364_v44 = vmul.f32 -1.442695, %v5119_v56 }
 0x1a4   : > { %v3967_v49 = vpop.eup %3966  ;;  %v5116_v16 = vmul.f32 %v3965_v5, %v5011_v8  ;;  %v5123_v24 = vpop.f32.mrb[18].mxu0  ;;  %3988 = vpow2.f32 %v3350_v50 }
 0x1a5   : > { %v3969_v57 = vpop.eup %3968  ;;  %v2126_v25 = vpack.c.bf16 %v5102_v10, %v5099_v7  ;;  %v5131_v8 = vpop.f32.mrb[18].mxu1  ;;  %3990 = vpow2.f32 %v3349_v43  ;;  %v2007_v46 = vmul.f32 %v3967_v49, %v5014_v9  ;;  %v3366_v43 = vmul.f32 -1.442695, %v5129_v59  ;;  %v3899_v59 = vld [vmem:[#allocation8 + $0x180] sm:$0xff]  }
 0x1a6   : > { %v5133_v30 = vpop.f32.mrb[19].mxu0  ;;  %v5135_v12 = vpop.eup %3970  ;;  %v2128_v32 = vpack.c.bf16 %v5116_v16, %v5113_v15  ;;  %3992 = vpow2.f32 %v3351_v58  ;;  %v2009_v50 = vmul.f32 %v3969_v57, %v5019_v13  ;;  %v1999_v10 = vmul.f32 %v3959_v42, %v4999_v60 }
 0x1a7   : > { %v5140_v37 = vpop.f32.mrb[19].mxu1  ;;  %v5142_v39 = vpop.eup %3972  ;;  %3994 = vpow2.f32 %v3356_v61  ;;  %v2001_v58 = vmul.f32 %v3961_v47, %v5003_v1 }
 0x1a8   : > { %v5145_v40 = vpop.eup %3974  ;;  %3996 = vpow2.f32 %v3358_v6  ;;  %v5155_v15 = vpop.f32.mrb[20].mxu0  ;;  %v2127_v57 = vpack.c.bf16 %v2007_v46, %v1999_v10 }
 0x1a9   : > { %v5150_v5 = vpop.eup %3976  ;;  %3998 = vpow2.f32 %v3357_v36  ;;  %v5157_v9 = vpop.f32.mrb[20].mxu1  ;;  %v2129_v6 = vpack.c.bf16 %v2009_v50, %v2001_v58 }
 0x1aa   : > { %v3979_v7 = vpop.eup %3978  ;;  %4000 = vpow2.f32 %v3359_v19  ;;  %6242 = vst [vmem:[#allocation18_spill] sm:$0xff] %v5157_v9  ;;  %v5159_v13 = vpop.f32.mrb[21].mxu0  ;;  %v3900_v19 = vld [vmem:[#allocation8 + $0x148] sm:$0xff]   ;;  %2741 = vmatprep.mubr.bf16.mxu0 %v2127_v57 }
 0x1ab   : > { %v3981_v16 = vpop.eup %3980  ;;  %6243 = vst [vmem:[#allocation19_spill] sm:$0xff] %v5159_v13  ;;  %4002 = vpow2.f32 %v3364_v44  ;;  %v5161_v56 = vpop.f32.mrb[21].mxu1  ;;  %v3902_v13 = vld [vmem:[#allocation8 + $0x1c8] sm:$0xff]   ;;  %2838 = vmatprep.mubr.bf16.mxu1 %v2129_v6  ;;  %2742 = vmatmul.mubr.bf16.vlgmr.msra.gmra.mrb[64].mxu0 %v2126_v25 }
 0x1ac   : > { %v3983_v61 = vpop.eup %3982  ;;  %v1640_v49 = vadd.f32 1.0, %v3981_v16  ;;  %v5163_v60 = vpop.f32.mrb[22].mxu0  ;;  %4004 = vpow2.f32 %v3366_v43  ;;  %2839 = vmatmul.mubr.bf16.vlgmr.msra.gmra.mrb[64].mxu1 %v2128_v32  ;;  %v5173_v16 = vadd.f32 %v5056_v20, %v4988_v53  ;;  %3645 = vmatpush3.bf16.msra.mxu0 %v3897_v45  ;;  %v3903_v57 = vld [vmem:[#allocation8 + $0x188] sm:$0xff]   ;;  %v5184_v32 = vadd.f32 %v5064_v29, %v4984_v51  ;;  %v3904_v20 = vld [vmem:[#allocation8 + $0x150] sm:$0xff]  }
 0x1ad   : > { %v3985_v1 = vpop.eup %3984  ;;  %v1639_v42 = vadd.f32 1.0, %v3983_v61  ;;  %v5165_v47 = vpop.f32.mrb[22].mxu1  ;;  %v5177_v61 = vadd.f32 %v5062_v28, %v4990_v54  ;;  %3709 = vmatpush3.bf16.msra.mxu1 %v3899_v59  ;;  %3646 = vmatprep.subr.bf16.mxu0 %v3900_v19  ;;  %v5188_v59 = vadd.f32 %v5072_v34, %v4986_v52  ;;  %v3907_v34 = vld [vmem:[#allocation8 + $0x190] sm:$0xff]  }
 0x1ae   : > { %v5167_v36 = vpop.f32.mrb[23].mxu0  ;;  %v3987_v9 = vpop.eup %3986  ;;  %4006 = vrcp.f32 %v1640_v49  ;;  %v1641_v44 = vadd.f32 1.0, %v3985_v1  ;;  %v3901_v49 = vld [vmem:[#allocation8 + $0x108] sm:$0xff]   ;;  %3710 = vmatprep.subr.bf16.mxu1 %v3902_v13  ;;  %v3906_v1 = vld [vmem:[#allocation8 + $0x1d0] sm:$0xff]   ;;  %v5198_v13 = vadd.f32 %v5074_v35, %v4988_v53 }
 0x1af   : > { %v5169_v46 = vpop.f32.mrb[23].mxu1  ;;  %v3989_v50 = vpop.eup %3988  ;;  %4008 = vrcp.f32 %v1639_v42  ;;  %v1646_v10 = vadd.f32 1.0, %v3987_v9  ;;  %6244 = vst [vmem:[#allocation20_spill] sm:$0xff] %v5177_v61  ;;  %v5180_v9 = vmul.f32 %v3979_v7, %v5038_v22  ;;  %v5194_v7 = vmul.f32 %v5135_v12, %v5025_v18 }
 0x1b0   : > { %v3991_v58 = vpop.eup %3990  ;;  %4010 = vrcp.f32 %v1641_v44  ;;  %v1648_v43 = vadd.f32 1.0, %v3989_v50  ;;  %v5190_v42 = vpop.f32.mrb[24].mxu0  ;;  %v3905_v50 = vld [vmem:[#allocation8 + $0x110] sm:$0xff]   ;;  %v3367_v18 = vmul.f32 -1.442695, %v5177_v61  ;;  %3647 = vmatpush3.bf16.msra.mxu0 %v3901_v49 }
 0x1b1   : > { %v3993_v6 = vpop.eup %3992  ;;  %4012 = vrcp.f32 %v1646_v10  ;;  %v1647_v25 = vadd.f32 1.0, %v3991_v58  ;;  %v5200_v19 = vpop.f32.mrb[24].mxu1  ;;  %v3908_v10 = vld [vmem:[#allocation8 + $0x158] sm:$0xff]   ;;  %3711 = vmatpush3.bf16.msra.mxu1 %v3903_v57  ;;  %3648 = vmatprep.subr.bf16.mxu0 %v3904_v20  ;;  %v3374_v57 = vmul.f32 -1.442695, %v5188_v59 }
 0x1b2   : > { %v3995_v28 = vpop.eup %3994  ;;  %4014 = vrcp.f32 %v1648_v43  ;;  %v1649_v45 = vadd.f32 1.0, %v3993_v6  ;;  %6245 = vst [vmem:[#allocation21_spill] sm:$0xff] %v5200_v19  ;;  %v5202_v44 = vpop.f32.mrb[25].mxu0  ;;  %v3365_v6 = vmul.f32 -1.442695, %v5173_v16  ;;  %3712 = vmatprep.subr.bf16.mxu1 %v3906_v1  ;;  %v5227_v1 = vadd.f32 %v5096_v3, %v4984_v51 }
 0x1b3   : > { %v3997_v22 = vpop.eup %3996  ;;  %4016 = vrcp.f32 %v1647_v25  ;;  %v1654_v29 = vadd.f32 1.0, %v3995_v28  ;;  %6246 = vst [vmem:[#allocation22_spill] sm:$0xff] %v5202_v44  ;;  %v5206_v12 = vpop.f32.mrb[25].mxu1  ;;  %v3372_v28 = vmul.f32 -1.442695, %v5184_v32  ;;  %v2016_v3 = vmul.f32 %v5142_v39, %v5028_v21 }
 0x1b4   : > { %v3999_v58 = vpop.eup %3998  ;;  %4018 = vrcp.f32 %v1649_v45  ;;  %v1656_v43 = vadd.f32 1.0, %v3997_v22  ;;  %6247 = vst [vmem:[#allocation23_spill] sm:$0xff] %v5206_v12  ;;  %v5211_v19 = vpop.f32.mrb[26].mxu0  ;;  %v3910_v22 = vld [vmem:[#allocation8 + $0x1d8] sm:$0xff]   ;;  %v3373_v20 = vmul.f32 -1.442695, %v5198_v13  ;;  %3649 = vmatpush3.bf16.msra.mxu0 %v3905_v50  ;;  %v2015_v50 = vmul.f32 %v5145_v40, %v5031_v23 }
 0x1b5   : > { %v4001_v35 = vpop.eup %4000  ;;  %4020 = vrcp.f32 %v1654_v29  ;;  %v1655_v25 = vadd.f32 1.0, %v3999_v58  ;;  %6248 = vst [vmem:[#allocation24_spill] sm:$0xff] %v5211_v19  ;;  %v5213_v45 = vpop.f32.mrb[26].mxu1  ;;  %v5218_v29 = vadd.f32 %v5082_v41, %v4990_v54  ;;  %v5231_v41 = vadd.f32 %v5108_v11, %v4986_v52  ;;  %3713 = vmatpush3.bf16.msra.mxu1 %v3907_v34  ;;  %3650 = vmatprep.subr.bf16.mxu0 %v3908_v10  ;;  %v3912_v11 = vld [vmem:[#allocation8 + $0x160] sm:$0xff]  }
 0x1b6   : > { %6249 = vst [vmem:[#allocation25_spill] sm:$0xff] %v5213_v45  ;;  %v4003_v61 = vpop.eup %4002  ;;  %4022 = vrcp.f32 %v1656_v43  ;;  %v1657_v49 = vadd.f32 1.0, %v4001_v35  ;;  %v5220_v58 = vpop.f32.mrb[27].mxu0  ;;  %3714 = vmatprep.subr.bf16.mxu1 %v3910_v22  ;;  %v5249_v21 = vadd.f32 %v5123_v24, %v4984_v51  ;;  %v5263_v24 = vadd.f32 %v5131_v8, %v4986_v52 }
 0x1b7   : > { %6250 = vst [vmem:[#allocation26_spill] sm:$0xff] %v5220_v58  ;;  %v5222_v12 = vpop.f32.mrb[27].mxu1  ;;  %v4005_v44 = vpop.eup %4004  ;;  %4024 = vrcp.f32 %v1655_v25  ;;  %v1662_v19 = vadd.f32 1.0, %v4003_v61  ;;  %v5235_v58 = vadd.f32 %v5110_v14, %v4988_v53  ;;  %v3909_v61 = vld [vmem:[#allocation8 + $0x118] sm:$0xff]   ;;  %v3914_v14 = vld [vmem:[#allocation8 + $0x1e0] sm:$0xff]  }
 0x1b8   : > { %6251 = vst [vmem:[#allocation27_spill] sm:$0xff] %v5222_v12  ;;  %v4007_v43 = vpop.eup %4006  ;;  %4026 = vrcp.f32 %v1657_v49  ;;  %v1664_v35 = vadd.f32 1.0, %v4005_v44  ;;  %v3911_v25 = vld [vmem:[#allocation8 + $0x198] sm:$0xff]   ;;  %v5242_v44 = vadd.f32 %v5121_v2, %v4990_v54  ;;  %v2017_v2 = vmul.f32 %v5150_v5, %v5035_v26  ;;  %v5256_v22 = vpop.f32.mrb[28].mxu1  ;;  %3651 = vmatpush3.bf16.msra.mxu0 %v3909_v61 }
 0x1b9   : > { %v4009_v12 = vpop.eup %4008  ;;  %v2024_v45 = vmul.f32 %v4007_v43, %v5047_v62  ;;  %4028 = vrcp.f32 %v1662_v19  ;;  %v5251_v62 = vpop.f32.mrb[28].mxu0  ;;  %v3375_v40 = vmul.f32 -1.442695, %v5218_v29  ;;  %3715 = vmatpush3.bf16.msra.mxu1 %v3911_v25  ;;  %3652 = vmatprep.subr.bf16.mxu0 %v3912_v11  ;;  %v3382_v25 = vmul.f32 -1.442695, %v5231_v41 }
 0x1ba   : > { %v4011_v49 = vpop.eup %4010  ;;  %v2023_v34 = vmul.f32 %v4009_v12, %v5050_v4  ;;  %4030 = vrcp.f32 %v1664_v35  ;;  %v5258_v23 = vpop.f32.mrb[29].mxu0  ;;  %3716 = vmatprep.subr.bf16.mxu1 %v3914_v14  ;;  %v6255_v11 = vpack.c.bf16 %v5180_v9, %v5194_v7  ;;  %v3919_v7 = vld [vmem:[#allocation8 + $0x1a8] sm:$0xff]  }
 0x1bb   : > { %v4013_v39 = vpop.eup %4012  ;;  %v2025_v19 = vmul.f32 %v4011_v49, %v5054_v17  ;;  %4032 = vpow2.f32 %v3365_v6  ;;  %v2136_v10 = vpack.c.bf16 %v2024_v45, %v2016_v3  ;;  %v5265_v43 = vpop.f32.mrb[29].mxu1  ;;  %v3913_v17 = vld [vmem:[#allocation8 + $0x120] sm:$0xff]   ;;  %v3380_v6 = vmul.f32 -1.442695, %v5227_v1  ;;  %v3916_v49 = vld [vmem:[#allocation8 + $0x168] sm:$0xff]  }
 0x1bc   : > { %v4015_v4 = vpop.eup %4014  ;;  %4034 = vpow2.f32 %v3367_v18  ;;  %v2135_v12 = vpack.c.bf16 %v2023_v34, %v2015_v50  ;;  %v5267_v26 = vpop.f32.mrb[30].mxu0  ;;  %v5272_v18 = vadd.f32 %v5133_v30, %v4988_v53  ;;  %v3915_v3 = vld [vmem:[#allocation8 + $0x1a0] sm:$0xff]   ;;  %v3918_v50 = vld [vmem:[#allocation8 + $0x1e8] sm:$0xff]   ;;  %v3381_v30 = vmul.f32 -1.442695, %v5235_v58  ;;  %3653 = vmatpush3.bf16.msra.mxu0 %v3913_v17 }
 0x1bd   : > { %v4017_v5 = vpop.eup %4016  ;;  %4036 = vpow2.f32 %v3372_v28  ;;  %v2137_v45 = vpack.c.bf16 %v2025_v19, %v2017_v2  ;;  %v5274_v35 = vpop.f32.mrb[30].mxu1  ;;  %v3383_v2 = vmul.f32 -1.442695, %v5242_v44  ;;  %v3388_v19 = vmul.f32 -1.442695, %v5249_v21  ;;  %3717 = vmatpush3.bf16.msra.mxu1 %v3915_v3  ;;  %3654 = vmatprep.subr.bf16.mxu0 %v3916_v49 }
 0x1be   : > { %6252 = vst [vmem:[#allocation28_spill] sm:$0xff] %v5274_v35  ;;  %v5276_v8 = vpop.f32.mrb[31].mxu0  ;;  %v4019_v61 = vpop.eup %4018  ;;  %4038 = vpow2.f32 %v3374_v57  ;;  %2749 = vmatprep.mubr.bf16.mxu0 %v2135_v12  ;;  %v2030_v14 = vmul.f32 %v4013_v39, %v5060_v27  ;;  %v2032_v35 = vmul.f32 %v4015_v4, %v5067_v31  ;;  %v3389_v9 = vmul.f32 -1.442695, %v5272_v18  ;;  %v3920_v27 = vld [vmem:[#allocation8 + $0x170] sm:$0xff]   ;;  %3718 = vmatprep.subr.bf16.mxu1 %v3918_v50 }
 0x1bf   : > { %6253 = vst [vmem:[#allocation29_spill] sm:$0xff] %v5276_v8  ;;  %v5279_v28 = vpop.f32.mrb[31].mxu1  ;;  %v4021_v34 = vpop.eup %4020  ;;  %4040 = vpow2.f32 %v3373_v20  ;;  %2846 = vmatprep.mubr.bf16.mxu1 %v2137_v45  ;;  %2750 = vmatmul.mubr.bf16.gmra.mrb[68].mxu0 %v6255_v11  ;;  %v3917_v20 = vld [vmem:[#allocation8 + $0x128] sm:$0xff]   ;;  %v3922_v31 = vld [vmem:[#allocation8 + $0x1f0] sm:$0xff]  }
 0x1c0   : > { %6254 = vst [vmem:[#allocation30_spill] sm:$0xff] %v5279_v28  ;;  %v4023_v57 = vpop.eup %4022  ;;  %v2038_v12 = vmul.f32 %v4021_v34, %v5080_v0  ;;  %4042 = vpow2.f32 %v3375_v40  ;;  %v3390_v28 = vmul.f32 -1.442695, %v5263_v24  ;;  %2847 = vmatmul.mubr.bf16.gmra.mrb[68].mxu1 %v2136_v10  ;;  %v2031_v0 = vmul.f32 %v4017_v5, %v5070_v33  ;;  %v5295_v17 = vpop.f32.mrb[32].mxu0  ;;  %3655 = vmatpush3.bf16.msra.mxu0 %v3917_v20 }
 0x1c1   : > { %v4025_v8 = vpop.eup %4024  ;;  %v2040_v45 = vmul.f32 %v4023_v57, %v5089_v55  ;;  %4044 = vpow2.f32 %v3380_v6  ;;  %v2033_v55 = vmul.f32 %v4019_v61, %v5077_v38  ;;  %v5301_v49 = vpop.f32.mrb[32].mxu1  ;;  %3719 = vmatpush3.bf16.msra.mxu1 %v3919_v7  ;;  %3656 = vmatprep.subr.bf16.mxu0 %v3920_v27  ;;  %v3923_v61 = vld [vmem:[#allocation8 + $0x1b0] sm:$0xff]   ;;  %v3925_v7 = vld [vmem:[#allocation8 + $0x138] sm:$0xff]  }
 0x1c2   : > { %v4027_v39 = vpop.eup %4026  ;;  %v2039_v40 = vmul.f32 %v4025_v8, %v5094_v63  ;;  %4046 = vpow2.f32 %v3382_v25  ;;  %v2142_v10 = vpack.c.bf16 %v2038_v12, %v2030_v14  ;;  %v5303_v34 = vpop.f32.mrb[33].mxu0  ;;  %v3921_v25 = vld [vmem:[#allocation8 + $0x130] sm:$0xff]   ;;  %3720 = vmatprep.subr.bf16.mxu1 %v3922_v31  ;;  %v3926_v14 = vld [vmem:[#allocation8 + $0x1f8] sm:$0xff]  }
 0x1c3   : > { %v5297_v4 = vpop.eup %4028  ;;  %v2041_v6 = vmul.f32 %v4027_v39, %v5106_v48  ;;  %4048 = vpow2.f32 %v3381_v30  ;;  %v2144_v3 = vpack.c.bf16 %v2040_v45, %v2032_v35  ;;  %v5307_v5 = vpop.f32.mrb[33].mxu1  ;;  %v3924_v30 = vld [vmem:[#allocation8 + $0x178] sm:$0xff]  }
 0x1c4   : > { %v5305_v33 = vpop.eup %4030  ;;  %4050 = vpow2.f32 %v3383_v2  ;;  %v2143_v63 = vpack.c.bf16 %v2039_v40, %v2031_v0  ;;  %v5309_v8 = vpop.f32.mrb[34].mxu0  ;;  %3657 = vmatpush3.bf16.msra.mxu0 %v3921_v25 }
 0x1c5   : > { %v4033_v50 = vpop.eup %4032  ;;  %4052 = vpow2.f32 %v3388_v19  ;;  %v2145_v38 = vpack.c.bf16 %v2041_v6, %v2033_v55  ;;  %v5311_v48 = vpop.f32.mrb[34].mxu1  ;;  %3721 = vmatpush3.bf16.msra.mxu1 %v3923_v61  ;;  %3658 = vmatprep.subr.bf16.mxu0 %v3924_v30  ;;  %v5329_v30 = vadd.f32 %v5140_v37, %v4990_v54 }
 0x1c6   : > { %v5313_v35 = vpop.f32.mrb[35].mxu0  ;;  %v4035_v11 = vpop.eup %4034  ;;  %v1663_v2 = vadd.f32 1.0, %v4033_v50  ;;  %4054 = vpow2.f32 %v3390_v28  ;;  %2757 = vmatprep.mubr.bf16.mxu0 %v2143_v63  ;;  %v3927_v28 = vld [vmem:[#allocation8 + $0x1b8] sm:$0xff]   ;;  %3722 = vmatprep.subr.bf16.mxu1 %v3926_v14 }
 0x1c7   : > { %6256 = vst [vmem:[#allocation31_spill] sm:$0xff] %v5313_v35  ;;  %v5315_v57 = vpop.f32.mrb[35].mxu1  ;;  %v4037_v12 = vpop.eup %4036  ;;  %v1665_v20 = vadd.f32 1.0, %v4035_v11  ;;  %4056 = vpow2.f32 %v3389_v9  ;;  %2854 = vmatprep.mubr.bf16.mxu1 %v2145_v38  ;;  %2758 = vmatmul.mubr.bf16.gmra.mrb[72].mxu0 %v2142_v10  ;;  %v5333_v11 = vadd.f32 %v5155_v15, %v4984_v51 }
 0x1c8   : > { %6257 = vst [vmem:[#allocation32_spill] sm:$0xff] %v5315_v57  ;;  %v4039_v19 = vpop.eup %4038  ;;  %4058 = vrcp.f32 %v1663_v2  ;;  %v1670_v45 = vadd.f32 1.0, %v4037_v12  ;;  %2855 = vmatmul.mubr.bf16.gmra.mrb[72].mxu1 %v2144_v3  ;;  %v5317_v31 = vpop.f32.mrb[36].mxu0  ;;  %3659 = vmatpush3.bf16.msra.mxu0 %v3925_v7  ;;  %v6279_v57 = vld [vmem:[#allocation20_spill] sm:$0xff] }
 0x1c9   : > { %v4041_v27 = vpop.eup %4040  ;;  %4060 = vrcp.f32 %v1665_v20  ;;  %v1672_v39 = vadd.f32 1.0, %v4039_v19  ;;  %6258 = vst [vmem:[#allocation33_spill] sm:$0xff] %v5317_v31  ;;  %v5319_v55 = vpop.f32.mrb[36].mxu1  ;;  %3723 = vmatpush3.bf16.msra.mxu1 %v3927_v28  ;;  %v6264_v20 = vld [vmem:[#allocation18_spill] sm:$0xff]  ;;  %v5351_v28 = vadd.f32 %v5161_v56, %v4990_v54  ;;  %v3391_v56 = vmul.f32 -1.442695, %v5329_v30 }
 0x1ca   : > { %v4043_v0 = vpop.eup %4042  ;;  %4062 = vrcp.f32 %v1670_v45  ;;  %v1671_v40 = vadd.f32 1.0, %v4041_v27  ;;  %6259 = vst [vmem:[#allocation34_spill] sm:$0xff] %v5319_v55  ;;  %v5321_v6 = vpop.f32.mrb[37].mxu0  ;;  %v5339_v19 = vadd.f32 %v6264_v20, %v4986_v52  ;;  %v6265_v45 = vld [vmem:[#allocation19_spill] sm:$0xff]  ;;  %v6277_v31 = vld [vmem:[#allocation17_spill] sm:$0xff] }
 0x1cb   : > { %v4045_v9 = vpop.eup %4044  ;;  %4064 = vrcp.f32 %v1672_v39  ;;  %v1673_v10 = vadd.f32 1.0, %v4043_v0  ;;  %6260 = vst [vmem:[#allocation35_spill] sm:$0xff] %v5321_v6  ;;  %v5323_v25 = vpop.f32.mrb[37].mxu1  ;;  %v5343_v7 = vadd.f32 %v6265_v45, %v4988_v53  ;;  %v5355_v0 = vadd.f32 %v5163_v60, %v4984_v51 }
 0x1cc   : > { %v4047_v3 = vpop.eup %4046  ;;  %4066 = vrcp.f32 %v1671_v40  ;;  %v1678_v63 = vadd.f32 1.0, %v4045_v9  ;;  %6261 = vst [vmem:[#allocation36_spill] sm:$0xff] %v5323_v25  ;;  %v5325_v50 = vpop.f32.mrb[38].mxu0 }
 0x1cd   : > { %6262 = vst [vmem:[#allocation37_spill] sm:$0xff] %v5325_v50  ;;  %v4049_v38 = vpop.eup %4048  ;;  %4068 = vrcp.f32 %v1673_v10  ;;  %v1680_v61 = vadd.f32 1.0, %v4047_v3  ;;  %v5335_v2 = vpop.f32.mrb[38].mxu1  ;;  %v5359_v10 = vadd.f32 %v5165_v47, %v4986_v52  ;;  %v5363_v3 = vadd.f32 %v5167_v36, %v4988_v53  ;;  %v6273_v50 = vld [vmem:[#allocation16_spill] sm:$0xff] }
 0x1ce   : > { %6263 = vst [vmem:[#allocation38_spill] sm:$0xff] %v5335_v2  ;;  %v4051_v14 = vpop.eup %4050  ;;  %4070 = vrcp.f32 %v1678_v63  ;;  %v1679_v12 = vadd.f32 1.0, %v4049_v38  ;;  %v5345_v37 = vpop.f32.mrb[39].mxu0  ;;  %v3397_v20 = vmul.f32 -1.442695, %v5343_v7 }
 0x1cf   : > { %6266 = vst [vmem:[#allocation18_spill] sm:$0xff] %v5345_v37  ;;  %v5347_v27 = vpop.f32.mrb[39].mxu1  ;;  %v4053_v15 = vpop.eup %4052  ;;  %4072 = vrcp.f32 %v1680_v61  ;;  %v1681_v39 = vadd.f32 1.0, %v4051_v14  ;;  %v3396_v61 = vmul.f32 -1.442695, %v5333_v11 }
 0x1d0   : > { %6267 = vst [vmem:[#allocation19_spill] sm:$0xff] %v5347_v27  ;;  %v4055_v40 = vpop.eup %4054  ;;  %4074 = vrcp.f32 %v1679_v12  ;;  %v1686_v9 = vadd.f32 1.0, %v4053_v15  ;;  %v3398_v12 = vmul.f32 -1.442695, %v5339_v19  ;;  %v5369_v47 = vpop.f32.mrb[40].mxu0 }
 0x1d1   : > { %v4057_v63 = vpop.eup %4056  ;;  %4076 = vrcp.f32 %v1681_v39  ;;  %v1688_v38 = vadd.f32 1.0, %v4055_v40  ;;  %6268 = vst [vmem:[#allocation39_spill] sm:$0xff] %v5369_v47  ;;  %v3399_v36 = vmul.f32 -1.442695, %v5351_v28  ;;  %v3404_v15 = vmul.f32 -1.442695, %v5355_v0 }
 0x1d2   : > { %v4059_v60 = vpop.eup %4058  ;;  %4078 = vrcp.f32 %v1686_v9  ;;  %v1687_v14 = vadd.f32 1.0, %v4057_v63  ;;  %v5375_v39 = vadd.f32 %v5169_v46, %v4990_v54  ;;  %v5377_v40 = vpop.f32.mrb[40].mxu1  ;;  %v3406_v27 = vmul.f32 -1.442695, %v5359_v10 }
 0x1d3   : > { %v4061_v45 = vpop.eup %4060  ;;  %4080 = vrcp.f32 %v1688_v38  ;;  %6269 = vst [vmem:[#allocation40_spill] sm:$0xff] %v5377_v40  ;;  %v5379_v9 = vpop.f32.mrb[41].mxu0  ;;  %v3405_v47 = vmul.f32 -1.442695, %v5363_v3  ;;  %v5385_v38 = vadd.f32 %v5190_v42, %v4984_v51  ;;  %v2046_v40 = vmul.f32 %v5297_v4, %v6273_v50  ;;  %v6278_v4 = vld [vmem:[#allocation22_spill] sm:$0xff] }
 0x1d4   : > { %6270 = vst [vmem:[#allocation41_spill] sm:$0xff] %v5379_v9  ;;  %v4063_v63 = vpop.eup %4062  ;;  %4082 = vrcp.f32 %v1687_v14  ;;  %v5387_v37 = vpop.f32.mrb[41].mxu1  ;;  %v6274_v14 = vld [vmem:[#allocation21_spill] sm:$0xff]  ;;  %v5407_v50 = vadd.f32 %v6278_v4, %v4988_v53  ;;  %v2049_v35 = vmul.f32 %v4061_v45, %v6279_v57 }
 0x1d5   : > { %6271 = vst [vmem:[#allocation42_spill] sm:$0xff] %v5387_v37  ;;  %v5389_v2 = vpop.f32.mrb[42].mxu0  ;;  %v4065_v46 = vpop.eup %4064  ;;  %v2054_v9 = vmul.f32 %v4063_v63, %v5184_v32  ;;  %4084 = vpow2.f32 %v3391_v56  ;;  %v5396_v25 = vadd.f32 %v6274_v14, %v4986_v52  ;;  %v2048_v37 = vmul.f32 %v5305_v33, %v6277_v31 }
 0x1d6   : > { %6272 = vst [vmem:[#allocation43_spill] sm:$0xff] %v5389_v2  ;;  %v5398_v6 = vpop.f32.mrb[42].mxu1  ;;  %v5400_v55 = vpop.f32.mrb[43].mxu0  ;;  %v2056_v2 = vmul.f32 %v4065_v46, %v5188_v59  ;;  %4086 = vpow2.f32 %v3396_v61  ;;  %v2047_v63 = vmul.f32 %v4059_v60, %v5173_v16  ;;  %v3407_v61 = vmul.f32 -1.442695, %v5375_v39  ;;  %v6280_v46 = vld [vmem:[#allocation23_spill] sm:$0xff] }
 0x1d7   : > { %6275 = vst [vmem:[#allocation16_spill] sm:$0xff] %v5398_v6  ;;  %6276 = vst [vmem:[#allocation21_spill] sm:$0xff] %v5400_v55  ;;  %v4067_v42 = vpop.eup %4066  ;;  %v5409_v32 = vpop.f32.mrb[43].mxu1  ;;  %4088 = vpow2.f32 %v3398_v12  ;;  %v2150_v55 = vpack.c.bf16 %v2054_v9, %v2046_v40  ;;  %v5418_v4 = vadd.f32 %v6280_v46, %v4990_v54  ;;  %v3413_v45 = vmul.f32 -1.442695, %v5407_v50 }
 0x1d8   : > { %v4069_v56 = vpop.eup %4068  ;;  %v2055_v14 = vmul.f32 %v4067_v42, %v5198_v13  ;;  %4090 = vpow2.f32 %v3397_v20  ;;  %v2152_v59 = vpack.c.bf16 %v2056_v2, %v2048_v37  ;;  %v3412_v13 = vmul.f32 -1.442695, %v5385_v38  ;;  %v5421_v40 = vpop.f32.mrb[44].mxu0 }
 0x1d9   : > { %v4071_v6 = vpop.eup %4070  ;;  %v2057_v33 = vmul.f32 %v4069_v56, %v5218_v29  ;;  %4092 = vpow2.f32 %v3399_v36  ;;  %v3414_v29 = vmul.f32 -1.442695, %v5396_v25  ;;  %v5426_v2 = vpop.f32.mrb[44].mxu1  ;;  %v3415_v42 = vmul.f32 -1.442695, %v5418_v4 }
 0x1da   : > { %v4073_v31 = vpop.eup %4072  ;;  %v2151_v16 = vpack.c.bf16 %v2055_v14, %v2047_v63  ;;  %4094 = vpow2.f32 %v3404_v15  ;;  %v5428_v37 = vpop.f32.mrb[45].mxu0 }
 0x1db   : > { %v4075_v60 = vpop.eup %4074  ;;  %v2153_v12 = vpack.c.bf16 %v2057_v33, %v2049_v35  ;;  %4096 = vpow2.f32 %v3406_v27  ;;  %v5431_v36 = vpop.f32.mrb[45].mxu1  ;;  %v2062_v27 = vmul.f32 %v4071_v6, %v5227_v1 }
 0x1dc   : > { %v5423_v57 = vpop.eup %4076  ;;  %2765 = vmatprep.mubr.bf16.mxu0 %v2151_v16  ;;  %4098 = vpow2.f32 %v3405_v47  ;;  %v5433_v35 = vpop.f32.mrb[46].mxu0 }
 0x1dd   : > { %v4079_v20 = vpop.eup %4078  ;;  %2862 = vmatprep.mubr.bf16.mxu1 %v2153_v12  ;;  %2766 = vmatmul.mubr.bf16.gmra.mrb[76].mxu0 %v2150_v55  ;;  %4100 = vpow2.f32 %v3407_v61  ;;  %v5438_v56 = vpop.f32.mrb[46].mxu1  ;;  %v5443_v55 = vmul.f32 %v4073_v31, %v5231_v41 }
 0x1de   : > { %v4081_v15 = vpop.eup %4080  ;;  %v2070_v9 = vmul.f32 %v4079_v20, %v5249_v21  ;;  %2863 = vmatmul.mubr.bf16.gmra.mrb[76].mxu1 %v2152_v59  ;;  %v5440_v47 = vpop.f32.mrb[47].mxu0  ;;  %4102 = vpow2.f32 %v3412_v13  ;;  %v2063_v21 = vmul.f32 %v4075_v60, %v5235_v58 }
 0x1df   : > { %6281 = vst [vmem:[#allocation17_spill] sm:$0xff] %v5440_v47  ;;  %v4083_v63 = vpop.eup %4082  ;;  %v5446_v14 = vmul.f32 %v4081_v15, %v5263_v24  ;;  %v5448_v33 = vpop.f32.mrb[47].mxu1  ;;  %4104 = vpow2.f32 %v3414_v29 }
 0x1e0   : > { %6282 = vst [vmem:[#allocation22_spill] sm:$0xff] %v5448_v33  ;;  %v4085_v1 = vpop.eup %4084  ;;  %v2071_v6 = vmul.f32 %v4083_v63, %v5272_v18  ;;  %v2158_v59 = vpack.c.bf16 %v2070_v9, %v2062_v27  ;;  %4106 = vpow2.f32 %v3413_v45  ;;  %v5454_v20 = vpop.f32.mrb[48].mxu0  ;;  %v6286_v27 = vld [vmem:[#allocation24_spill] sm:$0xff] }
 0x1e1   : > { %v4087_v61 = vpop.eup %4086  ;;  %v1689_v46 = vadd.f32 1.0, %v4085_v1  ;;  %4108 = vpow2.f32 %v3415_v42  ;;  %6283 = vst [vmem:[#allocation20_spill] sm:$0xff] %v5454_v20  ;;  %v5456_v60 = vpop.f32.mrb[48].mxu1  ;;  %v5462_v9 = vadd.f32 %v6286_v27, %v4984_v51  ;;  %v6306_v20 = vld [vmem:[#allocation30_spill] sm:$0xff] }
 0x1e2   : > { %v4089_v31 = vpop.eup %4088  ;;  %v1694_v16 = vadd.f32 1.0, %v4087_v61  ;;  %v2159_v24 = vpack.c.bf16 %v2071_v6, %v2063_v21  ;;  %6284 = vst [vmem:[#allocation23_spill] sm:$0xff] %v5456_v60  ;;  %v5458_v29 = vpop.f32.mrb[49].mxu0  ;;  %v6288_v21 = vld [vmem:[#allocation25_spill] sm:$0xff]  ;;  %v6289_v61 = vld [vmem:[#allocation26_spill] sm:$0xff]  ;;  %v5552_v33 = vadd.f32 %v6306_v20, %v4990_v54 }
 0x1e3   : > { %v4091_v13 = vpop.eup %4090  ;;  %4110 = vrcp.f32 %v1689_v46  ;;  %v1696_v12 = vadd.f32 1.0, %v4089_v31  ;;  %6285 = vst [vmem:[#allocation44_spill] sm:$0xff] %v5458_v29  ;;  %v5464_v42 = vpop.f32.mrb[49].mxu1  ;;  %v5468_v6 = vadd.f32 %v6288_v21, %v4986_v52  ;;  %v5472_v46 = vadd.f32 %v6289_v61, %v4988_v53  ;;  %v6294_v61 = vld [vmem:[#allocation15_spill] sm:$0xff] }
 0x1e4   : > { %v4093_v58 = vpop.eup %4092  ;;  %4112 = vrcp.f32 %v1694_v16  ;;  %v1695_v18 = vadd.f32 1.0, %v4091_v13  ;;  %2773 = vmatprep.mubr.bf16.mxu0 %v2159_v24  ;;  %6287 = vst [vmem:[#allocation24_spill] sm:$0xff] %v5464_v42  ;;  %v5474_v31 = vpop.f32.mrb[50].mxu0  ;;  %v3420_v21 = vmul.f32 -1.442695, %v5462_v9  ;;  %v388_v41 = vsub.s32 4, %v6294_v61 }
 0x1e5   : > { %v4095_v45 = vpop.eup %4094  ;;  %4114 = vrcp.f32 %v1696_v12  ;;  %v1697_v15 = vadd.f32 1.0, %v4093_v58  ;;  %2774 = vmatmul.mubr.bf16.gmra.mrb[80].mxu0 %v2158_v59  ;;  %6290 = vst [vmem:[#allocation25_spill] sm:$0xff] %v5474_v31  ;;  %v5476_v13 = vpop.f32.mrb[50].mxu1 }
 0x1e6   : > { %v4097_v63 = vpop.eup %4096  ;;  %4116 = vrcp.f32 %v1695_v18  ;;  %v1702_v1 = vadd.f32 1.0, %v4095_v45  ;;  %6291 = vst [vmem:[#allocation26_spill] sm:$0xff] %v5476_v13  ;;  %v5478_v59 = vpop.f32.mrb[51].mxu0  ;;  %v3421_v13 = vmul.f32 -1.442695, %v5472_v46 }
 0x1e7   : > { %v4099_v16 = vpop.eup %4098  ;;  %4118 = vrcp.f32 %v1697_v15  ;;  %v1704_v24 = vadd.f32 1.0, %v4097_v63  ;;  %6292 = vst [vmem:[#allocation45_spill] sm:$0xff] %v5478_v59  ;;  %v5480_v18 = vpop.f32.mrb[51].mxu1  ;;  %v3422_v63 = vmul.f32 -1.442695, %v5468_v6 }
 0x1e8   : > { %v4101_v12 = vpop.eup %4100  ;;  %4120 = vrcp.f32 %v1702_v1  ;;  %v1703_v58 = vadd.f32 1.0, %v4099_v16  ;;  %6293 = vst [vmem:[#allocation46_spill] sm:$0xff] %v5480_v18  ;;  %v6295_v16 = vld [vmem:[#allocation27_spill] sm:$0xff] }
 0x1e9   : > { %v4103_v45 = vpop.eup %4102  ;;  %4122 = vrcp.f32 %v1704_v24  ;;  %v1705_v27 = vadd.f32 1.0, %v4101_v12  ;;  %v5488_v18 = vadd.f32 %v6295_v16, %v4990_v54  ;;  %v5492_v24 = vadd.f32 %v5251_v62, %v4984_v51  ;;  %v5494_v12 = vpop.f32.mrb[52].mxu0 }
 0x1ea   : > { %v4105_v31 = vpop.eup %4104  ;;  %4124 = vrcp.f32 %v1703_v58  ;;  %v1710_v15 = vadd.f32 1.0, %v4103_v45  ;;  %6296 = vst [vmem:[#allocation15_spill] sm:$0xff] %v5494_v12  ;;  %v5498_v45 = vadd.f32 %v5256_v22, %v4986_v52  ;;  %v5506_v16 = vpop.f32.mrb[53].mxu0  ;;  %v5510_v12 = vadd.f32 %v5265_v43, %v4990_v54 }
 0x1eb   : > { %v4107_v59 = vpop.eup %4106  ;;  %4126 = vrcp.f32 %v1705_v27  ;;  %v1712_v1 = vadd.f32 1.0, %v4105_v31  ;;  %v5502_v31 = vadd.f32 %v5258_v23, %v4988_v53  ;;  %v5504_v27 = vpop.f32.mrb[52].mxu1  ;;  %6298 = vst [vmem:[#allocation47_spill] sm:$0xff] %v5506_v16  ;;  %v2065_v23 = vmul.f32 %v5423_v57, %v5242_v44 }
 0x1ec   : > { %v4109_v42 = vpop.eup %4108  ;;  %4128 = vrcp.f32 %v1710_v15  ;;  %v1711_v58 = vadd.f32 1.0, %v4107_v59  ;;  %6297 = vst [vmem:[#allocation27_spill] sm:$0xff] %v5504_v27  ;;  %v5514_v59 = vadd.f32 %v5267_v26, %v4984_v51  ;;  %v5516_v22 = vpop.f32.mrb[53].mxu1  ;;  %v3423_v51 = vmul.f32 -1.442695, %v5488_v18  ;;  %v5530_v26 = vld [vmem:[#allocation7] sm:$0xff] }
 0x1ed   : > { %v4111_v29 = vpop.eup %4110  ;;  %4130 = vrcp.f32 %v1712_v1  ;;  %v1713_v62 = vadd.f32 1.0, %v4109_v42  ;;  %6299 = vst [vmem:[#allocation48_spill] sm:$0xff] %v5516_v22  ;;  %v6300_v1 = vld [vmem:[#allocation28_spill] sm:$0xff]  ;;  %v5525_v16 = vpop.f32.mrb[54].mxu0  ;;  %v5533_v22 = vrot.slane %v5530_v26, %v388_v41  ;;  %v3430_v41 = vmul.f32 -1.442695, %v5498_v45 }
 0x1ee   : > { %v4113_v15 = vpop.eup %4112  ;;  %v2073_v27 = vmul.f32 %v4111_v29, %v5329_v30  ;;  %4132 = vrcp.f32 %v1711_v58  ;;  %v5523_v42 = vadd.f32 %v6300_v1, %v4986_v52  ;;  %6301 = vst [vmem:[#allocation28_spill] sm:$0xff] %v5525_v16  ;;  %v5527_v43 = vpop.f32.mrb[54].mxu1  ;;  %v3428_v29 = vmul.f32 -1.442695, %v5492_v24  ;;  %v6305_v58 = vld [vmem:[#allocation29_spill] sm:$0xff] }
 0x1ef   : > { %6302 = vst [vmem:[#allocation49_spill] sm:$0xff] %v5527_v43  ;;  %v4115_v60 = vpop.eup %4114  ;;  %4134 = vrcp.f32 %v1713_v62  ;;  %v5536_v30 = vpop.f32.mrb[55].mxu0  ;;  %v5543_v62 = vadd.f32 %v6305_v58, %v4988_v53  ;;  %v3429_v16 = vmul.f32 -1.442695, %v5502_v31  ;;  %v3431_v44 = vmul.f32 -1.442695, %v5510_v12 }
 0x1f0   : > { %6303 = vst [vmem:[#allocation50_spill] sm:$0xff] %v5536_v30  ;;  %v5538_v57 = vpop.f32.mrb[55].mxu1  ;;  %v4117_v52 = vpop.eup %4116  ;;  %4136 = vpow2.f32 %v3420_v21  ;;  %v2161_v1 = vpack.c.bf16 %v2073_v27, %v2065_v23  ;;  %v3438_v21 = vmul.f32 -1.442695, %v5523_v42  ;;  %v5558_v23 = vadd.f32 %v5295_v17, %v5533_v22 }
 0x1f1   : > { %6304 = vst [vmem:[#allocation51_spill] sm:$0xff] %v5538_v57  ;;  %v4119_v43 = vpop.eup %4118  ;;  %4138 = vpow2.f32 %v3422_v63  ;;  %v3436_v57 = vmul.f32 -1.442695, %v5514_v59  ;;  %v2078_v63 = vmul.f32 %v4113_v15, %v5333_v11  ;;  %v5563_v58 = vpop.f32.mrb[56].mxu0  ;;  %v2080_v54 = vmul.f32 %v4115_v60, %v5339_v19 }
 0x1f2   : > { %v4121_v30 = vpop.eup %4120  ;;  %4140 = vpow2.f32 %v3421_v13  ;;  %2870 = vmatprep.mubr.bf16.mxu1 %v2161_v1  ;;  %v6307_v13 = vpack.c.bf16 %v5446_v14, %v5443_v55  ;;  %v3437_v11 = vmul.f32 -1.442695, %v5543_v62  ;;  %v5570_v15 = vpop.f32.mrb[57].mxu0 }
 0x1f3   : > { %v4123_v53 = vpop.eup %4122  ;;  %v2086_v27 = vmul.f32 %v4121_v30, %v5355_v0  ;;  %4142 = vpow2.f32 %v3423_v51  ;;  %v5568_v0 = vpop.f32.mrb[56].mxu1  ;;  %v2079_v51 = vmul.f32 %v4117_v52, %v5343_v7 }
 0x1f4   : > { %2871 = vmatmul.mubr.bf16.gmra.mrb[80].mxu1 %v6307_v13  ;;  %v4125_v47 = vpop.eup %4124  ;;  %v2088_v20 = vmul.f32 %v4123_v53, %v5359_v10  ;;  %4144 = vpow2.f32 %v3428_v29  ;;  %v5574_v30 = vpop.f32.mrb[57].mxu1  ;;  %v2081_v10 = vmul.f32 %v4119_v43, %v5351_v28  ;;  %v3320_v28 = vmul.f32 -1.442695, %v5558_v23 }
 0x1f5   : > { %v4127_v17 = vpop.eup %4126  ;;  %v2087_v55 = vmul.f32 %v4125_v47, %v5363_v3  ;;  %4146 = vpow2.f32 %v3430_v41  ;;  %v2166_v14 = vpack.c.bf16 %v2086_v27, %v2078_v63  ;;  %6308 = vst [vmem:[#allocation29_spill] sm:$0xff] %v5574_v30  ;;  %v5576_v1 = vpop.f32.mrb[58].mxu0  ;;  %v3439_v3 = vmul.f32 -1.442695, %v5552_v33 }
 0x1f6   : > { %6309 = vst [vmem:[#allocation30_spill] sm:$0xff] %v5576_v1  ;;  %v5578_v19 = vpop.eup %4128  ;;  %v2089_v60 = vmul.f32 %v4127_v17, %v5375_v39  ;;  %4148 = vpow2.f32 %v3429_v16  ;;  %v2168_v29 = vpack.c.bf16 %v2088_v20, %v2080_v54  ;;  %v5582_v53 = vpop.f32.mrb[58].mxu1  ;;  %v392_v47 = vsub.s32 5, %v6294_v61 }
 0x1f7   : > { %6310 = vst [vmem:[#allocation52_spill] sm:$0xff] %v5582_v53  ;;  %v5584_v13 = vpop.f32.mrb[59].mxu0  ;;  %v5586_v7 = vpop.eup %4130  ;;  %4150 = vpow2.f32 %v3431_v44  ;;  %v2167_v52 = vpack.c.bf16 %v2087_v55, %v2079_v51  ;;  %v400_v39 = vsub.s32 7, %v6294_v61  ;;  %v6313_v20 = vsub.s32 6, %v6294_v61 }
 0x1f8   : > { %6311 = vst [vmem:[#allocation53_spill] sm:$0xff] %v5584_v13  ;;  %v5590_v41 = vpop.f32.mrb[59].mxu1  ;;  %v5592_v63 = vpop.eup %4132  ;;  %4152 = vpow2.f32 %v3436_v57  ;;  %v2169_v16 = vpack.c.bf16 %v2089_v60, %v2081_v10  ;;  %v6326_v13 = vld [vmem:[#allocation35_spill] sm:$0xff] }
 0x1f9   : > { %6312 = vst [vmem:[#allocation54_spill] sm:$0xff] %v5590_v41  ;;  %v5596_v43 = vpop.eup %4134  ;;  %4154 = vpow2.f32 %v3438_v21  ;;  %2781 = vmatprep.mubr.bf16.mxu0 %v2167_v52  ;;  %v5601_v57 = vrot.slane %v5530_v26, %v6313_v20  ;;  %v5603_v17 = vpop.f32.mrb[60].mxu0  ;;  %v5606_v21 = vrot.slane %v5530_v26, %v392_v47 }
 0x1fa   : > { %v4137_v44 = vpop.eup %4136  ;;  %4156 = vpow2.f32 %v3437_v11  ;;  %2878 = vmatprep.mubr.bf16.mxu1 %v2169_v16  ;;  %2782 = vmatmul.mubr.bf16.gmra.mrb[84].mxu0 %v2166_v14  ;;  %6314 = vst [vmem:[#allocation55_spill] sm:$0xff] %v5603_v17  ;;  %v5609_v11 = vrot.slane %v5530_v26, %v400_v39  ;;  %v5611_v14 = vpop.f32.mrb[60].mxu1 }
 0x1fb   : > { %v4139_v27 = vpop.eup %4138  ;;  %v1718_v54 = vadd.f32 1.0, %v4137_v44  ;;  %4158 = vpow2.f32 %v3439_v3  ;;  %6315 = vst [vmem:[#allocation56_spill] sm:$0xff] %v5611_v14  ;;  %v5613_v10 = vpop.f32.mrb[61].mxu0  ;;  %v5625_v44 = vadd.f32 %v5301_v49, %v5601_v57  ;;  %v5639_v49 = vadd.f32 %v5309_v8, %v5533_v22 }
 0x1fc   : > { %2879 = vmatmul.mubr.bf16.gmra.mrb[84].mxu1 %v2168_v29  ;;  %v4141_v51 = vpop.eup %4140  ;;  %v1720_v55 = vadd.f32 1.0, %v4139_v27  ;;  %4160 = vpow2.f32 %v3320_v28  ;;  %6316 = vst [vmem:[#allocation57_spill] sm:$0xff] %v5613_v10  ;;  %v5615_v3 = vpop.f32.mrb[61].mxu1 }
 0x1fd   : > { %v4143_v61 = vpop.eup %4142  ;;  %4162 = vrcp.f32 %v1718_v54  ;;  %v1719_v60 = vadd.f32 1.0, %v4141_v51  ;;  %6317 = vst [vmem:[#allocation58_spill] sm:$0xff] %v5615_v3  ;;  %v5617_v29 = vpop.f32.mrb[62].mxu0  ;;  %v5631_v51 = vadd.f32 %v5303_v34, %v5606_v21 }
 0x1fe   : > { %6318 = vst [vmem:[#allocation59_spill] sm:$0xff] %v5617_v29  ;;  %v4145_v52 = vpop.eup %4144  ;;  %4164 = vrcp.f32 %v1720_v55  ;;  %v1721_v28 = vadd.f32 1.0, %v4143_v61  ;;  %v5619_v16 = vpop.f32.mrb[62].mxu1  ;;  %v5635_v55 = vadd.f32 %v5307_v5, %v5609_v11  ;;  %v3322_v5 = vmul.f32 -1.442695, %v5625_v44 }
 0x1ff   : > { %6319 = vst [vmem:[#allocation60_spill] sm:$0xff] %v5619_v16  ;;  %v5621_v47 = vpop.f32.mrb[63].mxu0  ;;  %v4147_v26 = vpop.eup %4146  ;;  %4166 = vrcp.f32 %v1719_v60  ;;  %v1726_v39 = vadd.f32 1.0, %v4145_v52  ;;  %v3321_v16 = vmul.f32 -1.442695, %v5631_v51 }
 0x200   : > { %6320 = vst [vmem:[#allocation61_spill] sm:$0xff] %v5621_v47  ;;  %v5627_v27 = vpop.f32.mrb[63].mxu1  ;;  %v4149_v54 = vpop.eup %4148  ;;  %4168 = vrcp.f32 %v1721_v28  ;;  %v1728_v20 = vadd.f32 1.0, %v4147_v26  ;;  %v5643_v28 = vadd.f32 %v5311_v48, %v5601_v57  ;;  %v6322_v47 = vld [vmem:[#allocation31_spill] sm:$0xff]  ;;  %v3328_v29 = vmul.f32 -1.442695, %v5639_v49 }
 0x201   : > { %6321 = vst [vmem:[#allocation62_spill] sm:$0xff] %v5627_v27  ;;  %v4151_v61 = vpop.eup %4150  ;;  %4170 = vrcp.f32 %v1726_v39  ;;  %v1727_v60 = vadd.f32 1.0, %v4149_v54  ;;  %v5648_v39 = vadd.f32 %v6322_v47, %v5606_v21 }
 0x202   : > { %v4153_v52 = vpop.eup %4152  ;;  %4172 = vrcp.f32 %v1728_v20  ;;  %v1729_v27 = vadd.f32 1.0, %v4151_v61  ;;  %v3323_v20 = vmul.f32 -1.442695, %v5635_v55  ;;  %v3330_v10 = vmul.f32 -1.442695, %v5643_v28 }
 0x203   : > { %v4155_v34 = vpop.eup %4154  ;;  %4174 = vrcp.f32 %v1727_v60  ;;  %v1734_v26 = vadd.f32 1.0, %v4153_v52  ;;  %v6323_v60 = vld [vmem:[#allocation32_spill] sm:$0xff] }
 0x204   : > { %v4157_v54 = vpop.eup %4156  ;;  %4176 = vrcp.f32 %v1729_v27  ;;  %v1736_v8 = vadd.f32 1.0, %v4155_v34  ;;  %v5655_v52 = vadd.f32 %v6323_v60, %v5609_v11  ;;  %v6324_v27 = vld [vmem:[#allocation33_spill] sm:$0xff] }
 0x205   : > { %v4159_v61 = vpop.eup %4158  ;;  %4178 = vrcp.f32 %v1734_v26  ;;  %v1735_v48 = vadd.f32 1.0, %v4157_v54  ;;  %v5660_v34 = vadd.f32 %v6324_v27, %v5533_v22  ;;  %v3329_v26 = vmul.f32 -1.442695, %v5648_v39  ;;  %v6325_v54 = vld [vmem:[#allocation34_spill] sm:$0xff] }
 0x206   : > { %v4161_v3 = vpop.eup %4160  ;;  %4180 = vrcp.f32 %v1736_v8  ;;  %v1737_v47 = vadd.f32 1.0, %v4159_v61  ;;  %v5665_v41 = vadd.f32 %v6325_v54, %v5601_v57  ;;  %v2094_v8 = vmul.f32 %v5578_v19, %v5385_v38  ;;  %v6327_v54 = vld [vmem:[#allocation36_spill] sm:$0xff] }
 0x207   : > { %v4163_v14 = vpop.eup %4162  ;;  %4182 = vrcp.f32 %v1735_v48  ;;  %v1618_v17 = vadd.f32 1.0, %v4161_v3  ;;  %v5672_v27 = vadd.f32 %v6326_v13, %v5606_v21  ;;  %v2096_v3 = vmul.f32 %v5586_v7, %v5396_v25 }
 0x208   : > { %v4165_v60 = vpop.eup %4164  ;;  %v2102_v61 = vmul.f32 %v4163_v14, %v5462_v9  ;;  %4184 = vrcp.f32 %v1737_v47  ;;  %v5679_v30 = vadd.f32 %v6327_v54, %v5609_v11  ;;  %v2095_v38 = vmul.f32 %v5592_v63, %v5407_v50  ;;  %v6328_v47 = vld [vmem:[#allocation37_spill] sm:$0xff]  ;;  %v6329_v63 = vld [vmem:[#allocation38_spill] sm:$0xff] }
 0x209   : > { %v4167_v53 = vpop.eup %4166  ;;  %v2104_v48 = vmul.f32 %v4165_v60, %v5468_v6  ;;  %4186 = vrcp.f32 %v1618_v17  ;;  %v2097_v14 = vmul.f32 %v5596_v43, %v5418_v4  ;;  %v3331_v17 = vmul.f32 -1.442695, %v5655_v52 }
 0x20a   : > { %v4169_v1 = vpop.eup %4168  ;;  %v2103_v9 = vmul.f32 %v4167_v53, %v5472_v46  ;;  %4188 = vpow2.f32 %v3322_v5  ;;  %v2174_v19 = vpack.c.bf16 %v2102_v61, %v2094_v8  ;;  %v5690_v60 = vadd.f32 %v6328_v47, %v5533_v22 }
 0x20b   : > { %v4171_v13 = vpop.eup %4170  ;;  %v2105_v25 = vmul.f32 %v4169_v1, %v5488_v18  ;;  %4190 = vpow2.f32 %v3321_v16  ;;  %v2176_v6 = vpack.c.bf16 %v2104_v48, %v2096_v3  ;;  %v3336_v53 = vmul.f32 -1.442695, %v5660_v34 }
 0x20c   : > { %v4173_v7 = vpop.eup %4172  ;;  %4192 = vpow2.f32 %v3323_v20  ;;  %v2175_v50 = vpack.c.bf16 %v2103_v9, %v2095_v38  ;;  %v5695_v4 = vadd.f32 %v6329_v63, %v5601_v57  ;;  %v3338_v43 = vmul.f32 -1.442695, %v5665_v41 }
 0x20d   : > { %v4175_v46 = vpop.eup %4174  ;;  %4194 = vpow2.f32 %v3328_v29  ;;  %v2177_v18 = vpack.c.bf16 %v2105_v25, %v2097_v14  ;;  %v3337_v5 = vmul.f32 -1.442695, %v5672_v27  ;;  %v3339_v20 = vmul.f32 -1.442695, %v5679_v30 }
 0x20e   : > { %v4177_v1 = vpop.eup %4176  ;;  %4196 = vpow2.f32 %v3330_v10  ;;  %2789 = vmatprep.mubr.bf16.mxu0 %v2175_v50  ;;  %v2110_v8 = vmul.f32 %v4171_v13, %v5492_v24  ;;  %v3344_v3 = vmul.f32 -1.442695, %v5690_v60  ;;  %v2112_v48 = vmul.f32 %v4173_v7, %v5498_v45 }
 0x20f   : > { %v4179_v16 = vpop.eup %4178  ;;  %4198 = vpow2.f32 %v3329_v26  ;;  %2886 = vmatprep.mubr.bf16.mxu1 %v2177_v18  ;;  %2790 = vmatmul.mubr.bf16.gmra.mrb[88].mxu0 %v2174_v19  ;;  %v3346_v54 = vmul.f32 -1.442695, %v5695_v4  ;;  %v2111_v9 = vmul.f32 %v4175_v46, %v5502_v31  ;;  %v2113_v13 = vmul.f32 %v4177_v1, %v5510_v12  ;;  %v6330_v46 = vld [vmem:[#allocation18_spill] sm:$0xff] }
 0x210   : > { %v4181_v29 = vpop.eup %4180  ;;  %v2118_v61 = vmul.f32 %v4179_v16, %v5514_v59  ;;  %4200 = vpow2.f32 %v3331_v17  ;;  %2887 = vmatmul.mubr.bf16.gmra.mrb[88].mxu1 %v2176_v6 }
 0x211   : > { %v4183_v10 = vpop.eup %4182  ;;  %v2120_v26 = vmul.f32 %v4181_v29, %v5523_v42  ;;  %4202 = vpow2.f32 %v3336_v53  ;;  %v5714_v53 = vadd.f32 %v6330_v46, %v5606_v21 }
 0x212   : > { %v4185_v38 = vpop.eup %4184  ;;  %v2119_v19 = vmul.f32 %v4183_v10, %v5543_v62  ;;  %4204 = vpow2.f32 %v3338_v43  ;;  %v2182_v24 = vpack.c.bf16 %v2118_v61, %v2110_v8  ;;  %v6331_v10 = vld [vmem:[#allocation19_spill] sm:$0xff] }
 0x213   : > { %v5708_v59 = vpop.eup %4186  ;;  %v2121_v14 = vmul.f32 %v4185_v38, %v5552_v33  ;;  %4206 = vpow2.f32 %v3337_v5  ;;  %v2184_v45 = vpack.c.bf16 %v2120_v26, %v2112_v48  ;;  %v3345_v8 = vmul.f32 -1.442695, %v5714_v53  ;;  %v6332_v26 = vld [vmem:[#allocation39_spill] sm:$0xff] }
 0x214   : > { %v4189_v25 = vpop.eup %4188  ;;  %4208 = vpow2.f32 %v3339_v20  ;;  %v2183_v42 = vpack.c.bf16 %v2119_v19, %v2111_v9  ;;  %v5719_v48 = vadd.f32 %v6331_v10, %v5609_v11  ;;  %v6333_v19 = vld [vmem:[#allocation40_spill] sm:$0xff] }
 0x215   : > { %v4191_v6 = vpop.eup %4190  ;;  %v1620_v7 = vadd.f32 1.0, %v4189_v25  ;;  %4210 = vpow2.f32 %v3344_v3  ;;  %v2185_v17 = vpack.c.bf16 %v2121_v14, %v2113_v13  ;;  %v6334_v13 = vld [vmem:[#allocation41_spill] sm:$0xff] }
 0x216   : > { %v4193_v31 = vpop.eup %4192  ;;  %v1619_v47 = vadd.f32 1.0, %v4191_v6  ;;  %4212 = vpow2.f32 %v3346_v54  ;;  %2797 = vmatprep.mubr.bf16.mxu0 %v2183_v42  ;;  %v5723_v54 = vadd.f32 %v6332_v26, %v5533_v22  ;;  %v5731_v14 = vadd.f32 %v6334_v13, %v5606_v21  ;;  %v6335_v42 = vld [vmem:[#allocation42_spill] sm:$0xff] }
 0x217   : > { %v4195_v62 = vpop.eup %4194  ;;  %4214 = vrcp.f32 %v1620_v7  ;;  %v1621_v50 = vadd.f32 1.0, %v4193_v31  ;;  %2894 = vmatprep.mubr.bf16.mxu1 %v2185_v17  ;;  %2798 = vmatmul.mubr.bf16.gmra.mrb[92].mxu0 %v2182_v24  ;;  %v5727_v24 = vadd.f32 %v6333_v19, %v5601_v57  ;;  %v5735_v6 = vadd.f32 %v6335_v42, %v5609_v11  ;;  %v6336_v7 = vld [vmem:[#allocation43_spill] sm:$0xff] }
 0x218   : > { %v4197_v12 = vpop.eup %4196  ;;  %4216 = vrcp.f32 %v1619_v47  ;;  %v1626_v33 = vadd.f32 1.0, %v4195_v62  ;;  %2895 = vmatmul.mubr.bf16.gmra.mrb[92].mxu1 %v2184_v45  ;;  %v5739_v17 = vadd.f32 %v6336_v7, %v5533_v22  ;;  %v6337_v62 = vld [vmem:[#allocation16_spill] sm:$0xff]  ;;  %v2002_v13 = vmul.f32 %v5708_v59, %v5558_v23 }
 0x219   : > { %v4199_v63 = vpop.eup %4198  ;;  %4218 = vrcp.f32 %v1621_v50  ;;  %v1628_v18 = vadd.f32 1.0, %v4197_v12  ;;  %v5743_v50 = vadd.f32 %v6337_v62, %v5601_v57  ;;  %v6338_v12 = vld [vmem:[#allocation21_spill] sm:$0xff] }
 0x21a   : > { %v4201_v1 = vpop.eup %4200  ;;  %4220 = vrcp.f32 %v1626_v33  ;;  %v1627_v43 = vadd.f32 1.0, %v4199_v63  ;;  %v5747_v33 = vadd.f32 %v6338_v12, %v5606_v21 }
 0x21b   : > { %v4203_v16 = vpop.eup %4202  ;;  %4222 = vrcp.f32 %v1628_v18  ;;  %v1629_v5 = vadd.f32 1.0, %v4201_v1  ;;  %v3347_v18 = vmul.f32 -1.442695, %v5719_v48  ;;  %v3362_v26 = vmul.f32 -1.442695, %v5743_v50 }
 0x21c   : > { %v4205_v20 = vpop.eup %4204  ;;  %4224 = vrcp.f32 %v1627_v43  ;;  %v1634_v29 = vadd.f32 1.0, %v4203_v16  ;;  %v3352_v43 = vmul.f32 -1.442695, %v5723_v54  ;;  %v3354_v16 = vmul.f32 -1.442695, %v5727_v24 }
 0x21d   : > { %v4207_v61 = vpop.eup %4206  ;;  %4226 = vrcp.f32 %v1629_v5  ;;  %v1636_v3 = vadd.f32 1.0, %v4205_v20  ;;  %v3353_v5 = vmul.f32 -1.442695, %v5731_v14 }
 0x21e   : > { %v4209_v38 = vpop.eup %4208  ;;  %4228 = vrcp.f32 %v1634_v29  ;;  %v1635_v9 = vadd.f32 1.0, %v4207_v61  ;;  %v3355_v29 = vmul.f32 -1.442695, %v5735_v6  ;;  %v3360_v61 = vmul.f32 -1.442695, %v5739_v17 }
 0x21f   : > { %v4211_v45 = vpop.eup %4210  ;;  %4230 = vrcp.f32 %v1636_v3  ;;  %v1637_v25 = vadd.f32 1.0, %v4209_v38  ;;  %v5757_v3 = vadd.f32 %v5409_v32, %v5609_v11  ;;  %v3361_v38 = vmul.f32 -1.442695, %v5747_v33 }
 0x220   : > { %v4213_v31 = vpop.eup %4212  ;;  %4232 = vrcp.f32 %v1635_v9  ;;  %v1642_v47 = vadd.f32 1.0, %v4211_v45  ;;  %v5763_v9 = vadd.f32 %v5421_v40, %v5533_v22  ;;  %v5770_v32 = vadd.f32 %v5426_v2, %v5601_v57 }
 0x221   : > { %v4215_v46 = vpop.eup %4214  ;;  %4234 = vrcp.f32 %v1637_v25  ;;  %v1644_v63 = vadd.f32 1.0, %v4213_v31  ;;  %v5776_v40 = vadd.f32 %v5428_v37, %v5606_v21  ;;  %v3363_v62 = vmul.f32 -1.442695, %v5757_v3 }
 0x222   : > { %v4217_v1 = vpop.eup %4216  ;;  %4236 = vrcp.f32 %v1642_v47  ;;  %v2004_v25 = vmul.f32 %v4215_v46, %v5625_v44 }
 0x223   : > { %v4219_v20 = vpop.eup %4218  ;;  %4238 = vrcp.f32 %v1644_v63  ;;  %v2003_v23 = vmul.f32 %v4217_v1, %v5631_v51  ;;  %v3368_v51 = vmul.f32 -1.442695, %v5763_v9 }
 0x224   : > { %v4221_v10 = vpop.eup %4220  ;;  %4240 = vpow2.f32 %v3345_v8  ;;  %v2005_v2 = vmul.f32 %v4219_v20, %v5635_v55  ;;  %v3370_v55 = vmul.f32 -1.442695, %v5770_v32 }
 0x225   : > { %v4223_v19 = vpop.eup %4222  ;;  %v2010_v45 = vmul.f32 %v4221_v10, %v5639_v49  ;;  %4242 = vpow2.f32 %v3347_v18 }
 0x226   : > { %v4225_v8 = vpop.eup %4224  ;;  %v2012_v42 = vmul.f32 %v4223_v19, %v5643_v28  ;;  %4244 = vpow2.f32 %v3352_v43 }
 0x227   : > { %v4227_v7 = vpop.eup %4226  ;;  %v2130_v59 = vpack.c.bf16 %v2010_v45, %v2002_v13  ;;  %v2011_v49 = vmul.f32 %v4225_v8, %v5648_v39  ;;  %4246 = vpow2.f32 %v3354_v16 }
 0x228   : > { %v4229_v31 = vpop.eup %4228  ;;  %v2132_v47 = vpack.c.bf16 %v2012_v42, %v2004_v25  ;;  %v2013_v44 = vmul.f32 %v4227_v7, %v5655_v52  ;;  %4248 = vpow2.f32 %v3353_v5  ;;  %v3369_v52 = vmul.f32 -1.442695, %v5776_v40 }
 0x229   : > { %v4231_v28 = vpop.eup %4230  ;;  %4250 = vpow2.f32 %v3355_v29  ;;  %v2131_v37 = vpack.c.bf16 %v2011_v49, %v2003_v23  ;;  %v5791_v1 = vmul.f32 %v4229_v31, %v5660_v34  ;;  %v5808_v42 = vadd.f32 %v5431_v36, %v5609_v11 }
 0x22a   : > { %v5783_v12 = vpop.eup %4232  ;;  %4252 = vpow2.f32 %v3360_v61  ;;  %v2133_v46 = vpack.c.bf16 %v2013_v44, %v2005_v2  ;;  %v5797_v5 = vmul.f32 %v4231_v28, %v5665_v41  ;;  %v5812_v7 = vadd.f32 %v5433_v35, %v5533_v22 }
 0x22b   : > { %v5786_v39 = vpop.eup %4234  ;;  %4254 = vpow2.f32 %v3362_v26  ;;  %2935 = vmatprep.mubr.bf16.mxu0 %v2131_v37  ;;  %v5816_v2 = vadd.f32 %v5438_v56, %v5601_v57  ;;  %v3371_v37 = vmul.f32 -1.442695, %v5808_v42  ;;  %v6340_v56 = vld [vmem:[#allocation22_spill] sm:$0xff] }
 0x22c   : > { %v4237_v63 = vpop.eup %4236  ;;  %4256 = vpow2.f32 %v3361_v38  ;;  %3032 = vmatprep.mubr.bf16.mxu1 %v2133_v46  ;;  %2936 = vmatmul.mubr.bf16.vlgmr.msra.gmra.mrb[96].mxu0 %v2130_v59 }
 0x22d   : > { %v4239_v18 = vpop.eup %4238  ;;  %v5794_v43 = vmul.f32 %v4237_v63, %v5690_v60  ;;  %4258 = vpow2.f32 %v3363_v62  ;;  %3033 = vmatmul.mubr.bf16.vlgmr.msra.gmra.mrb[96].mxu1 %v2132_v47  ;;  %v6339_v47 = vld [vmem:[#allocation17_spill] sm:$0xff]  ;;  %v5826_v63 = vadd.f32 %v6340_v56, %v5609_v11 }
 0x22e   : > { %v4241_v16 = vpop.eup %4240  ;;  %v5800_v20 = vmul.f32 %v4239_v18, %v5695_v4  ;;  %4260 = vpow2.f32 %v3368_v51  ;;  %v5820_v44 = vadd.f32 %v6339_v47, %v5606_v21  ;;  %v3376_v51 = vmul.f32 -1.442695, %v5812_v7 }
 0x22f   : > { %v4243_v29 = vpop.eup %4242  ;;  %v1643_v61 = vadd.f32 1.0, %v4241_v16  ;;  %4262 = vpow2.f32 %v3370_v55  ;;  %v2138_v34 = vpack.c.bf16 %v5794_v43, %v5791_v1 }
 0x230   : > { %v4245_v10 = vpop.eup %4244  ;;  %v1645_v26 = vadd.f32 1.0, %v4243_v29  ;;  %4264 = vpow2.f32 %v3369_v52  ;;  %v2140_v60 = vpack.c.bf16 %v5800_v20, %v5797_v5  ;;  %v6341_v52 = vld [vmem:[#allocation20_spill] sm:$0xff] }
 0x231   : > { %v4247_v38 = vpop.eup %4246  ;;  %4266 = vrcp.f32 %v1643_v61  ;;  %v1650_v41 = vadd.f32 1.0, %v4245_v10  ;;  %v5830_v18 = vadd.f32 %v6341_v52, %v5533_v22  ;;  %v3378_v61 = vmul.f32 -1.442695, %v5816_v2 }
 0x232   : > { %v4249_v19 = vpop.eup %4248  ;;  %4268 = vrcp.f32 %v1645_v26  ;;  %v1652_v4 = vadd.f32 1.0, %v4247_v38  ;;  %v3377_v10 = vmul.f32 -1.442695, %v5820_v44 }
 0x233   : > { %v4251_v13 = vpop.eup %4250  ;;  %4270 = vrcp.f32 %v1650_v41  ;;  %v1651_v45 = vadd.f32 1.0, %v4249_v19  ;;  %v6342_v41 = vld [vmem:[#allocation23_spill] sm:$0xff] }
 0x234   : > { %v4253_v8 = vpop.eup %4252  ;;  %4272 = vrcp.f32 %v1652_v4  ;;  %v1653_v25 = vadd.f32 1.0, %v4251_v13  ;;  %v5836_v19 = vadd.f32 %v6342_v41, %v5601_v57  ;;  %v6343_v4 = vld [vmem:[#allocation44_spill] sm:$0xff] }
 0x235   : > { %v4255_v23 = vpop.eup %4254  ;;  %4274 = vrcp.f32 %v1651_v45  ;;  %v1658_v59 = vadd.f32 1.0, %v4253_v8  ;;  %v5840_v13 = vadd.f32 %v6343_v4, %v5606_v21  ;;  %v2019_v8 = vmul.f32 %v5783_v12, %v5672_v27 }
 0x236   : > { %v4257_v49 = vpop.eup %4256  ;;  %4276 = vrcp.f32 %v1653_v25  ;;  %v1660_v31 = vadd.f32 1.0, %v4255_v23  ;;  %v6344_v23 = vld [vmem:[#allocation24_spill] sm:$0xff]  ;;  %v3379_v27 = vmul.f32 -1.442695, %v5826_v63 }
 0x237   : > { %v4259_v36 = vpop.eup %4258  ;;  %4278 = vrcp.f32 %v1658_v59  ;;  %v1659_v28 = vadd.f32 1.0, %v4257_v49  ;;  %v5847_v59 = vadd.f32 %v6344_v23, %v5609_v11  ;;  %v3385_v52 = vmul.f32 -1.442695, %v5840_v13 }
 0x238   : > { %v4261_v62 = vpop.eup %4260  ;;  %4280 = vrcp.f32 %v1660_v31  ;;  %v1661_v35 = vadd.f32 1.0, %v4259_v36  ;;  %v2021_v31 = vmul.f32 %v5786_v39, %v5679_v30  ;;  %v6345_v36 = vld [vmem:[#allocation25_spill] sm:$0xff]  ;;  %v3384_v30 = vmul.f32 -1.442695, %v5830_v18 }
 0x239   : > { %v4263_v46 = vpop.eup %4262  ;;  %4282 = vrcp.f32 %v1659_v28  ;;  %v1666_v55 = vadd.f32 1.0, %v4261_v62  ;;  %v5854_v28 = vadd.f32 %v6345_v36, %v5533_v22 }
 0x23a   : > { %v4265_v16 = vpop.eup %4264  ;;  %4284 = vrcp.f32 %v1661_v35  ;;  %v1668_v29 = vadd.f32 1.0, %v4263_v46 }
 0x23b   : > { %v4267_v26 = vpop.eup %4266  ;;  %4286 = vrcp.f32 %v1666_v55  ;;  %v1667_v38 = vadd.f32 1.0, %v4265_v16 }
 0x23c   : > { %v4269_v45 = vpop.eup %4268  ;;  %v2027_v25 = vmul.f32 %v4267_v26, %v5714_v53  ;;  %4288 = vrcp.f32 %v1668_v29  ;;  %v6346_v53 = vld [vmem:[#allocation26_spill] sm:$0xff]  ;;  %v3387_v29 = vmul.f32 -1.442695, %v5847_v59 }
 0x23d   : > { %v4271_v49 = vpop.eup %4270  ;;  %v2029_v47 = vmul.f32 %v4269_v45, %v5719_v48  ;;  %4290 = vrcp.f32 %v1667_v38  ;;  %v5859_v12 = vadd.f32 %v6346_v53, %v5601_v57  ;;  %v6347_v48 = vld [vmem:[#allocation45_spill] sm:$0xff]  ;;  %v6348_v26 = vld [vmem:[#allocation46_spill] sm:$0xff] }
 0x23e   : > { %v4273_v62 = vpop.eup %4272  ;;  %4292 = vpow2.f32 %v3371_v37  ;;  %v2139_v35 = vpack.c.bf16 %v2027_v25, %v2019_v8  ;;  %v5864_v39 = vadd.f32 %v6347_v48, %v5606_v21  ;;  %v3386_v37 = vmul.f32 -1.442695, %v5836_v19 }
 0x23f   : > { %v4275_v46 = vpop.eup %4274  ;;  %4294 = vpow2.f32 %v3376_v51  ;;  %v2141_v55 = vpack.c.bf16 %v2029_v47, %v2021_v31  ;;  %v3392_v51 = vmul.f32 -1.442695, %v5854_v28  ;;  %v5872_v38 = vadd.f32 %v6348_v26, %v5609_v11  ;;  %v6350_v26 = vld [vmem:[#allocation27_spill] sm:$0xff] }
 0x240   : > { %v4277_v56 = vpop.eup %4276  ;;  %4296 = vpow2.f32 %v3378_v61  ;;  %2943 = vmatprep.mubr.bf16.mxu0 %v2139_v35  ;;  %v2034_v41 = vmul.f32 %v4271_v49, %v5723_v54  ;;  %v2036_v8 = vmul.f32 %v4273_v62, %v5727_v24  ;;  %v3393_v1 = vmul.f32 -1.442695, %v5864_v39 }
 0x241   : > { %v4279_v16 = vpop.eup %4278  ;;  %4298 = vpow2.f32 %v3377_v10  ;;  %3040 = vmatprep.mubr.bf16.mxu1 %v2141_v55  ;;  %2944 = vmatmul.mubr.bf16.gmra.mrb[100].mxu0 %v2138_v34  ;;  %v3394_v10 = vmul.f32 -1.442695, %v5859_v12  ;;  %v2035_v54 = vmul.f32 %v4275_v46, %v5731_v14  ;;  %v2037_v5 = vmul.f32 %v4277_v56, %v5735_v6 }
 0x242   : > { %v4281_v61 = vpop.eup %4280  ;;  %v2042_v4 = vmul.f32 %v4279_v16, %v5739_v17  ;;  %4300 = vpow2.f32 %v3379_v27  ;;  %3041 = vmatmul.mubr.bf16.gmra.mrb[100].mxu1 %v2140_v60 }
 0x243   : > { %v4283_v45 = vpop.eup %4282  ;;  %v2044_v25 = vmul.f32 %v4281_v61, %v5743_v50  ;;  %4302 = vpow2.f32 %v3384_v30  ;;  %v3395_v50 = vmul.f32 -1.442695, %v5872_v38  ;;  %v5903_v61 = vadd.f32 %v6350_v26, %v5601_v57 }
 0x244   : > { %v4285_v43 = vpop.eup %4284  ;;  %v2043_v17 = vmul.f32 %v4283_v45, %v5747_v33  ;;  %4304 = vpow2.f32 %v3386_v37  ;;  %v2146_v34 = vpack.c.bf16 %v2042_v4, %v2034_v41  ;;  %v6351_v41 = vld [vmem:[#allocation47_spill] sm:$0xff] }
 0x245   : > { %v5888_v23 = vpop.eup %4286  ;;  %v2045_v20 = vmul.f32 %v4285_v43, %v5757_v3  ;;  %4306 = vpow2.f32 %v3385_v52  ;;  %v2148_v24 = vpack.c.bf16 %v2044_v25, %v2036_v8  ;;  %v6349_v52 = vld [vmem:[#allocation15_spill] sm:$0xff]  ;;  %v5907_v4 = vadd.f32 %v6351_v41, %v5606_v21  ;;  %v6352_v8 = vld [vmem:[#allocation48_spill] sm:$0xff] }
 0x246   : > { %v5892_v60 = vpop.eup %4288  ;;  %4308 = vpow2.f32 %v3387_v29  ;;  %v2147_v49 = vpack.c.bf16 %v2043_v17, %v2035_v54  ;;  %v5899_v16 = vadd.f32 %v6349_v52, %v5533_v22  ;;  %v5911_v25 = vadd.f32 %v6352_v8, %v5609_v11 }
 0x247   : > { %v5895_v31 = vpop.eup %4290  ;;  %4310 = vpow2.f32 %v3392_v51  ;;  %v2149_v14 = vpack.c.bf16 %v2045_v20, %v2037_v5  ;;  %v6355_v20 = vld [vmem:[#allocation50_spill] sm:$0xff]  ;;  %v2052_v26 = vmul.f32 %v5892_v60, %v5770_v32 }
 0x248   : > { %v4293_v33 = vpop.eup %4292  ;;  %4312 = vpow2.f32 %v3394_v10  ;;  %2951 = vmatprep.mubr.bf16.mxu0 %v2147_v49 }
 0x249   : > { %v4295_v47 = vpop.eup %4294  ;;  %v1669_v36 = vadd.f32 1.0, %v4293_v33  ;;  %4314 = vpow2.f32 %v3393_v1  ;;  %3048 = vmatprep.mubr.bf16.mxu1 %v2149_v14  ;;  %2952 = vmatmul.mubr.bf16.gmra.mrb[104].mxu0 %v2146_v34  ;;  %v6353_v1 = vld [vmem:[#allocation28_spill] sm:$0xff]  ;;  %v6354_v34 = vld [vmem:[#allocation49_spill] sm:$0xff]  ;;  %v3400_v14 = vmul.f32 -1.442695, %v5899_v16 }
 0x24a   : > { %v4297_v6 = vpop.eup %4296  ;;  %v1674_v3 = vadd.f32 1.0, %v4295_v47  ;;  %4316 = vpow2.f32 %v3395_v50  ;;  %3049 = vmatmul.mubr.bf16.gmra.mrb[104].mxu1 %v2148_v24  ;;  %v5915_v43 = vadd.f32 %v6353_v1, %v5533_v22  ;;  %v5919_v5 = vadd.f32 %v6354_v34, %v5601_v57 }
 0x24b   : > { %v4299_v62 = vpop.eup %4298  ;;  %4318 = vrcp.f32 %v1669_v36  ;;  %v1676_v27 = vadd.f32 1.0, %v4297_v6  ;;  %v5923_v24 = vadd.f32 %v6355_v20, %v5606_v21  ;;  %v3402_v36 = vmul.f32 -1.442695, %v5903_v61 }
 0x24c   : > { %v4301_v53 = vpop.eup %4300  ;;  %4320 = vrcp.f32 %v1674_v3  ;;  %v1675_v35 = vadd.f32 1.0, %v4299_v62  ;;  %v3401_v6 = vmul.f32 -1.442695, %v5907_v4  ;;  %v5958_v1 = vadd.f32 %v5570_v15, %v5606_v21 }
 0x24d   : > { %v4303_v46 = vpop.eup %4302  ;;  %4322 = vrcp.f32 %v1676_v27  ;;  %v1677_v30 = vadd.f32 1.0, %v4301_v53  ;;  %v3403_v27 = vmul.f32 -1.442695, %v5911_v25  ;;  %v3408_v53 = vmul.f32 -1.442695, %v5915_v43 }
 0x24e   : > { %v4305_v48 = vpop.eup %4304  ;;  %4324 = vrcp.f32 %v1675_v35  ;;  %v1682_v55 = vadd.f32 1.0, %v4303_v46  ;;  %v3410_v46 = vmul.f32 -1.442695, %v5919_v5 }
 0x24f   : > { %v4307_v56 = vpop.eup %4306  ;;  %4326 = vrcp.f32 %v1677_v30  ;;  %v1684_v37 = vadd.f32 1.0, %v4305_v48  ;;  %v3409_v30 = vmul.f32 -1.442695, %v5923_v24  ;;  %v6356_v48 = vld [vmem:[#allocation51_spill] sm:$0xff] }
 0x250   : > { %v4309_v29 = vpop.eup %4308  ;;  %4328 = vrcp.f32 %v1682_v55  ;;  %v1683_v51 = vadd.f32 1.0, %v4307_v56  ;;  %v5934_v55 = vadd.f32 %v6356_v48, %v5609_v11 }
 0x251   : > { %v4311_v10 = vpop.eup %4310  ;;  %4330 = vrcp.f32 %v1684_v37  ;;  %v1685_v45 = vadd.f32 1.0, %v4309_v29  ;;  %v2050_v37 = vmul.f32 %v5888_v23, %v5763_v9  ;;  %v5941_v29 = vadd.f32 %v5563_v58, %v5533_v22 }
 0x252   : > { %v4313_v54 = vpop.eup %4312  ;;  %4332 = vrcp.f32 %v1683_v51  ;;  %v1690_v17 = vadd.f32 1.0, %v4311_v10  ;;  %v5948_v10 = vadd.f32 %v5568_v0, %v5601_v57  ;;  %v2051_v9 = vmul.f32 %v5895_v31, %v5776_v40 }
 0x253   : > { %v4315_v50 = vpop.eup %4314  ;;  %4334 = vrcp.f32 %v1685_v45  ;;  %v1692_v49 = vadd.f32 1.0, %v4313_v54  ;;  %v3411_v0 = vmul.f32 -1.442695, %v5934_v55  ;;  %v6357_v54 = vld [vmem:[#allocation30_spill] sm:$0xff] }
 0x254   : > { %v4317_v33 = vpop.eup %4316  ;;  %4336 = vrcp.f32 %v1690_v17  ;;  %v1691_v47 = vadd.f32 1.0, %v4315_v50  ;;  %v3418_v34 = vmul.f32 -1.442695, %v5948_v10 }
 0x255   : > { %v4319_v3 = vpop.eup %4318  ;;  %4338 = vrcp.f32 %v1692_v49  ;;  %v1693_v62 = vadd.f32 1.0, %v4317_v33 }
 0x256   : > { %v4321_v35 = vpop.eup %4320  ;;  %4340 = vrcp.f32 %v1691_v47  ;;  %v2053_v8 = vmul.f32 %v4319_v3, %v5808_v42  ;;  %v5963_v42 = vadd.f32 %v6357_v54, %v5533_v22 }
 0x257   : > { %v4323_v56 = vpop.eup %4322  ;;  %v2058_v52 = vmul.f32 %v4321_v35, %v5812_v7  ;;  %4342 = vrcp.f32 %v1693_v62 }
 0x258   : > { %v4325_v51 = vpop.eup %4324  ;;  %v2060_v41 = vmul.f32 %v4323_v56, %v5816_v2  ;;  %4344 = vpow2.f32 %v3400_v14  ;;  %v3417_v14 = vmul.f32 -1.442695, %v5958_v1 }
 0x259   : > { %v4327_v45 = vpop.eup %4326  ;;  %v2059_v7 = vmul.f32 %v4325_v51, %v5820_v44  ;;  %4346 = vpow2.f32 %v3402_v36  ;;  %v2154_v58 = vpack.c.bf16 %v2058_v52, %v2050_v37  ;;  %v3416_v44 = vmul.f32 -1.442695, %v5941_v29 }
 0x25a   : > { %v4329_v23 = vpop.eup %4328  ;;  %v2061_v32 = vmul.f32 %v4327_v45, %v5826_v63  ;;  %4348 = vpow2.f32 %v3401_v6  ;;  %v2156_v2 = vpack.c.bf16 %v2060_v41, %v2052_v26  ;;  %v3424_v6 = vmul.f32 -1.442695, %v5963_v42 }
 0x25b   : > { %v4331_v60 = vpop.eup %4330  ;;  %4350 = vpow2.f32 %v3403_v27  ;;  %v2155_v40 = vpack.c.bf16 %v2059_v7, %v2051_v9  ;;  %v2066_v50 = vmul.f32 %v4329_v23, %v5830_v18 }
 0x25c   : > { %v4333_v31 = vpop.eup %4332  ;;  %4352 = vpow2.f32 %v3408_v53  ;;  %v2157_v63 = vpack.c.bf16 %v2061_v32, %v2053_v8  ;;  %v2068_v47 = vmul.f32 %v4331_v60, %v5836_v19  ;;  %v6359_v8 = vld [vmem:[#allocation52_spill] sm:$0xff] }
 0x25d   : > { %v4335_v17 = vpop.eup %4334  ;;  %4354 = vpow2.f32 %v3410_v46  ;;  %2959 = vmatprep.mubr.bf16.mxu0 %v2155_v40  ;;  %v2067_v62 = vmul.f32 %v4333_v31, %v5840_v13  ;;  %v5983_v32 = vadd.f32 %v6359_v8, %v5601_v57 }
 0x25e   : > { %v4337_v20 = vpop.eup %4336  ;;  %4356 = vpow2.f32 %v3409_v30  ;;  %3056 = vmatprep.mubr.bf16.mxu1 %v2157_v63  ;;  %2960 = vmatmul.mubr.bf16.gmra.mrb[108].mxu0 %v2154_v58  ;;  %v2069_v53 = vmul.f32 %v4335_v17, %v5847_v59  ;;  %v6361_v63 = vld [vmem:[#allocation54_spill] sm:$0xff] }
 0x25f   : > { %v4339_v15 = vpop.eup %4338  ;;  %v2074_v49 = vmul.f32 %v4337_v20, %v5854_v28  ;;  %4358 = vpow2.f32 %v3411_v0  ;;  %3057 = vmatmul.mubr.bf16.gmra.mrb[108].mxu1 %v2156_v2  ;;  %v6360_v0 = vld [vmem:[#allocation53_spill] sm:$0xff]  ;;  %v5991_v17 = vadd.f32 %v6361_v63, %v5609_v11  ;;  %v3426_v20 = vmul.f32 -1.442695, %v5983_v32 }
 0x260   : > { %v4341_v33 = vpop.eup %4340  ;;  %v2076_v36 = vmul.f32 %v4339_v15, %v5859_v12  ;;  %4360 = vpow2.f32 %v3416_v44  ;;  %v5987_v40 = vadd.f32 %v6360_v0, %v5606_v21  ;;  %v6362_v15 = vld [vmem:[#allocation55_spill] sm:$0xff] }
 0x261   : > { %v4343_v3 = vpop.eup %4342  ;;  %v2075_v27 = vmul.f32 %v4341_v33, %v5864_v39  ;;  %4362 = vpow2.f32 %v3418_v34  ;;  %v2162_v18 = vpack.c.bf16 %v2074_v49, %v2066_v50  ;;  %v6358_v39 = vld [vmem:[#allocation29_spill] sm:$0xff]  ;;  %v5996_v50 = vadd.f32 %v6362_v15, %v5533_v22  ;;  %v6363_v33 = vld [vmem:[#allocation56_spill] sm:$0xff] }
 0x262   : > { %v4345_v28 = vpop.eup %4344  ;;  %v2077_v35 = vmul.f32 %v4343_v3, %v5872_v38  ;;  %v2164_v46 = vpack.c.bf16 %v2076_v36, %v2068_v47  ;;  %4364 = vpow2.f32 %v3417_v14  ;;  %v5978_v51 = vadd.f32 %v6358_v39, %v5609_v11  ;;  %v6364_v36 = vld [vmem:[#allocation57_spill] sm:$0xff]  ;;  %v6365_v3 = vld [vmem:[#allocation58_spill] sm:$0xff] }
 0x263   : > { %v4347_v30 = vpop.eup %4346  ;;  %v1698_v19 = vadd.f32 1.0, %v4345_v28  ;;  %v2163_v12 = vpack.c.bf16 %v2075_v27, %v2067_v62  ;;  %4366 = vpow2.f32 %v3424_v6  ;;  %v3425_v14 = vmul.f32 -1.442695, %v5987_v40  ;;  %v6366_v28 = vld [vmem:[#allocation59_spill] sm:$0xff] }
 0x264   : > { %v4349_v48 = vpop.eup %4348  ;;  %v1700_v56 = vadd.f32 1.0, %v4347_v30  ;;  %v2165_v37 = vpack.c.bf16 %v2077_v35, %v2069_v53  ;;  %v3419_v23 = vmul.f32 -1.442695, %v5978_v51  ;;  %v6001_v47 = vadd.f32 %v6363_v33, %v5601_v57  ;;  %v6367_v35 = vld [vmem:[#allocation60_spill] sm:$0xff] }
 0x265   : > { %v4351_v52 = vpop.eup %4350  ;;  %4368 = vrcp.f32 %v1698_v19  ;;  %v1699_v13 = vadd.f32 1.0, %v4349_v48  ;;  %2967 = vmatprep.mubr.bf16.mxu0 %v2163_v12  ;;  %v6005_v6 = vadd.f32 %v6364_v36, %v5606_v21  ;;  %v6009_v62 = vadd.f32 %v6365_v3, %v5609_v11 }
 0x266   : > { %v4353_v59 = vpop.eup %4352  ;;  %4370 = vrcp.f32 %v1700_v56  ;;  %v1701_v38 = vadd.f32 1.0, %v4351_v52  ;;  %3064 = vmatprep.mubr.bf16.mxu1 %v2165_v37  ;;  %2968 = vmatmul.mubr.bf16.gmra.mrb[112].mxu0 %v2162_v18  ;;  %v6013_v53 = vadd.f32 %v6366_v28, %v5533_v22  ;;  %v3427_v19 = vmul.f32 -1.442695, %v5991_v17  ;;  %v6368_v56 = vld [vmem:[#allocation61_spill] sm:$0xff] }
 0x267   : > { %v4355_v26 = vpop.eup %4354  ;;  %4372 = vrcp.f32 %v1699_v13  ;;  %v1706_v41 = vadd.f32 1.0, %v4353_v59  ;;  %3065 = vmatmul.mubr.bf16.gmra.mrb[112].mxu1 %v2164_v46  ;;  %v6017_v46 = vadd.f32 %v6367_v35, %v5601_v57  ;;  %v3432_v48 = vmul.f32 -1.442695, %v5996_v50 }
 0x268   : > { %v4357_v45 = vpop.eup %4356  ;;  %4374 = vrcp.f32 %v1701_v38  ;;  %v1708_v9 = vadd.f32 1.0, %v4355_v26  ;;  %v6023_v37 = vadd.f32 %v6368_v56, %v5606_v21  ;;  %v3434_v22 = vmul.f32 -1.442695, %v6001_v47 }
 0x269   : > { %v4359_v7 = vpop.eup %4358  ;;  %4376 = vrcp.f32 %v1706_v41  ;;  %v1707_v58 = vadd.f32 1.0, %v4357_v45  ;;  %v3433_v13 = vmul.f32 -1.442695, %v6005_v6  ;;  %v3435_v39 = vmul.f32 -1.442695, %v6009_v62  ;;  %v6369_v45 = vld [vmem:[#allocation62_spill] sm:$0xff] }
 0x26a   : > { %v4361_v2 = vpop.eup %4360  ;;  %4378 = vrcp.f32 %v1708_v9  ;;  %v1709_v60 = vadd.f32 1.0, %v4359_v7  ;;  %v3440_v59 = vmul.f32 -1.442695, %v6013_v53  ;;  %v3442_v38 = vmul.f32 -1.442695, %v6017_v46 }
 0x26b   : > { %v4363_v31 = vpop.eup %4362  ;;  %4380 = vrcp.f32 %v1707_v58  ;;  %v1714_v44 = vadd.f32 1.0, %v4361_v2  ;;  %v6034_v9 = vadd.f32 %v6369_v45, %v5609_v11  ;;  %v3441_v8 = vmul.f32 -1.442695, %v6023_v37 }
 0x26c   : > { %4382 = vrcp.f32 %v1709_v60  ;;  %v1716_v54 = vadd.f32 1.0, %v4363_v31  ;;  %v4365_v34 = vpop.eup %4364 }
 0x26d   : > { %4384 = vpow2.f32 %v3419_v23  ;;  %v4367_v49 = vpop.eup %4366  ;;  %v1715_v63 = vadd.f32 1.0, %v4365_v34 }
 0x26e   : > { %4386 = vrcp.f32 %v1714_v44  ;;  %v1722_v18 = vadd.f32 1.0, %v4367_v49 }
 0x26f   : > { %v4369_v27 = vpop.eup %4368  ;;  %4388 = vrcp.f32 %v1716_v54 }
 0x270   : > { %v4371_v30 = vpop.eup %4370  ;;  %4390 = vrcp.f32 %v1722_v18  ;;  %v2082_v41 = vmul.f32 %v4369_v27, %v5899_v16 }
 0x271   : > { %v4373_v12 = vpop.eup %4372  ;;  %4392 = vpow2.f32 %v3426_v20  ;;  %v2084_v58 = vmul.f32 %v4371_v30, %v5903_v61  ;;  %v3443_v61 = vmul.f32 -1.442695, %v6034_v9 }
 0x272   : > { %v4375_v52 = vpop.eup %4374  ;;  %4394 = vpow2.f32 %v3425_v14  ;;  %v2083_v60 = vmul.f32 %v4373_v12, %v5907_v4 }
 0x273   : > { %v4377_v57 = vpop.eup %4376  ;;  %4396 = vpow2.f32 %v3427_v19  ;;  %v2085_v31 = vmul.f32 %v4375_v52, %v5911_v25 }
 0x274   : > { %v4379_v26 = vpop.eup %4378  ;;  %v2090_v21 = vmul.f32 %v4377_v57, %v5915_v43  ;;  %4398 = vpow2.f32 %v3432_v48  ;;  %v6057_v57 = vld [vmem:[%s6215_s4] ss:$0 sm:$0xff] }
 0x275   : > { %v4381_v7 = vpop.eup %4380  ;;  %v2092_v23 = vmul.f32 %v4379_v26, %v5919_v5  ;;  %4400 = vpow2.f32 %v3434_v22 }
 0x276   : > { %v4383_v2 = vpop.eup %4382  ;;  %v2091_v16 = vmul.f32 %v4381_v7, %v5923_v24  ;;  %v2170_v43 = vpack.c.bf16 %v2090_v21, %v2082_v41  ;;  %4402 = vpow2.f32 %v3433_v13 }
 0x277   : > { %v4385_v0 = vpop.eup %4384  ;;  %v2093_v11 = vmul.f32 %v4383_v2, %v5934_v55  ;;  %v2172_v44 = vpack.c.bf16 %v2092_v23, %v2084_v58  ;;  %4404 = vpow2.f32 %v3435_v39 }
 0x278   : > { %v2171_v5 = vpack.c.bf16 %v2091_v16, %v2083_v60  ;;  %v4387_v54 = vpop.eup %4386  ;;  %4406 = vpow2.f32 %v3440_v59  ;;  %v1717_v24 = vadd.f32 1.0, %v4385_v0 }
 0x279   : > { %v2173_v20 = vpack.c.bf16 %v2093_v11, %v2085_v31  ;;  %v6044_v4 = vpop.eup %4388  ;;  %4408 = vpow2.f32 %v3442_v38  ;;  %v6047_v55 = vmul.f32 %v4387_v54, %v5941_v29 }
 0x27a   : > { %2975 = vmatprep.mubr.bf16.mxu0 %v2171_v5  ;;  %v4391_v15 = vpop.eup %4390  ;;  %4410 = vpow2.f32 %v3441_v8 }
 0x27b   : > { %3072 = vmatprep.mubr.bf16.mxu1 %v2173_v20  ;;  %2976 = vmatmul.mubr.bf16.gmra.mrb[116].mxu0 %v2170_v43  ;;  %v4393_v25 = vpop.eup %4392  ;;  %v6050_v49 = vmul.f32 %v4391_v15, %v5963_v42  ;;  %4412 = vpow2.f32 %v3443_v61 }
 0x27c   : > { %3073 = vmatmul.mubr.bf16.gmra.mrb[116].mxu1 %v2172_v44  ;;  %v4395_v34 = vpop.eup %4394  ;;  %4414 = vrcp.f32 %v1715_v63  ;;  %v1724_v14 = vadd.f32 1.0, %v4393_v25  ;;  %v2100_v63 = vmul.f32 %v6044_v4, %v5948_v10 }
 0x27d   : > { %v4397_v33 = vpop.eup %4396  ;;  %4416 = vrcp.f32 %v1717_v24  ;;  %v1723_v36 = vadd.f32 1.0, %v4395_v34  ;;  %v2178_v3 = vpack.c.bf16 %v6050_v49, %v6047_v55 }
 0x27e   : > { %v4399_v27 = vpop.eup %4398  ;;  %4418 = vrcp.f32 %v1724_v14  ;;  %v1725_v18 = vadd.f32 1.0, %v4397_v33  ;;  %v3532_v56 = vpop.f32.mrb[64].mxu0 }
 0x27f   : > { %v4401_v28 = vpop.eup %4400  ;;  %4420 = vrcp.f32 %v1723_v36  ;;  %v1730_v29 = vadd.f32 1.0, %v4399_v27  ;;  %v3596_v52 = vpop.f32.mrb[64].mxu1 }
 0x280   : > { %v4403_v35 = vpop.eup %4402  ;;  %4422 = vrcp.f32 %v1725_v18  ;;  %v1732_v42 = vadd.f32 1.0, %v4401_v28  ;;  %v3533_v39 = vpop.f32.mrb[65].mxu0 }
 0x281   : > { %v4405_v30 = vpop.eup %4404  ;;  %4424 = vrcp.f32 %v1730_v29  ;;  %v1731_v19 = vadd.f32 1.0, %v4403_v35  ;;  %v3597_v59 = vpop.f32.mrb[65].mxu1  ;;  %v3534_v41 = vadd.f32 %v3533_v39, %v3532_v56 }
 0x282   : > { %v4407_v12 = vpop.eup %4406  ;;  %4426 = vrcp.f32 %v1732_v42  ;;  %v1733_v48 = vadd.f32 1.0, %v4405_v30  ;;  %v3598_v21 = vadd.f32 %v3597_v59, %v3596_v52  ;;  %v3535_v45 = vpop.f32.mrb[66].mxu0 }
 0x283   : > { %v4409_v22 = vpop.eup %4408  ;;  %4428 = vrcp.f32 %v1731_v19  ;;  %v1738_v13 = vadd.f32 1.0, %v4407_v12  ;;  %v3599_v7 = vpop.f32.mrb[66].mxu1  ;;  %v2744_v43 = vadd.f32 %v3534_v41, %v6057_v57 }
 0x284   : > { %v4411_v38 = vpop.eup %4410  ;;  %4430 = vrcp.f32 %v1733_v48  ;;  %v1740_v26 = vadd.f32 1.0, %v4409_v22  ;;  %v3536_v8 = vpop.f32.mrb[67].mxu0 }
 0x285   : > { %v4413_v58 = vpop.eup %4412  ;;  %4432 = vrcp.f32 %v1738_v13  ;;  %v1739_v23 = vadd.f32 1.0, %v4411_v38  ;;  %v3600_v2 = vpop.f32.mrb[67].mxu1  ;;  %v3537_v0 = vadd.f32 %v3536_v8, %v3535_v45  ;;  %v6060_v61 = vadd.f32 %v3598_v21, %v2744_v43 }
 0x286   : > { %v4415_v60 = vpop.eup %4414  ;;  %4434 = vrcp.f32 %v1740_v26  ;;  %v1741_v16 = vadd.f32 1.0, %v4413_v58  ;;  %v3601_v11 = vadd.f32 %v3600_v2, %v3599_v7 }
 0x287   : > { %v4417_v31 = vpop.eup %4416  ;;  %4436 = vrcp.f32 %v1739_v23  ;;  %v2747_v5 = vadd.f32 %v3537_v0, %v6057_v57  ;;  %v2099_v15 = vmul.f32 %v4415_v60, %v5958_v1 }
 0x288   : > { %v4419_v44 = vpop.eup %4418  ;;  %4438 = vrcp.f32 %v1741_v16  ;;  %v2101_v33 = vmul.f32 %v4417_v31, %v5978_v51 }
 0x289   : > { %v4421_v54 = vpop.eup %4420  ;;  %v2108_v20 = vmul.f32 %v4419_v44, %v5983_v32  ;;  %v6068_v34 = vadd.f32 %v3601_v11, %v2747_v5 }
 0x28a   : > { %v4423_v24 = vpop.eup %4422  ;;  %v2107_v25 = vmul.f32 %v4421_v54, %v5987_v40 }
 0x28b   : > { %v4425_v14 = vpop.eup %4424  ;;  %v2109_v36 = vmul.f32 %v4423_v24, %v5991_v17  ;;  %v2180_v27 = vpack.c.bf16 %v2108_v20, %v2100_v63 }
 0x28c   : > { %v4427_v18 = vpop.eup %4426  ;;  %v2179_v28 = vpack.c.bf16 %v2107_v25, %v2099_v15  ;;  %v2114_v40 = vmul.f32 %v4425_v14, %v5996_v50 }
 0x28d   : > { %v4429_v29 = vpop.eup %4428  ;;  %v2181_v35 = vpack.c.bf16 %v2109_v36, %v2101_v33  ;;  %v2116_v4 = vmul.f32 %v4427_v18, %v6001_v47 }
 0x28e   : > { %v4431_v10 = vpop.eup %4430  ;;  %2983 = vmatprep.mubr.bf16.mxu0 %v2179_v28  ;;  %v2115_v19 = vmul.f32 %v4429_v29, %v6005_v6 }
 0x28f   : > { %v4433_v32 = vpop.eup %4432  ;;  %3080 = vmatprep.mubr.bf16.mxu1 %v2181_v35  ;;  %2984 = vmatmul.mubr.bf16.gmra.mrb[120].mxu0 %v2178_v3  ;;  %v2117_v55 = vmul.f32 %v4431_v10, %v6009_v62 }
 0x290   : > { %v4435_v1 = vpop.eup %4434  ;;  %v2122_v51 = vmul.f32 %v4433_v32, %v6013_v53  ;;  %3081 = vmatmul.mubr.bf16.gmra.mrb[120].mxu1 %v2180_v27 }
 0x291   : > { %v4437_v17 = vpop.eup %4436  ;;  %v2124_v42 = vmul.f32 %v4435_v1, %v6017_v46 }
 0x292   : > { %v4439_v30 = vpop.eup %4438  ;;  %v2123_v12 = vmul.f32 %v4437_v17, %v6023_v37  ;;  %v2186_v48 = vpack.c.bf16 %v2122_v51, %v2114_v40  ;;  %v3538_v56 = vpop.f32.mrb[68].mxu0 }
 0x293   : > { %v2125_v49 = vmul.f32 %v4439_v30, %v6034_v9  ;;  %v2188_v50 = vpack.c.bf16 %v2124_v42, %v2116_v4  ;;  %v3602_v3 = vpop.f32.mrb[68].mxu1  ;;  %v3539_v53 = vpop.f32.mrb[69].mxu0 }
 0x294   : > { %v2187_v52 = vpack.c.bf16 %v2123_v12, %v2115_v19  ;;  %v3540_v22 = vadd.f32 %v3539_v53, %v3538_v56  ;;  %v3603_v13 = vpop.f32.mrb[69].mxu1  ;;  %v3541_v47 = vpop.f32.mrb[70].mxu0 }
 0x295   : > { %v2189_v39 = vpack.c.bf16 %v2125_v49, %v2117_v55  ;;  %v3604_v46 = vadd.f32 %v3603_v13, %v3602_v3  ;;  %v3605_v59 = vpop.f32.mrb[70].mxu1  ;;  %v3542_v38 = vpop.f32.mrb[71].mxu0 }
 0x296   : > { %2991 = vmatprep.mubr.bf16.mxu0 %v2187_v52  ;;  %v2752_v6 = vadd.f32 %v3540_v22, %v6057_v57  ;;  %v3543_v37 = vadd.f32 %v3542_v38, %v3541_v47  ;;  %v3606_v26 = vpop.f32.mrb[71].mxu1 }
 0x297   : > { %3088 = vmatprep.mubr.bf16.mxu1 %v2189_v39  ;;  %2992 = vmatmul.mubr.bf16.gmra.mrb[124].mxu0 %v2186_v48  ;;  %v3607_v62 = vadd.f32 %v3606_v26, %v3605_v59 }
 0x298   : > { %3089 = vmatmul.mubr.bf16.gmra.mrb[124].mxu1 %v2188_v50  ;;  %v6084_v9 = vadd.f32 %v3604_v46, %v2752_v6  ;;  %v2755_v41 = vadd.f32 %v3543_v37, %v6057_v57 }
 0x29a   : > { %v6087_v21 = vadd.f32 %v3607_v62, %v2755_v41  ;;  %v3544_v45 = vpop.f32.mrb[72].mxu0 }
 0x29b   : > { %v3608_v7 = vpop.f32.mrb[72].mxu1  ;;  %v3545_v58 = vpop.f32.mrb[73].mxu0 }
 0x29c   : > { %v3546_v23 = vadd.f32 %v3545_v58, %v3544_v45  ;;  %v3609_v8 = vpop.f32.mrb[73].mxu1  ;;  %v3547_v2 = vpop.f32.mrb[74].mxu0 }
 0x29d   : > { %v3610_v60 = vadd.f32 %v3609_v8, %v3608_v7  ;;  %v3611_v16 = vpop.f32.mrb[74].mxu1  ;;  %v3548_v43 = vpop.f32.mrb[75].mxu0 }
 0x29e   : > { %v2760_v0 = vadd.f32 %v3546_v23, %v6057_v57  ;;  %v3549_v31 = vadd.f32 %v3548_v43, %v3547_v2  ;;  %v3612_v11 = vpop.f32.mrb[75].mxu1 }
 0x29f   : > { %v3613_v44 = vadd.f32 %v3612_v11, %v3611_v16 }
 0x2a0   : > { %v6090_v5 = vadd.f32 %v3610_v60, %v2760_v0  ;;  %v2763_v54 = vadd.f32 %v3549_v31, %v6057_v57 }
 0x2a2   : > { %v6093_v63 = vadd.f32 %v3613_v44, %v2763_v54 }
 0x2b0   : > { %v3550_v20 = vpop.f32.mrb[76].mxu0 }
 0x2b1   : > { %v3614_v24 = vpop.f32.mrb[76].mxu1  ;;  %v3551_v15 = vpop.f32.mrb[77].mxu0 }
 0x2b2   : > { %v3552_v25 = vadd.f32 %v3551_v15, %v3550_v20  ;;  %v3615_v14 = vpop.f32.mrb[77].mxu1  ;;  %v3553_v33 = vpop.f32.mrb[78].mxu0 }
 0x2b3   : > { %v3616_v36 = vadd.f32 %v3615_v14, %v3614_v24  ;;  %v3617_v27 = vpop.f32.mrb[78].mxu1  ;;  %v3554_v18 = vpop.f32.mrb[79].mxu0 }
 0x2b4   : > { %v2768_v28 = vadd.f32 %v3552_v25, %v6057_v57  ;;  %v3555_v29 = vadd.f32 %v3554_v18, %v3553_v33  ;;  %v3618_v35 = vpop.f32.mrb[79].mxu1 }
 0x2b5   : > { %v3619_v10 = vadd.f32 %v3618_v35, %v3617_v27 }
 0x2b6   : > { %v6096_v32 = vadd.f32 %v3616_v36, %v2768_v28  ;;  %v2771_v1 = vadd.f32 %v3555_v29, %v6057_v57 }
 0x2b8   : > { %v6099_v40 = vadd.f32 %v3619_v10, %v2771_v1  ;;  %v3556_v51 = vpop.f32.mrb[80].mxu0 }
 0x2b9   : > { %v3557_v17 = vpop.f32.mrb[81].mxu0 }
 0x2ba   : > { %v3558_v4 = vadd.f32 %v3557_v17, %v3556_v51  ;;  %v3559_v42 = vpop.f32.mrb[82].mxu0 }
 0x2bb   : > { %v3560_v30 = vpop.f32.mrb[83].mxu0 }
 0x2bc   : > { %v3561_v19 = vadd.f32 %v3560_v30, %v3559_v42  ;;  %v2776_v48 = vadd.f32 %v3558_v4, %v6057_v57 }
 0x2be   : > { %v2779_v50 = vadd.f32 %v3561_v19, %v6057_v57 }
 0x2c7   : > { %v3620_v12 = vpop.f32.mrb[80].mxu1 }
 0x2c8   : > { %v3621_v56 = vpop.f32.mrb[81].mxu1 }
 0x2c9   : > { %v3622_v55 = vadd.f32 %v3621_v56, %v3620_v12  ;;  %v3623_v49 = vpop.f32.mrb[82].mxu1 }
 0x2ca   : > { %v3624_v3 = vpop.f32.mrb[83].mxu1 }
 0x2cb   : > { %v6103_v53 = vadd.f32 %v3622_v55, %v2776_v48  ;;  %v3625_v52 = vadd.f32 %v3624_v3, %v3623_v49 }
 0x2cd   : > { %v6105_v22 = vadd.f32 %v3625_v52, %v2779_v50  ;;  %v3562_v13 = vpop.f32.mrb[84].mxu0 }
 0x2ce   : > { %v3563_v39 = vpop.f32.mrb[85].mxu0 }
 0x2cf   : > { %v3626_v47 = vpop.f32.mrb[84].mxu1  ;;  %v3564_v46 = vadd.f32 %v3563_v39, %v3562_v13  ;;  %v3565_v38 = vpop.f32.mrb[86].mxu0 }
 0x2d0   : > { %v3627_v59 = vpop.f32.mrb[85].mxu1  ;;  %v3566_v26 = vpop.f32.mrb[87].mxu0 }
 0x2d1   : > { %v3628_v6 = vadd.f32 %v3627_v59, %v3626_v47  ;;  %v3629_v37 = vpop.f32.mrb[86].mxu1  ;;  %v2784_v62 = vadd.f32 %v3564_v46, %v6057_v57  ;;  %v3567_v41 = vadd.f32 %v3566_v26, %v3565_v38 }
 0x2d2   : > { %v3630_v45 = vpop.f32.mrb[87].mxu1 }
 0x2d3   : > { %v3631_v7 = vadd.f32 %v3630_v45, %v3629_v37  ;;  %v6108_v58 = vadd.f32 %v3628_v6, %v2784_v62  ;;  %v2787_v23 = vadd.f32 %v3567_v41, %v6057_v57 }
 0x2d5   : > { %v6111_v8 = vadd.f32 %v3631_v7, %v2787_v23 }
 0x2e2   : > { %v3568_v2 = vpop.f32.mrb[88].mxu0 }
 0x2e3   : > { %v3632_v60 = vpop.f32.mrb[88].mxu1  ;;  %v3569_v16 = vpop.f32.mrb[89].mxu0 }
 0x2e4   : > { %v3570_v43 = vadd.f32 %v3569_v16, %v3568_v2  ;;  %v3633_v0 = vpop.f32.mrb[89].mxu1  ;;  %v3571_v31 = vpop.f32.mrb[90].mxu0 }
 0x2e5   : > { %v3634_v11 = vadd.f32 %v3633_v0, %v3632_v60  ;;  %v3635_v44 = vpop.f32.mrb[90].mxu1  ;;  %v3572_v54 = vpop.f32.mrb[91].mxu0 }
 0x2e6   : > { %v2792_v20 = vadd.f32 %v3570_v43, %v6057_v57  ;;  %v3573_v24 = vadd.f32 %v3572_v54, %v3571_v31  ;;  %v3636_v15 = vpop.f32.mrb[91].mxu1 }
 0x2e7   : > { %v3637_v25 = vadd.f32 %v3636_v15, %v3635_v44 }
 0x2e8   : > { %v6114_v14 = vadd.f32 %v3634_v11, %v2792_v20  ;;  %v2795_v33 = vadd.f32 %v3573_v24, %v6057_v57 }
 0x2ea   : > { %v6117_v36 = vadd.f32 %v3637_v25, %v2795_v33  ;;  %v3574_v27 = vpop.f32.mrb[92].mxu0 }
 0x2eb   : > { %v3638_v18 = vpop.f32.mrb[92].mxu1  ;;  %v3575_v28 = vpop.f32.mrb[93].mxu0 }
 0x2ec   : > { %v3576_v29 = vadd.f32 %v3575_v28, %v3574_v27  ;;  %v3639_v35 = vpop.f32.mrb[93].mxu1  ;;  %v3577_v10 = vpop.f32.mrb[94].mxu0 }
 0x2ed   : > { %v3640_v1 = vadd.f32 %v3639_v35, %v3638_v18  ;;  %v3641_v51 = vpop.f32.mrb[94].mxu1  ;;  %v3578_v17 = vpop.f32.mrb[95].mxu0 }
 0x2ee   : > { %v2800_v4 = vadd.f32 %v3576_v29, %v6057_v57  ;;  %v3579_v42 = vadd.f32 %v3578_v17, %v3577_v10  ;;  %v3642_v30 = vpop.f32.mrb[95].mxu1 }
 0x2ef   : > { %v3643_v19 = vadd.f32 %v3642_v30, %v3641_v51 }
 0x2f0   : > { %v6120_v12 = vadd.f32 %v3640_v1, %v2800_v4  ;;  %v2803_v48 = vadd.f32 %v3579_v42, %v6057_v57 }
 0x2f2   : > { %v6123_v56 = vadd.f32 %v3643_v19, %v2803_v48 }
 0x2ff   : > { %v3660_v55 = vpop.f32.mrb[96].mxu0 }
 0x300   : > { %v3724_v49 = vpop.f32.mrb[96].mxu1  ;;  %v3661_v50 = vpop.f32.mrb[97].mxu0 }
 0x301   : > { %v3662_v3 = vadd.f32 %v3661_v50, %v3660_v55  ;;  %v3725_v52 = vpop.f32.mrb[97].mxu1  ;;  %v3663_v13 = vpop.f32.mrb[98].mxu0 }
 0x302   : > { %v3726_v47 = vadd.f32 %v3725_v52, %v3724_v49  ;;  %v3727_v39 = vpop.f32.mrb[98].mxu1  ;;  %v3664_v46 = vpop.f32.mrb[99].mxu0 }
 0x303   : > { %v2938_v59 = vadd.f32 %v3662_v3, %v6060_v61  ;;  %v3665_v38 = vadd.f32 %v3664_v46, %v3663_v13  ;;  %v3728_v6 = vpop.f32.mrb[99].mxu1 }
 0x304   : > { %v3729_v37 = vadd.f32 %v3728_v6, %v3727_v39 }
 0x305   : > { %v3035_v26 = vadd.f32 %v3726_v47, %v2938_v59  ;;  %v2941_v57 = vadd.f32 %v3665_v38, %v6068_v34 }
 0x307   : > { %3097 = vst [vmem:[%s6128_s14] sm:$0xff] %v3035_v26  ;;  %v3038_v62 = vadd.f32 %v3729_v37, %v2941_v57 }
 0x309   : > { %3098 = vst [vmem:[%s6128_s14 + $0x8] sm:$0xff] %v3038_v62 }
 0x314   : > { %v3666_v41 = vpop.f32.mrb[100].mxu0 }
 0x315   : > { %v3730_v45 = vpop.f32.mrb[100].mxu1  ;;  %v3667_v7 = vpop.f32.mrb[101].mxu0 }
 0x316   : > { %v3668_v23 = vadd.f32 %v3667_v7, %v3666_v41  ;;  %v3731_v2 = vpop.f32.mrb[101].mxu1  ;;  %v3669_v61 = vpop.f32.mrb[102].mxu0 }
 0x317   : > { %v3732_v60 = vadd.f32 %v3731_v2, %v3730_v45  ;;  %v3733_v16 = vpop.f32.mrb[102].mxu1  ;;  %v3670_v43 = vpop.f32.mrb[103].mxu0 }
 0x318   : > { %v2946_v34 = vadd.f32 %v3668_v23, %v6084_v9  ;;  %v3671_v0 = vadd.f32 %v3670_v43, %v3669_v61  ;;  %v3734_v31 = vpop.f32.mrb[103].mxu1 }
 0x319   : > { %v3735_v11 = vadd.f32 %v3734_v31, %v3733_v16 }
 0x31a   : > { %v3043_v44 = vadd.f32 %v3732_v60, %v2946_v34  ;;  %v2949_v54 = vadd.f32 %v3671_v0, %v6087_v21 }
 0x31c   : > { %3099 = vst [vmem:[%s6128_s14 + $0x10] sm:$0xff] %v3043_v44  ;;  %v3046_v20 = vadd.f32 %v3735_v11, %v2949_v54  ;;  %v3672_v24 = vpop.f32.mrb[104].mxu0 }
 0x31d   : > { %v3736_v15 = vpop.f32.mrb[104].mxu1  ;;  %v3673_v25 = vpop.f32.mrb[105].mxu0 }
 0x31e   : > { %3100 = vst [vmem:[%s6128_s14 + $0x18] sm:$0xff] %v3046_v20  ;;  %v3674_v33 = vadd.f32 %v3673_v25, %v3672_v24  ;;  %v3737_v27 = vpop.f32.mrb[105].mxu1  ;;  %v3675_v18 = vpop.f32.mrb[106].mxu0 }
 0x31f   : > { %v3738_v28 = vadd.f32 %v3737_v27, %v3736_v15  ;;  %v3739_v29 = vpop.f32.mrb[106].mxu1  ;;  %v3676_v9 = vpop.f32.mrb[107].mxu0 }
 0x320   : > { %v2954_v35 = vadd.f32 %v3674_v33, %v6090_v5  ;;  %v3677_v10 = vadd.f32 %v3676_v9, %v3675_v18  ;;  %v3740_v1 = vpop.f32.mrb[107].mxu1 }
 0x321   : > { %v3741_v51 = vadd.f32 %v3740_v1, %v3739_v29 }
 0x322   : > { %v3051_v21 = vadd.f32 %v3738_v28, %v2954_v35  ;;  %v2957_v17 = vadd.f32 %v3677_v10, %v6093_v63 }
 0x324   : > { %3101 = vst [vmem:[%s6128_s14 + $0x20] sm:$0xff] %v3051_v21  ;;  %v3054_v4 = vadd.f32 %v3741_v51, %v2957_v17 }
 0x326   : > { %3102 = vst [vmem:[%s6128_s14 + $0x28] sm:$0xff] %v3054_v4 }
 0x331   : > { %v3678_v42 = vpop.f32.mrb[108].mxu0 }
 0x332   : > { %v3742_v30 = vpop.f32.mrb[108].mxu1  ;;  %v3679_v19 = vpop.f32.mrb[109].mxu0 }
 0x333   : > { %v3680_v48 = vadd.f32 %v3679_v19, %v3678_v42  ;;  %v3743_v55 = vpop.f32.mrb[109].mxu1  ;;  %v3681_v49 = vpop.f32.mrb[110].mxu0 }
 0x334   : > { %v3744_v50 = vadd.f32 %v3743_v55, %v3742_v30  ;;  %v3745_v3 = vpop.f32.mrb[110].mxu1  ;;  %v3682_v5 = vpop.f32.mrb[111].mxu0 }
 0x335   : > { %v2962_v52 = vadd.f32 %v3680_v48, %v6096_v32  ;;  %v3683_v13 = vadd.f32 %v3682_v5, %v3681_v49  ;;  %v3746_v47 = vpop.f32.mrb[111].mxu1 }
 0x336   : > { %v3747_v39 = vadd.f32 %v3746_v47, %v3745_v3 }
 0x337   : > { %v3059_v63 = vadd.f32 %v3744_v50, %v2962_v52  ;;  %v2965_v46 = vadd.f32 %v3683_v13, %v6099_v40 }
 0x339   : > { %3103 = vst [vmem:[%s6128_s14 + $0x30] sm:$0xff] %v3059_v63  ;;  %v3062_v59 = vadd.f32 %v3747_v39, %v2965_v46  ;;  %v3684_v38 = vpop.f32.mrb[112].mxu0 }
 0x33a   : > { %v3748_v6 = vpop.f32.mrb[112].mxu1  ;;  %v3685_v37 = vpop.f32.mrb[113].mxu0 }
 0x33b   : > { %3104 = vst [vmem:[%s6128_s14 + $0x38] sm:$0xff] %v3062_v59  ;;  %v3686_v26 = vadd.f32 %v3685_v37, %v3684_v38  ;;  %v3749_v57 = vpop.f32.mrb[113].mxu1  ;;  %v3687_v62 = vpop.f32.mrb[114].mxu0 }
 0x33c   : > { %v3750_v41 = vadd.f32 %v3749_v57, %v3748_v6  ;;  %v3751_v45 = vpop.f32.mrb[114].mxu1  ;;  %v3688_v32 = vpop.f32.mrb[115].mxu0 }
 0x33d   : > { %v2970_v7 = vadd.f32 %v3686_v26, %v6103_v53  ;;  %v3689_v23 = vadd.f32 %v3688_v32, %v3687_v62  ;;  %v3752_v2 = vpop.f32.mrb[115].mxu1 }
 0x33e   : > { %v3753_v61 = vadd.f32 %v3752_v2, %v3751_v45 }
 0x33f   : > { %v3067_v40 = vadd.f32 %v3750_v41, %v2970_v7  ;;  %v2973_v60 = vadd.f32 %v3689_v23, %v6105_v22 }
 0x341   : > { %3105 = vst [vmem:[%s6128_s14 + $0x40] sm:$0xff] %v3067_v40  ;;  %v3070_v16 = vadd.f32 %v3753_v61, %v2973_v60 }
 0x343   : > { %3106 = vst [vmem:[%s6128_s14 + $0x48] sm:$0xff] %v3070_v16 }
 0x34e   : > { %v3690_v43 = vpop.f32.mrb[116].mxu0 }
 0x34f   : > { %v3754_v34 = vpop.f32.mrb[116].mxu1  ;;  %v3691_v0 = vpop.f32.mrb[117].mxu0 }
 0x350   : > { %v3692_v31 = vadd.f32 %v3691_v0, %v3690_v43  ;;  %v3755_v11 = vpop.f32.mrb[117].mxu1  ;;  %v3693_v44 = vpop.f32.mrb[118].mxu0 }
 0x351   : > { %v3756_v54 = vadd.f32 %v3755_v11, %v3754_v34  ;;  %v3757_v20 = vpop.f32.mrb[118].mxu1  ;;  %v3694_v53 = vpop.f32.mrb[119].mxu0 }
 0x352   : > { %v2978_v24 = vadd.f32 %v3692_v31, %v6108_v58  ;;  %v3695_v15 = vadd.f32 %v3694_v53, %v3693_v44  ;;  %v3758_v25 = vpop.f32.mrb[119].mxu1 }
 0x353   : > { %v3759_v33 = vadd.f32 %v3758_v25, %v3757_v20 }
 0x354   : > { %v3075_v22 = vadd.f32 %v3756_v54, %v2978_v24  ;;  %v2981_v27 = vadd.f32 %v3695_v15, %v6111_v8 }
 0x356   : > { %3107 = vst [vmem:[%s6128_s14 + $0x50] sm:$0xff] %v3075_v22  ;;  %v3078_v18 = vadd.f32 %v3759_v33, %v2981_v27 }
 0x358   : > { %3108 = vst [vmem:[%s6128_s14 + $0x58] sm:$0xff] %v3078_v18 }
 0x362   : > { %v3696_v28 = vpop.f32.mrb[120].mxu0 }
 0x363   : > { %v3760_v29 = vpop.f32.mrb[120].mxu1  ;;  %v3697_v9 = vpop.f32.mrb[121].mxu0 }
 0x364   : > { %v3698_v35 = vadd.f32 %v3697_v9, %v3696_v28  ;;  %v3761_v10 = vpop.f32.mrb[121].mxu1  ;;  %v3699_v1 = vpop.f32.mrb[122].mxu0 }
 0x365   : > { %v3762_v51 = vadd.f32 %v3761_v10, %v3760_v29  ;;  %v3763_v21 = vpop.f32.mrb[122].mxu1  ;;  %v3700_v58 = vpop.f32.mrb[123].mxu0 }
 0x366   : > { %v2986_v17 = vadd.f32 %v3698_v35, %v6114_v14  ;;  %v3701_v4 = vadd.f32 %v3700_v58, %v3699_v1  ;;  %v3764_v42 = vpop.f32.mrb[123].mxu1 }
 0x367   : > { %v3765_v30 = vadd.f32 %v3764_v42, %v3763_v21 }
 0x368   : > { %v3083_v8 = vadd.f32 %v3762_v51, %v2986_v17  ;;  %v2989_v19 = vadd.f32 %v3701_v4, %v6117_v36 }
 0x36a   : > { %3109 = vst [vmem:[%s6128_s14 + $0x60] sm:$0xff] %v3083_v8  ;;  %v3086_v48 = vadd.f32 %v3765_v30, %v2989_v19  ;;  %v3702_v55 = vpop.f32.mrb[124].mxu0 }
 0x36b   : > { %v3766_v49 = vpop.f32.mrb[124].mxu1  ;;  %v3703_v50 = vpop.f32.mrb[125].mxu0 }
 0x36c   : > { %3110 = vst [vmem:[%s6128_s14 + $0x68] sm:$0xff] %v3086_v48  ;;  %v3704_v3 = vadd.f32 %v3703_v50, %v3702_v55  ;;  %v3767_v5 = vpop.f32.mrb[125].mxu1  ;;  %v3705_v52 = vpop.f32.mrb[126].mxu0 }
 0x36d   : > { %v3768_v14 = vadd.f32 %v3767_v5, %v3766_v49  ;;  %v3769_v13 = vpop.f32.mrb[126].mxu1  ;;  %v3706_v47 = vpop.f32.mrb[127].mxu0 }
 0x36e   : > { %v2994_v39 = vadd.f32 %v3704_v3, %v6120_v12  ;;  %v3707_v36 = vadd.f32 %v3706_v47, %v3705_v52  ;;  %v3770_v63 = vpop.f32.mrb[127].mxu1 }
 0x36f   : > { %v3771_v46 = vadd.f32 %v3770_v63, %v3769_v13 }
 0x370   : > { %v3091_v59 = vadd.f32 %v3768_v14, %v2994_v39  ;;  %v2997_v38 = vadd.f32 %v3707_v36, %v6123_v56 }
 0x372   : > { %3111 = vst [vmem:[%s6128_s14 + $0x70] sm:$0xff] %v3091_v59  ;;  %v3094_v12 = vadd.f32 %v3771_v46, %v2997_v38 }
 0x374   : > { %3112 = vst [vmem:[%s6128_s14 + $0x78] sm:$0xff] %v3094_v12 }
 0x375   : > { %4568 = shalt.err (!%p4565_p4)
}
 0x376   : > { %s4569_s9 = scalar_lea.hbm %s6163_s30, 2048  ;;  %s4573_s26 = scalar_lea.hbm %s6216_s5, 4096 }
 0x377   : > { %p4570_p9 = scmp.ne.s32.totalorder %s6163_s30, %s4569_s9  ;;  %p4574_p8 = scmp.lt.u32.totalorder %s6163_s30, %s6216_s5 }
 0x378   : > { %p4575_p13 = scmp.lt.u32.totalorder %s4573_s26, %s4569_s9  ;;  %p4577_p10 = scmp.lt.u32.totalorder %s4569_s9, %s6163_s30 }
 0x379   : > { %p4571_p0 = pnand %p4570_p9, %p4821_p5 }
 0x37a   : > { %p4576_p6 = por %p4575_p13, %p4574_p8 }
 0x37b   : > { %p4572_p11 = pneg %p4571_p0 }
 0x37c   : > { %p4578_p3 = por %p4577_p10, %p4576_p6 }
 0x37e   : > { %p4579_p7 = pnand %p4578_p3, %p4572_p11 }
 0x380   : > { %4582 = shalt.err (!%p4579_p7)
}
 0x381   : > { %s4641_s11 = smov 128   ;;  %s4642_s15 = smov 8  }
 0x382   : > { %3786 = dma.vmem_to_hbm [thread:$0]  (%p4821_p5), %s6165_s13, 2048, %s6163_s30, %s3114_s12, %s4641_s11, %s4641_s11, %s4642_s15  }
 0x383 PF: > { %s3142_s16 = sand.u32 1, %s4617_s18   ;;  %p6370_p12 = scmp.ne.s32.totalorder %s6226_s25, 0 }
 0x384   : > { %p6371_p2 = scmp.ge.s32.totalorder %s4629_s21, 2  ;;  %s3143_s22 = scalar_lea.sflag [#allocation4], %s3142_s16 }
 0x386   : > { %p3803_p1 = pnand %p6371_p2, %p6370_p12 }
 0x388   : > { %4612 = dma.done.wait (!%p3803_p1), %s3143_s22, 2048  }
 0x389   : > { %4614 = vsyncadd (!%p3803_p1), %s3143_s22, 4294965248  ;;  %p20_p4 = scmp.ge.s32.totalorder %s4807_s28, 4   ;;  %s6372_s18 = smov %s4621_s19 }
 0x38a   : > { %s6373_s19 = smov %s4625_s20  ;;  %s6374_s20 = smov %s4817_s27 }
 0x38b   : > { %s6375_s21 = smov %s4807_s28  ;;  %22 = sbr.rel (!%p20_p4) target bundleno = 7 (0x7), region = 97 }
 0x392   :  { %3148 = vsyncpa [#allocation3], 1 }
 0x393   :  { %3150 = vsyncpa [#allocation3 + $0x1], 1 }
 0x394   :  { %3151 = vsyncpa [#allocation6], 1 }
 0x395   :  { %3152 = vsyncpa [#allocation9], 1 }
 0x396   :  { %3153 = vsyncpa [#allocation4], 1 }
 0x397   :  { %3155 = vsyncpa [#allocation4 + $0x1], 1 }

</bundles_post_ra>
